<compile_context>
chip_gen: v5e
topology: v5e:2x2
jax: 0.10.0
libtpu: 0.0.40
codegen_flags: <defaults>
</compile_context>

<pallas_src>
import jax
import jax.numpy as jnp
from jax.experimental import pallas as pl
from jax.experimental.pallas import tpu as pltpu


# ----------------------------------------------------------------------------
# GRU cell step (shared by all kernels)
# ----------------------------------------------------------------------------
def _gru_step(gi, h, wh, bhn, m, H):
    """One GRU cell update with pack/pad length masking.

    gi : (N, 3H) f32  hoisted input projection (b_ih and b_hh[r,z] folded in)
    h  : (N, H)  f32  previous hidden state
    wh : (H, 3H) bf16 fused [r|z|n] hidden weights
    bhn: (N, H)  f32  pre-broadcast b_hn
    m  : (N, 1)  f32  1.0 where t < length else 0.0
    """
    gh = jnp.dot(h.astype(wh.dtype), wh, preferred_element_type=jnp.float32)  # (N,3H)
    # fused r|z sigmoid: one EUP issue instead of two
    rz = jax.nn.sigmoid(gi[:, 0:2 * H] + gh[:, 0:2 * H])
    n = jnp.tanh(gi[:, 2 * H:3 * H] + rz[:, 0:H] * (gh[:, 2 * H:3 * H] + bhn))
    # (1-z)*n + z*h  ==  n + z*(h-n)
    h_new = n + rz[:, H:2 * H] * (h - n)
    mb = jnp.broadcast_to(m, (h.shape[0], H))          # broadcast once, use twice
    out = mb * h_new                                    # zero past sequence end
    h_next = h + mb * (h_new - h)                       # freeze state past end
    return h_next, out


# ----------------------------------------------------------------------------
# Generic single-layer bidirectional GRU kernel (used by the utterance
# encoder and by leading layers of multi-layer stacks).
# ----------------------------------------------------------------------------
def make_bigru_kernel(T, N, H, batch_major_out):
    G = 3 * H

    def kernel(mask_ref, x_ref, wi_ref, bi_ref, whf_ref, whb_ref, bhn_ref,
               out_ref, gi_ref):
        # Hoisted fused input projection for BOTH directions: one MXU pass.
        gi_ref[...] = (jnp.dot(x_ref[...], wi_ref[...],
                               preferred_element_type=jnp.float32) + bi_ref[...])
        whf = whf_ref[...]
        whb = whb_ref[...]
        bhn_f = jnp.broadcast_to(bhn_ref[:, 0:H], (N, H))
        bhn_b = jnp.broadcast_to(bhn_ref[:, H:2 * H], (N, H))
        hf = jnp.zeros((N, H), jnp.float32)
        hb = jnp.zeros((N, H), jnp.float32)
        odt = out_ref.dtype
        # Interleaved fwd/bwd recurrence (independent chains -> latency hiding).
        # T is small & static here; switch to fori_loop(unroll=True) at real T.
        for i in range(T):
            tf, tb = i, T - 1 - i
            mf = mask_ref[tf * N:(tf + 1) * N, :]
            mb = mask_ref[tb * N:(tb + 1) * N, :]
            hf, of = _gru_step(gi_ref[tf * N:(tf + 1) * N, 0:G], hf, whf, bhn_f, mf, H)
            hb, ob = _gru_step(gi_ref[tb * N:(tb + 1) * N, G:2 * G], hb, whb, bhn_b, mb, H)
            if batch_major_out:
                # fused (N, T*2H) slab: downstream (B, C, T*2H) is a pure reshape
                out_ref[:, tf * 2 * H:tf * 2 * H + H] = of.astype(odt)
                out_ref[:, tb * 2 * H + H:(tb + 1) * 2 * H] = ob.astype(odt)
            else:
                # time-major flattened (T*N, 2H): directly the next layer's input
                out_ref[tf * N:(tf + 1) * N, 0:H] = of.astype(odt)
                out_ref[tb * N:(tb + 1) * N, H:2 * H] = ob.astype(odt)

    return kernel


def bigru_call(x2d, mask, p, T, N, *, batch_major_out=False):
    """x2d: (T*N, E) bf16 time-major flattened. Returns bf16 fused output."""
    H = p['whf'].shape[0]
    if batch_major_out:
        out_shape = jax.ShapeDtypeStruct((N, T * 2 * H), jnp.bfloat16)
    else:
        out_shape = jax.ShapeDtypeStruct((T * N, 2 * H), jnp.bfloat16)
    return pl.pallas_call(
        make_bigru_kernel(T, N, H, batch_major_out),
        out_shape=out_shape,
        scratch_shapes=[pltpu.VMEM((T * N, 6 * H), jnp.float32)],
    )(mask, x2d, p['wi'], p['bi'], p['whf'], p['whb'], p['bhn'])


# ----------------------------------------------------------------------------
# Fused DA-GRU + context-GRU + fc1 kernel (one pallas_call, four interleaved
# recurrent chains over the same conversation mask, fc epilogue on the MXU).
# ----------------------------------------------------------------------------
def make_da_ctx_fc_kernel(T, B, Hd, Hc):
    Gd, Gc = 3 * Hd, 3 * Hc

    def kernel(mask_ref, xd_ref, xc_ref,
               wi_d_ref, bi_d_ref, whf_d_ref, whb_d_ref, bhn_d_ref,
               wi_c_ref, bi_c_ref, whf_c_ref, whb_c_ref, bhn_c_ref,
               fcw_ref, fcb_ref,
               da_out_ref, logits_ref,
               gid_ref, gic_ref, ctx_ref):
        # Hoisted input projections (one MXU pass per encoder, both directions).
        gid_ref[...] = (jnp.dot(xd_ref[...], wi_d_ref[...],
                                preferred_element_type=jnp.float32) + bi_d_ref[...])
        gic_ref[...] = (jnp.dot(xc_ref[...], wi_c_ref[...],
                                preferred_element_type=jnp.float32) + bi_c_ref[...])
        whf_d = whf_d_ref[...]
        whb_d = whb_d_ref[...]
        whf_c = whf_c_ref[...]
        whb_c = whb_c_ref[...]
        bhn_fd = jnp.broadcast_to(bhn_d_ref[:, 0:Hd], (B, Hd))
        bhn_bd = jnp.broadcast_to(bhn_d_ref[:, Hd:2 * Hd], (B, Hd))
        bhn_fc = jnp.broadcast_to(bhn_c_ref[:, 0:Hc], (B, Hc))
        bhn_bc = jnp.broadcast_to(bhn_c_ref[:, Hc:2 * Hc], (B, Hc))
        hfd = jnp.zeros((B, Hd), jnp.float32)
        hbd = jnp.zeros((B, Hd), jnp.float32)
        hfc = jnp.zeros((B, Hc), jnp.float32)
        hbc = jnp.zeros((B, Hc), jnp.float32)
        # Four independent chains interleaved per step: da fwd/bwd + ctx fwd/bwd.
        for i in range(T):
            tf, tb = i, T - 1 - i
            mf = mask_ref[tf * B:(tf + 1) * B, :]
            mb = mask_ref[tb * B:(tb + 1) * B, :]
            hfd, ofd = _gru_step(gid_ref[tf * B:(tf + 1) * B, 0:Gd], hfd, whf_d, bhn_fd, mf, Hd)
            hfc, ofc = _gru_step(gic_ref[tf * B:(tf + 1) * B, 0:Gc], hfc, whf_c, bhn_fc, mf, Hc)
            hbd, obd = _gru_step(gid_ref[tb * B:(tb + 1) * B, Gd:2 * Gd], hbd, whb_d, bhn_bd, mb, Hd)
            hbc, obc = _gru_step(gic_ref[tb * B:(tb + 1) * B, Gc:2 * Gc], hbc, whb_c, bhn_bc, mb, Hc)
            da_out_ref[tf * B:(tf + 1) * B, 0:Hd] = ofd
            da_out_ref[tb * B:(tb + 1) * B, Hd:2 * Hd] = obd
            ctx_ref[tf * B:(tf + 1) * B, 0:Hc] = ofc.astype(jnp.bfloat16)
            ctx_ref[tb * B:(tb + 1) * B, Hc:2 * Hc] = obc.astype(jnp.bfloat16)
        # fc1 fused epilogue: (T*B, 2Hc) @ (2Hc, L) -> logits, no HBM round-trip
        # for the context-GRU outputs.
        logits_ref[...] = (jnp.dot(ctx_ref[...], fcw_ref[...],
                                   preferred_element_type=jnp.float32) + fcb_ref[...])

    return kernel


def da_ctx_fc(xd2d, xc2d, mask, da_p, ctx_p, fcw, fcb, T, B):
    Hd = da_p['whf'].shape[0]
    Hc = ctx_p['whf'].shape[0]
    L = fcw.shape[1]
    da_out, logits = pl.pallas_call(
        make_da_ctx_fc_kernel(T, B, Hd, Hc),
        out_shape=(jax.ShapeDtypeStruct((T * B, 2 * Hd), jnp.float32),
                   jax.ShapeDtypeStruct((T * B, L), jnp.float32)),
        scratch_shapes=[pltpu.VMEM((T * B, 6 * Hd), jnp.float32),
                        pltpu.VMEM((T * B, 6 * Hc), jnp.float32),
                        pltpu.VMEM((T * B, 2 * Hc), jnp.bfloat16)],
    )(mask, xd2d, xc2d,
      da_p['wi'], da_p['bi'], da_p['whf'], da_p['whb'], da_p['bhn'],
      ctx_p['wi'], ctx_p['bi'], ctx_p['whf'], ctx_p['whb'], ctx_p['bhn'],
      fcw, fcb)
    return da_out.reshape(T, B, 2 * Hd), logits.reshape(T, B, L)


# ----------------------------------------------------------------------------
# Helpers
# ----------------------------------------------------------------------------
def _length_mask(lengths, T):
    """(T*N, 1) f32 time-major flattened mask: 1.0 where t < length."""
    t = jnp.arange(T, dtype=jnp.int32)
    m = (t[:, None] < lengths.astype(jnp.int32)[None, :]).astype(jnp.float32)  # (T, N)
    return m.reshape(T * lengths.shape[0], 1)


# ----------------------------------------------------------------------------
# Parameter init (deterministic, synthetic) — fused [r|z|n], fwd|bwd packed
# ----------------------------------------------------------------------------
def _init_bigru_layer(key, in_dim, hid):
    ks = jax.random.split(key, 8)
    s = 0.1

    def nrm(k, shape):
        return jax.random.normal(k, shape, jnp.float32) * s

    wi_f, wi_b = nrm(ks[0], (in_dim, 3 * hid)), nrm(ks[1], (in_dim, 3 * hid))
    wh_f, wh_b = nrm(ks[2], (hid, 3 * hid)), nrm(ks[3], (hid, 3 * hid))
    bi_f, bi_b = nrm(ks[4], (1, 3 * hid)), nrm(ks[5], (1, 3 * hid))
    bh_f, bh_b = nrm(ks[6], (1, 3 * hid)), nrm(ks[7], (1, 3 * hid))

    def fold(bi, bh):   # fold b_hh[r,z] into the hoisted input bias
        return jnp.concatenate([bi[:, :2 * hid] + bh[:, :2 * hid], bi[:, 2 * hid:]], axis=1)

    return dict(
        wi=jnp.concatenate([wi_f, wi_b], axis=1).astype(jnp.bfloat16),     # (E, 6H)
        bi=jnp.concatenate([fold(bi_f, bh_f), fold(bi_b, bh_b)], axis=1),  # (1, 6H) f32
        whf=wh_f.astype(jnp.bfloat16),                                     # (H, 3H)
        whb=wh_b.astype(jnp.bfloat16),                                     # (H, 3H)
        bhn=jnp.concatenate([bh_f[:, 2 * hid:], bh_b[:, 2 * hid:]], axis=1),  # (1, 2H) f32
    )


def _init_bigru(key, in_dim, hid, num_layers):
    layers = []
    d = in_dim
    for _ in range(num_layers):
        key, kl = jax.random.split(key)
        layers.append(_init_bigru_layer(kl, d, hid))
        d = 2 * hid
    return layers


def init_weights(key, *, vocab, tags, e_utt, h_utt, e_da, h_da,
                 spk_dim, ctx_in, h_ctx, num_labels, num_layers=1):
    keys = jax.random.split(key, 8)
    spk = jax.random.normal(keys[0], (3, spk_dim), jnp.float32) * 0.1
    spk = spk.at[0].set(0.0)                                   # padding_idx=0
    return dict(
        # tables stored bf16: gather output feeds the bf16 MXU path directly
        speaker_embedding=spk.astype(jnp.bfloat16),
        utt_embedding=(jax.random.normal(keys[1], (vocab, e_utt), jnp.float32) * 0.1
                       ).astype(jnp.bfloat16),
        da_embedding=(jax.random.normal(keys[2], (tags, e_da), jnp.float32) * 0.1
                      ).astype(jnp.bfloat16),
        utt_gru=_init_bigru(keys[3], e_utt, h_utt, num_layers),
        da_gru=_init_bigru(keys[4], e_da, h_da, num_layers),
        ctx_gru=_init_bigru(keys[5], ctx_in, h_ctx, num_layers),
        fc1_w_t=(jax.random.normal(keys[6], (2 * h_ctx, num_labels), jnp.float32) * 0.1
                 ).astype(jnp.bfloat16),
        fc1_b=jax.random.normal(keys[7], (1, num_labels), jnp.float32) * 0.1,
    )


# ----------------------------------------------------------------------------
# Forward pass (mirrors HierarchicalDaPredictor.forward)
# ----------------------------------------------------------------------------
def forward(weights, dialogue, tag_sequence, conv_lengths, sent_lengths):
    B, C, S = dialogue.shape
    N = B * C
    # TODO(synk): original sets max_conv_len = dialogue.shape[0] (batch size); that is a
    # bug in the reference — we use the actual conversation axis dialogue.shape[1].
    utt_layers = weights['utt_gru']
    da_layers = weights['da_gru']
    ctx_layers = weights['ctx_gru']
    H_utt = utt_layers[-1]['whf'].shape[0]

    # --- utterance encoder (Embedding -> bi-GRU over tokens of each sentence) ---
    # Transpose the tiny int index matrix instead of the float embeddings: the
    # gather directly yields time-major activations (no float transpose pass).
    sent_ids_tm = dialogue.reshape(N, S).T                                   # (S, N) int32
    utt_x2d = jnp.take(weights['utt_embedding'], sent_ids_tm, axis=0).reshape(S * N, -1)
    sent_mask = _length_mask(sent_lengths.reshape(N), S)                     # (S*N, 1)
    for lp in utt_layers[:-1]:                                               # no-op for 1 layer
        utt_x2d = bigru_call(utt_x2d, sent_mask, lp, S, N)
    sent_out_bm = bigru_call(utt_x2d, sent_mask, utt_layers[-1], S, N,
                             batch_major_out=True)                           # (N, S*2H) bf16
    # TODO(synk): original `.view(batch, max_conv_len, -1)` mixes time/batch axes of a
    # non-batch-first tensor; we use the coherent batch-first flattening per utterance.
    sent_out_unwound = sent_out_bm.reshape(B, C, S * 2 * H_utt)              # pure reshape

    # --- speaker embeddings: cycle 1,2,1,2,... padded with 0 (padding_idx) ---
    pos = jnp.arange(C)
    base = jnp.where(pos % 2 == 0, 1, 2)
    spk_ids = jnp.where(pos[None, :] < conv_lengths[:, None], base[None, :], 0)   # (B, C)
    speaker_embeds = jnp.take(weights['speaker_embedding'], spk_ids, axis=0)      # (B, C, spk)

    context = jnp.concatenate([sent_out_unwound, speaker_embeds], axis=-1)        # (B, C, D) bf16
    # TODO(synk): at production sizes build the context time-major to drop this transpose.
    ctx_x2d = jnp.transpose(context, (1, 0, 2)).reshape(C * B, -1)                # (C*B, D) bf16

    conv_mask = _length_mask(conv_lengths, C)                                     # (C*B, 1)

    # --- DA encoder input (its output is computed but unused by logits, as in reference) ---
    da_x2d = jnp.take(weights['da_embedding'], tag_sequence.T, axis=0).reshape(C * B, -1)

    # leading layers of multi-layer stacks (no-op for num_layers=1)
    for lp in da_layers[:-1]:
        da_x2d = bigru_call(da_x2d, conv_mask, lp, C, B)
    for lp in ctx_layers[:-1]:
        ctx_x2d = bigru_call(ctx_x2d, conv_mask, lp, C, B)

    # --- fused DA-GRU + context-GRU + fc1 (single pallas_call) ---
    # TODO(synk): original nn.Linear(context_hidden_dim, num_labels) mismatches the
    # 2*hidden bidirectional output width; fc1 here is sized for 2*hidden.
    da_out, logits = da_ctx_fc(da_x2d, ctx_x2d, conv_mask,
                               da_layers[-1], ctx_layers[-1],
                               weights['fc1_w_t'], weights['fc1_b'], C, B)
    return logits, da_out


# ----------------------------------------------------------------------------
if __name__ == "__main__":
    key = jax.random.PRNGKey(0)

    # small shapes consistent with the module
    B, C, S = 2, 4, 8
    VOCAB, TAGS = 32, 8
    E_UTT, H_UTT = 16, 16
    E_DA, H_DA = 8, 8
    SPK_DIM = 8
    H_CTX = 16
    NUM_LABELS = 10
    CTX_IN = S * 2 * H_UTT + SPK_DIM     # context encoder input feature width

    k_w, k_d, k_t = jax.random.split(key, 3)
    weights = init_weights(
        k_w, vocab=VOCAB, tags=TAGS, e_utt=E_UTT, h_utt=H_UTT,
        e_da=E_DA, h_da=H_DA, spk_dim=SPK_DIM, ctx_in=CTX_IN,
        h_ctx=H_CTX, num_labels=NUM_LABELS, num_layers=1)

    dialogue = jax.random.randint(k_d, (B, C, S), 0, VOCAB, dtype=jnp.int32)
    tag_sequence = jax.random.randint(k_t, (B, C), 0, TAGS, dtype=jnp.int32)
    conv_lengths = jnp.array([4, 3], dtype=jnp.int32)
    sent_lengths = jnp.array([[8, 7, 6, 5],
                              [8, 8, 4, 3]], dtype=jnp.int32)

    fwd = jax.jit(forward)
    logits, da_out = fwd(weights, dialogue, tag_sequence, conv_lengths, sent_lengths)
    jax.block_until_ready((logits, da_out))

    assert logits.shape == (C, B, NUM_LABELS)
    assert da_out.shape == (C, B, 2 * H_DA)
    print("KERNEL_OK")
</pallas_src>

<mosaic_0001>
module attributes {stable_mosaic.version = 11 : i64} {
  func.func @kernel(%arg0: memref<64x1xf32, #tpu.memory_space<vmem>>, %arg1: memref<64x16xbf16, #tpu.memory_space<vmem>>, %arg2: memref<16x96xbf16, #tpu.memory_space<vmem>>, %arg3: memref<1x96xf32, #tpu.memory_space<vmem>>, %arg4: memref<16x48xbf16, #tpu.memory_space<vmem>>, %arg5: memref<16x48xbf16, #tpu.memory_space<vmem>>, %arg6: memref<1x32xf32, #tpu.memory_space<vmem>>, %arg7: memref<8x256xbf16, #tpu.memory_space<vmem>>, %arg8: memref<64x96xf32, #tpu.memory_space<vmem>>) attributes {dimension_semantics = [], scalar_prefetch = 0 : i64, scratch_operands = 1 : i64, tpu.core_type = #tpu.core_type<tc>} {
    %c0 = arith.constant 0 : index
    %c0_0 = arith.constant 0 : index
    %0 = vector.load %arg1[%c0, %c0_0] : memref<64x16xbf16, #tpu.memory_space<vmem>>, vector<64x16xbf16>
    %c0_1 = arith.constant 0 : index
    %c0_2 = arith.constant 0 : index
    %1 = vector.load %arg2[%c0_1, %c0_2] : memref<16x96xbf16, #tpu.memory_space<vmem>>, vector<16x96xbf16>
    %cst = arith.constant dense<0.000000e+00> : vector<64x96xf32>
    %2 = tpu.matmul %0, %1, %cst {dimension_numbers = #tpu.dot_dimension_numbers<[1], [0], [0], [1], [0, 0, 1, 1], [], []>} : vector<64x16xbf16>, vector<16x96xbf16>, vector<64x96xf32> -> vector<64x96xf32>
    %c0_3 = arith.constant 0 : index
    %c0_4 = arith.constant 0 : index
    %3 = vector.load %arg3[%c0_3, %c0_4] : memref<1x96xf32, #tpu.memory_space<vmem>>, vector<1x96xf32>
    %4 = vector.broadcast %3 : vector<1x96xf32> to vector<64x96xf32>
    %5 = arith.addf %2, %4 : vector<64x96xf32>
    %c0_5 = arith.constant 0 : index
    %c0_6 = arith.constant 0 : index
    %6 = vector.load %arg8[%c0_5, %c0_6] : memref<64x96xf32, #tpu.memory_space<vmem>>, vector<64x96xf32>
    tpu.vector_store %arg8[%c0_5, %c0_6], %5 {strides = array<i32>} : memref<64x96xf32, #tpu.memory_space<vmem>>, vector<64x96xf32>,
    %c0_7 = arith.constant 0 : index
    %c0_8 = arith.constant 0 : index
    %7 = vector.load %arg4[%c0_7, %c0_8] : memref<16x48xbf16, #tpu.memory_space<vmem>>, vector<16x48xbf16>
    %c0_9 = arith.constant 0 : index
    %c0_10 = arith.constant 0 : index
    %8 = vector.load %arg5[%c0_9, %c0_10] : memref<16x48xbf16, #tpu.memory_space<vmem>>, vector<16x48xbf16>
    %c0_11 = arith.constant 0 : index
    %c0_12 = arith.constant 0 : index
    %9 = vector.load %arg6[%c0_11, %c0_12] : memref<1x32xf32, #tpu.memory_space<vmem>>, vector<1x16xf32>
    %10 = vector.shape_cast %9 : vector<1x16xf32> to vector<1x16xf32>
    %11 = vector.broadcast %10 : vector<1x16xf32> to vector<8x16xf32>
    %c0_13 = arith.constant 0 : index
    %c16 = arith.constant 16 : index
    %12 = vector.load %arg6[%c0_13, %c16] : memref<1x32xf32, #tpu.memory_space<vmem>>, vector<1x16xf32>
    %13 = vector.shape_cast %12 : vector<1x16xf32> to vector<1x16xf32>
    %14 = vector.broadcast %13 : vector<1x16xf32> to vector<8x16xf32>
    %cst_14 = arith.constant 0.000000e+00 : f32
    %15 = vector.broadcast %cst_14 : f32 to vector<8x16xf32>
    %cst_15 = arith.constant 0.000000e+00 : f32
    %16 = vector.broadcast %cst_15 : f32 to vector<8x16xf32>
    %c0_16 = arith.constant 0 : index
    %c0_17 = arith.constant 0 : index
    %17 = vector.load %arg0[%c0_16, %c0_17] : memref<64x1xf32, #tpu.memory_space<vmem>>, vector<8x1xf32>
    %c56 = arith.constant 56 : index
    %c0_18 = arith.constant 0 : index
    %18 = vector.load %arg0[%c56, %c0_18] : memref<64x1xf32, #tpu.memory_space<vmem>>, vector<8x1xf32>
    %c0_19 = arith.constant 0 : index
    %c0_20 = arith.constant 0 : index
    %19 = vector.load %arg8[%c0_19, %c0_20] : memref<64x96xf32, #tpu.memory_space<vmem>>, vector<8x48xf32>
    %20 = arith.truncf %15 : vector<8x16xf32> to vector<8x16xbf16>
    %cst_21 = arith.constant dense<0.000000e+00> : vector<8x48xf32>
    %21 = tpu.matmul %20, %7, %cst_21 {dimension_numbers = #tpu.dot_dimension_numbers<[1], [0], [0], [1], [0, 0, 1, 1], [], []>} : vector<8x16xbf16>, vector<16x48xbf16>, vector<8x48xf32> -> vector<8x48xf32>
    %22 = vector.extract_strided_slice %19 {offsets = [0, 0], sizes = [8, 32], strides = [1, 1]} : vector<8x48xf32> to vector<8x32xf32>
    %23 = vector.extract_strided_slice %21 {offsets = [0, 0], sizes = [8, 32], strides = [1, 1]} : vector<8x48xf32> to vector<8x32xf32>
    %24 = arith.addf %22, %23 : vector<8x32xf32>
    %25 = arith.negf %24 : vector<8x32xf32>
    %26 = math.exp %25 : vector<8x32xf32>
    %cst_22 = arith.constant 1.000000e+00 : f32
    %27 = vector.broadcast %cst_22 : f32 to vector<8x32xf32>
    %28 = arith.addf %27, %26 : vector<8x32xf32>
    %29 = arith.divf %27, %28 : vector<8x32xf32>
    %30 = vector.extract_strided_slice %19 {offsets = [0, 32], sizes = [8, 16], strides = [1, 1]} : vector<8x48xf32> to vector<8x16xf32>
    %31 = vector.extract_strided_slice %29 {offsets = [0, 0], sizes = [8, 16], strides = [1, 1]} : vector<8x32xf32> to vector<8x16xf32>
    %32 = vector.extract_strided_slice %21 {offsets = [0, 32], sizes = [8, 16], strides = [1, 1]} : vector<8x48xf32> to vector<8x16xf32>
    %33 = arith.addf %32, %11 : vector<8x16xf32>
    %34 = arith.mulf %31, %33 : vector<8x16xf32>
    %35 = arith.addf %30, %34 : vector<8x16xf32>
    %36 = math.tanh %35 : vector<8x16xf32>
    %37 = vector.extract_strided_slice %29 {offsets = [0, 16], sizes = [8, 16], strides = [1, 1]} : vector<8x32xf32> to vector<8x16xf32>
    %38 = arith.subf %15, %36 : vector<8x16xf32>
    %39 = arith.mulf %37, %38 : vector<8x16xf32>
    %40 = arith.addf %36, %39 : vector<8x16xf32>
    %41 = vector.shape_cast %17 : vector<8x1xf32> to vector<8x1xf32>
    %42 = vector.broadcast %41 : vector<8x1xf32> to vector<8x16xf32>
    %43 = arith.mulf %42, %40 : vector<8x16xf32>
    %44 = arith.subf %40, %15 : vector<8x16xf32>
    %45 = arith.mulf %42, %44 : vector<8x16xf32>
    %46 = arith.addf %15, %45 : vector<8x16xf32>
    %c56_23 = arith.constant 56 : index
    %c48 = arith.constant 48 : index
    %47 = vector.load %arg8[%c56_23, %c48] : memref<64x96xf32, #tpu.memory_space<vmem>>, vector<8x48xf32>
    %48 = arith.truncf %16 : vector<8x16xf32> to vector<8x16xbf16>
    %cst_24 = arith.constant dense<0.000000e+00> : vector<8x48xf32>
    %49 = tpu.matmul %48, %8, %cst_24 {dimension_numbers = #tpu.dot_dimension_numbers<[1], [0], [0], [1], [0, 0, 1, 1], [], []>} : vector<8x16xbf16>, vector<16x48xbf16>, vector<8x48xf32> -> vector<8x48xf32>
    %50 = vector.extract_strided_slice %47 {offsets = [0, 0], sizes = [8, 32], strides = [1, 1]} : vector<8x48xf32> to vector<8x32xf32>
    %51 = vector.extract_strided_slice %49 {offsets = [0, 0], sizes = [8, 32], strides = [1, 1]} : vector<8x48xf32> to vector<8x32xf32>
    %52 = arith.addf %50, %51 : vector<8x32xf32>
    %53 = arith.negf %52 : vector<8x32xf32>
    %54 = math.exp %53 : vector<8x32xf32>
    %cst_25 = arith.constant 1.000000e+00 : f32
    %55 = vector.broadcast %cst_25 : f32 to vector<8x32xf32>
    %56 = arith.addf %55, %54 : vector<8x32xf32>
    %57 = arith.divf %55, %56 : vector<8x32xf32>
    %58 = vector.extract_strided_slice %47 {offsets = [0, 32], sizes = [8, 16], strides = [1, 1]} : vector<8x48xf32> to vector<8x16xf32>
    %59 = vector.extract_strided_slice %57 {offsets = [0, 0], sizes = [8, 16], strides = [1, 1]} : vector<8x32xf32> to vector<8x16xf32>
    %60 = vector.extract_strided_slice %49 {offsets = [0, 32], sizes = [8, 16], strides = [1, 1]} : vector<8x48xf32> to vector<8x16xf32>
    %61 = arith.addf %60, %14 : vector<8x16xf32>
    %62 = arith.mulf %59, %61 : vector<8x16xf32>
    %63 = arith.addf %58, %62 : vector<8x16xf32>
    %64 = math.tanh %63 : vector<8x16xf32>
    %65 = vector.extract_strided_slice %57 {offsets = [0, 16], sizes = [8, 16], strides = [1, 1]} : vector<8x32xf32> to vector<8x16xf32>
    %66 = arith.subf %16, %64 : vector<8x16xf32>
    %67 = arith.mulf %65, %66 : vector<8x16xf32>
    %68 = arith.addf %64, %67 : vector<8x16xf32>
    %69 = vector.shape_cast %18 : vector<8x1xf32> to vector<8x1xf32>
    %70 = vector.broadcast %69 : vector<8x1xf32> to vector<8x16xf32>
    %71 = arith.mulf %70, %68 : vector<8x16xf32>
    %72 = arith.subf %68, %16 : vector<8x16xf32>
    %73 = arith.mulf %70, %72 : vector<8x16xf32>
    %74 = arith.addf %16, %73 : vector<8x16xf32>
    %75 = arith.truncf %43 : vector<8x16xf32> to vector<8x16xbf16>
    %c0_26 = arith.constant 0 : index
    %c0_27 = arith.constant 0 : index
    %76 = vector.load %arg7[%c0_26, %c0_27] : memref<8x256xbf16, #tpu.memory_space<vmem>>, vector<8x16xbf16>
    tpu.vector_store %arg7[%c0_26, %c0_27], %75 {strides = array<i32>} : memref<8x256xbf16, #tpu.memory_space<vmem>>, vector<8x16xbf16>,
    %77 = arith.truncf %71 : vector<8x16xf32> to vector<8x16xbf16>
    %c0_28 = arith.constant 0 : index
    %c240 = arith.constant 240 : index
    %78 = vector.load %arg7[%c0_28, %c240] : memref<8x256xbf16, #tpu.memory_space<vmem>>, vector<8x16xbf16>
    tpu.vector_store %arg7[%c0_28, %c240], %77 {strides = array<i32>} : memref<8x256xbf16, #tpu.memory_space<vmem>>, vector<8x16xbf16>,
    %c8 = arith.constant 8 : index
    %c0_29 = arith.constant 0 : index
    %79 = vector.load %arg0[%c8, %c0_29] : memref<64x1xf32, #tpu.memory_space<vmem>>, vector<8x1xf32>
    %c48_30 = arith.constant 48 : index
    %c0_31 = arith.constant 0 : index
    %80 = vector.load %arg0[%c48_30, %c0_31] : memref<64x1xf32, #tpu.memory_space<vmem>>, vector<8x1xf32>
    %c8_32 = arith.constant 8 : index
    %c0_33 = arith.constant 0 : index
    %81 = vector.load %arg8[%c8_32, %c0_33] : memref<64x96xf32, #tpu.memory_space<vmem>>, vector<8x48xf32>
    %82 = arith.truncf %46 : vector<8x16xf32> to vector<8x16xbf16>
    %cst_34 = arith.constant dense<0.000000e+00> : vector<8x48xf32>
    %83 = tpu.matmul %82, %7, %cst_34 {dimension_numbers = #tpu.dot_dimension_numbers<[1], [0], [0], [1], [0, 0, 1, 1], [], []>} : vector<8x16xbf16>, vector<16x48xbf16>, vector<8x48xf32> -> vector<8x48xf32>
    %84 = vector.extract_strided_slice %81 {offsets = [0, 0], sizes = [8, 32], strides = [1, 1]} : vector<8x48xf32> to vector<8x32xf32>
    %85 = vector.extract_strided_slice %83 {offsets = [0, 0], sizes = [8, 32], strides = [1, 1]} : vector<8x48xf32> to vector<8x32xf32>
    %86 = arith.addf %84, %85 : vector<8x32xf32>
    %87 = arith.negf %86 : vector<8x32xf32>
    %88 = math.exp %87 : vector<8x32xf32>
    %cst_35 = arith.constant 1.000000e+00 : f32
    %89 = vector.broadcast %cst_35 : f32 to vector<8x32xf32>
    %90 = arith.addf %89, %88 : vector<8x32xf32>
    %91 = arith.divf %89, %90 : vector<8x32xf32>
    %92 = vector.extract_strided_slice %81 {offsets = [0, 32], sizes = [8, 16], strides = [1, 1]} : vector<8x48xf32> to vector<8x16xf32>
    %93 = vector.extract_strided_slice %91 {offsets = [0, 0], sizes = [8, 16], strides = [1, 1]} : vector<8x32xf32> to vector<8x16xf32>
    %94 = vector.extract_strided_slice %83 {offsets = [0, 32], sizes = [8, 16], strides = [1, 1]} : vector<8x48xf32> to vector<8x16xf32>
    %95 = arith.addf %94, %11 : vector<8x16xf32>
    %96 = arith.mulf %93, %95 : vector<8x16xf32>
    %97 = arith.addf %92, %96 : vector<8x16xf32>
    %98 = math.tanh %97 : vector<8x16xf32>
    %99 = vector.extract_strided_slice %91 {offsets = [0, 16], sizes = [8, 16], strides = [1, 1]} : vector<8x32xf32> to vector<8x16xf32>
    %100 = arith.subf %46, %98 : vector<8x16xf32>
    %101 = arith.mulf %99, %100 : vector<8x16xf32>
    %102 = arith.addf %98, %101 : vector<8x16xf32>
    %103 = vector.shape_cast %79 : vector<8x1xf32> to vector<8x1xf32>
    %104 = vector.broadcast %103 : vector<8x1xf32> to vector<8x16xf32>
    %105 = arith.mulf %104, %102 : vector<8x16xf32>
    %106 = arith.subf %102, %46 : vector<8x16xf32>
    %107 = arith.mulf %104, %106 : vector<8x16xf32>
    %108 = arith.addf %46, %107 : vector<8x16xf32>
    %c48_36 = arith.constant 48 : index
    %c48_37 = arith.constant 48 : index
    %109 = vector.load %arg8[%c48_36, %c48_37] : memref<64x96xf32, #tpu.memory_space<vmem>>, vector<8x48xf32>
    %110 = arith.truncf %74 : vector<8x16xf32> to vector<8x16xbf16>
    %cst_38 = arith.constant dense<0.000000e+00> : vector<8x48xf32>
    %111 = tpu.matmul %110, %8, %cst_38 {dimension_numbers = #tpu.dot_dimension_numbers<[1], [0], [0], [1], [0, 0, 1, 1], [], []>} : vector<8x16xbf16>, vector<16x48xbf16>, vector<8x48xf32> -> vector<8x48xf32>
    %112 = vector.extract_strided_slice %109 {offsets = [0, 0], sizes = [8, 32], strides = [1, 1]} : vector<8x48xf32> to vector<8x32xf32>
    %113 = vector.extract_strided_slice %111 {offsets = [0, 0], sizes = [8, 32], strides = [1, 1]} : vector<8x48xf32> to vector<8x32xf32>
    %114 = arith.addf %112, %113 : vector<8x32xf32>
    %115 = arith.negf %114 : vector<8x32xf32>
    %116 = math.exp %115 : vector<8x32xf32>
    %cst_39 = arith.constant 1.000000e+00 : f32
    %117 = vector.broadcast %cst_39 : f32 to vector<8x32xf32>
    %118 = arith.addf %117, %116 : vector<8x32xf32>
    %119 = arith.divf %117, %118 : vector<8x32xf32>
    %120 = vector.extract_strided_slice %109 {offsets = [0, 32], sizes = [8, 16], strides = [1, 1]} : vector<8x48xf32> to vector<8x16xf32>
    %121 = vector.extract_strided_slice %119 {offsets = [0, 0], sizes = [8, 16], strides = [1, 1]} : vector<8x32xf32> to vector<8x16xf32>
    %122 = vector.extract_strided_slice %111 {offsets = [0, 32], sizes = [8, 16], strides = [1, 1]} : vector<8x48xf32> to vector<8x16xf32>
    %123 = arith.addf %122, %14 : vector<8x16xf32>
    %124 = arith.mulf %121, %123 : vector<8x16xf32>
    %125 = arith.addf %120, %124 : vector<8x16xf32>
    %126 = math.tanh %125 : vector<8x16xf32>
    %127 = vector.extract_strided_slice %119 {offsets = [0, 16], sizes = [8, 16], strides = [1, 1]} : vector<8x32xf32> to vector<8x16xf32>
    %128 = arith.subf %74, %126 : vector<8x16xf32>
    %129 = arith.mulf %127, %128 : vector<8x16xf32>
    %130 = arith.addf %126, %129 : vector<8x16xf32>
    %131 = vector.shape_cast %80 : vector<8x1xf32> to vector<8x1xf32>
    %132 = vector.broadcast %131 : vector<8x1xf32> to vector<8x16xf32>
    %133 = arith.mulf %132, %130 : vector<8x16xf32>
    %134 = arith.subf %130, %74 : vector<8x16xf32>
    %135 = arith.mulf %132, %134 : vector<8x16xf32>
    %136 = arith.addf %74, %135 : vector<8x16xf32>
    %137 = arith.truncf %105 : vector<8x16xf32> to vector<8x16xbf16>
    %c0_40 = arith.constant 0 : index
    %c32 = arith.constant 32 : index
    %138 = vector.load %arg7[%c0_40, %c32] : memref<8x256xbf16, #tpu.memory_space<vmem>>, vector<8x16xbf16>
    tpu.vector_store %arg7[%c0_40, %c32], %137 {strides = array<i32>} : memref<8x256xbf16, #tpu.memory_space<vmem>>, vector<8x16xbf16>,
    %139 = arith.truncf %133 : vector<8x16xf32> to vector<8x16xbf16>
    %c0_41 = arith.constant 0 : index
    %c208 = arith.constant 208 : index
    %140 = vector.load %arg7[%c0_41, %c208] : memref<8x256xbf16, #tpu.memory_space<vmem>>, vector<8x16xbf16>
    tpu.vector_store %arg7[%c0_41, %c208], %139 {strides = array<i32>} : memref<8x256xbf16, #tpu.memory_space<vmem>>, vector<8x16xbf16>,
    %c16_42 = arith.constant 16 : index
    %c0_43 = arith.constant 0 : index
    %141 = vector.load %arg0[%c16_42, %c0_43] : memref<64x1xf32, #tpu.memory_space<vmem>>, vector<8x1xf32>
    %c40 = arith.constant 40 : index
    %c0_44 = arith.constant 0 : index
    %142 = vector.load %arg0[%c40, %c0_44] : memref<64x1xf32, #tpu.memory_space<vmem>>, vector<8x1xf32>
    %c16_45 = arith.constant 16 : index
    %c0_46 = arith.constant 0 : index
    %143 = vector.load %arg8[%c16_45, %c0_46] : memref<64x96xf32, #tpu.memory_space<vmem>>, vector<8x48xf32>
    %144 = arith.truncf %108 : vector<8x16xf32> to vector<8x16xbf16>
    %cst_47 = arith.constant dense<0.000000e+00> : vector<8x48xf32>
    %145 = tpu.matmul %144, %7, %cst_47 {dimension_numbers = #tpu.dot_dimension_numbers<[1], [0], [0], [1], [0, 0, 1, 1], [], []>} : vector<8x16xbf16>, vector<16x48xbf16>, vector<8x48xf32> -> vector<8x48xf32>
    %146 = vector.extract_strided_slice %143 {offsets = [0, 0], sizes = [8, 32], strides = [1, 1]} : vector<8x48xf32> to vector<8x32xf32>
    %147 = vector.extract_strided_slice %145 {offsets = [0, 0], sizes = [8, 32], strides = [1, 1]} : vector<8x48xf32> to vector<8x32xf32>
    %148 = arith.addf %146, %147 : vector<8x32xf32>
    %149 = arith.negf %148 : vector<8x32xf32>
    %150 = math.exp %149 : vector<8x32xf32>
    %cst_48 = arith.constant 1.000000e+00 : f32
    %151 = vector.broadcast %cst_48 : f32 to vector<8x32xf32>
    %152 = arith.addf %151, %150 : vector<8x32xf32>
    %153 = arith.divf %151, %152 : vector<8x32xf32>
    %154 = vector.extract_strided_slice %143 {offsets = [0, 32], sizes = [8, 16], strides = [1, 1]} : vector<8x48xf32> to vector<8x16xf32>
    %155 = vector.extract_strided_slice %153 {offsets = [0, 0], sizes = [8, 16], strides = [1, 1]} : vector<8x32xf32> to vector<8x16xf32>
    %156 = vector.extract_strided_slice %145 {offsets = [0, 32], sizes = [8, 16], strides = [1, 1]} : vector<8x48xf32> to vector<8x16xf32>
    %157 = arith.addf %156, %11 : vector<8x16xf32>
    %158 = arith.mulf %155, %157 : vector<8x16xf32>
    %159 = arith.addf %154, %158 : vector<8x16xf32>
    %160 = math.tanh %159 : vector<8x16xf32>
    %161 = vector.extract_strided_slice %153 {offsets = [0, 16], sizes = [8, 16], strides = [1, 1]} : vector<8x32xf32> to vector<8x16xf32>
    %162 = arith.subf %108, %160 : vector<8x16xf32>
    %163 = arith.mulf %161, %162 : vector<8x16xf32>
    %164 = arith.addf %160, %163 : vector<8x16xf32>
    %165 = vector.shape_cast %141 : vector<8x1xf32> to vector<8x1xf32>
    %166 = vector.broadcast %165 : vector<8x1xf32> to vector<8x16xf32>
    %167 = arith.mulf %166, %164 : vector<8x16xf32>
    %168 = arith.subf %164, %108 : vector<8x16xf32>
    %169 = arith.mulf %166, %168 : vector<8x16xf32>
    %170 = arith.addf %108, %169 : vector<8x16xf32>
    %c40_49 = arith.constant 40 : index
    %c48_50 = arith.constant 48 : index
    %171 = vector.load %arg8[%c40_49, %c48_50] : memref<64x96xf32, #tpu.memory_space<vmem>>, vector<8x48xf32>
    %172 = arith.truncf %136 : vector<8x16xf32> to vector<8x16xbf16>
    %cst_51 = arith.constant dense<0.000000e+00> : vector<8x48xf32>
    %173 = tpu.matmul %172, %8, %cst_51 {dimension_numbers = #tpu.dot_dimension_numbers<[1], [0], [0], [1], [0, 0, 1, 1], [], []>} : vector<8x16xbf16>, vector<16x48xbf16>, vector<8x48xf32> -> vector<8x48xf32>
    %174 = vector.extract_strided_slice %171 {offsets = [0, 0], sizes = [8, 32], strides = [1, 1]} : vector<8x48xf32> to vector<8x32xf32>
    %175 = vector.extract_strided_slice %173 {offsets = [0, 0], sizes = [8, 32], strides = [1, 1]} : vector<8x48xf32> to vector<8x32xf32>
    %176 = arith.addf %174, %175 : vector<8x32xf32>
    %177 = arith.negf %176 : vector<8x32xf32>
    %178 = math.exp %177 : vector<8x32xf32>
    %cst_52 = arith.constant 1.000000e+00 : f32
    %179 = vector.broadcast %cst_52 : f32 to vector<8x32xf32>
    %180 = arith.addf %179, %178 : vector<8x32xf32>
    %181 = arith.divf %179, %180 : vector<8x32xf32>
    %182 = vector.extract_strided_slice %171 {offsets = [0, 32], sizes = [8, 16], strides = [1, 1]} : vector<8x48xf32> to vector<8x16xf32>
    %183 = vector.extract_strided_slice %181 {offsets = [0, 0], sizes = [8, 16], strides = [1, 1]} : vector<8x32xf32> to vector<8x16xf32>
    %184 = vector.extract_strided_slice %173 {offsets = [0, 32], sizes = [8, 16], strides = [1, 1]} : vector<8x48xf32> to vector<8x16xf32>
    %185 = arith.addf %184, %14 : vector<8x16xf32>
    %186 = arith.mulf %183, %185 : vector<8x16xf32>
    %187 = arith.addf %182, %186 : vector<8x16xf32>
    %188 = math.tanh %187 : vector<8x16xf32>
    %189 = vector.extract_strided_slice %181 {offsets = [0, 16], sizes = [8, 16], strides = [1, 1]} : vector<8x32xf32> to vector<8x16xf32>
    %190 = arith.subf %136, %188 : vector<8x16xf32>
    %191 = arith.mulf %189, %190 : vector<8x16xf32>
    %192 = arith.addf %188, %191 : vector<8x16xf32>
    %193 = vector.shape_cast %142 : vector<8x1xf32> to vector<8x1xf32>
    %194 = vector.broadcast %193 : vector<8x1xf32> to vector<8x16xf32>
    %195 = arith.mulf %194, %192 : vector<8x16xf32>
    %196 = arith.subf %192, %136 : vector<8x16xf32>
    %197 = arith.mulf %194, %196 : vector<8x16xf32>
    %198 = arith.addf %136, %197 : vector<8x16xf32>
    %199 = arith.truncf %167 : vector<8x16xf32> to vector<8x16xbf16>
    %c0_53 = arith.constant 0 : index
    %c64 = arith.constant 64 : index
    %200 = vector.load %arg7[%c0_53, %c64] : memref<8x256xbf16, #tpu.memory_space<vmem>>, vector<8x16xbf16>
    tpu.vector_store %arg7[%c0_53, %c64], %199 {strides = array<i32>} : memref<8x256xbf16, #tpu.memory_space<vmem>>, vector<8x16xbf16>,
    %201 = arith.truncf %195 : vector<8x16xf32> to vector<8x16xbf16>
    %c0_54 = arith.constant 0 : index
    %c176 = arith.constant 176 : index
    %202 = vector.load %arg7[%c0_54, %c176] : memref<8x256xbf16, #tpu.memory_space<vmem>>, vector<8x16xbf16>
    tpu.vector_store %arg7[%c0_54, %c176], %201 {strides = array<i32>} : memref<8x256xbf16, #tpu.memory_space<vmem>>, vector<8x16xbf16>,
    %c24 = arith.constant 24 : index
    %c0_55 = arith.constant 0 : index
    %203 = vector.load %arg0[%c24, %c0_55] : memref<64x1xf32, #tpu.memory_space<vmem>>, vector<8x1xf32>
    %c32_56 = arith.constant 32 : index
    %c0_57 = arith.constant 0 : index
    %204 = vector.load %arg0[%c32_56, %c0_57] : memref<64x1xf32, #tpu.memory_space<vmem>>, vector<8x1xf32>
    %c24_58 = arith.constant 24 : index
    %c0_59 = arith.constant 0 : index
    %205 = vector.load %arg8[%c24_58, %c0_59] : memref<64x96xf32, #tpu.memory_space<vmem>>, vector<8x48xf32>
    %206 = arith.truncf %170 : vector<8x16xf32> to vector<8x16xbf16>
    %cst_60 = arith.constant dense<0.000000e+00> : vector<8x48xf32>
    %207 = tpu.matmul %206, %7, %cst_60 {dimension_numbers = #tpu.dot_dimension_numbers<[1], [0], [0], [1], [0, 0, 1, 1], [], []>} : vector<8x16xbf16>, vector<16x48xbf16>, vector<8x48xf32> -> vector<8x48xf32>
    %208 = vector.extract_strided_slice %205 {offsets = [0, 0], sizes = [8, 32], strides = [1, 1]} : vector<8x48xf32> to vector<8x32xf32>
    %209 = vector.extract_strided_slice %207 {offsets = [0, 0], sizes = [8, 32], strides = [1, 1]} : vector<8x48xf32> to vector<8x32xf32>
    %210 = arith.addf %208, %209 : vector<8x32xf32>
    %211 = arith.negf %210 : vector<8x32xf32>
    %212 = math.exp %211 : vector<8x32xf32>
    %cst_61 = arith.constant 1.000000e+00 : f32
    %213 = vector.broadcast %cst_61 : f32 to vector<8x32xf32>
    %214 = arith.addf %213, %212 : vector<8x32xf32>
    %215 = arith.divf %213, %214 : vector<8x32xf32>
    %216 = vector.extract_strided_slice %205 {offsets = [0, 32], sizes = [8, 16], strides = [1, 1]} : vector<8x48xf32> to vector<8x16xf32>
    %217 = vector.extract_strided_slice %215 {offsets = [0, 0], sizes = [8, 16], strides = [1, 1]} : vector<8x32xf32> to vector<8x16xf32>
    %218 = vector.extract_strided_slice %207 {offsets = [0, 32], sizes = [8, 16], strides = [1, 1]} : vector<8x48xf32> to vector<8x16xf32>
    %219 = arith.addf %218, %11 : vector<8x16xf32>
    %220 = arith.mulf %217, %219 : vector<8x16xf32>
    %221 = arith.addf %216, %220 : vector<8x16xf32>
    %222 = math.tanh %221 : vector<8x16xf32>
    %223 = vector.extract_strided_slice %215 {offsets = [0, 16], sizes = [8, 16], strides = [1, 1]} : vector<8x32xf32> to vector<8x16xf32>
    %224 = arith.subf %170, %222 : vector<8x16xf32>
    %225 = arith.mulf %223, %224 : vector<8x16xf32>
    %226 = arith.addf %222, %225 : vector<8x16xf32>
    %227 = vector.shape_cast %203 : vector<8x1xf32> to vector<8x1xf32>
    %228 = vector.broadcast %227 : vector<8x1xf32> to vector<8x16xf32>
    %229 = arith.mulf %228, %226 : vector<8x16xf32>
    %230 = arith.subf %226, %170 : vector<8x16xf32>
    %231 = arith.mulf %228, %230 : vector<8x16xf32>
    %232 = arith.addf %170, %231 : vector<8x16xf32>
    %c32_62 = arith.constant 32 : index
    %c48_63 = arith.constant 48 : index
    %233 = vector.load %arg8[%c32_62, %c48_63] : memref<64x96xf32, #tpu.memory_space<vmem>>, vector<8x48xf32>
    %234 = arith.truncf %198 : vector<8x16xf32> to vector<8x16xbf16>
    %cst_64 = arith.constant dense<0.000000e+00> : vector<8x48xf32>
    %235 = tpu.matmul %234, %8, %cst_64 {dimension_numbers = #tpu.dot_dimension_numbers<[1], [0], [0], [1], [0, 0, 1, 1], [], []>} : vector<8x16xbf16>, vector<16x48xbf16>, vector<8x48xf32> -> vector<8x48xf32>
    %236 = vector.extract_strided_slice %233 {offsets = [0, 0], sizes = [8, 32], strides = [1, 1]} : vector<8x48xf32> to vector<8x32xf32>
    %237 = vector.extract_strided_slice %235 {offsets = [0, 0], sizes = [8, 32], strides = [1, 1]} : vector<8x48xf32> to vector<8x32xf32>
    %238 = arith.addf %236, %237 : vector<8x32xf32>
    %239 = arith.negf %238 : vector<8x32xf32>
    %240 = math.exp %239 : vector<8x32xf32>
    %cst_65 = arith.constant 1.000000e+00 : f32
    %241 = vector.broadcast %cst_65 : f32 to vector<8x32xf32>
    %242 = arith.addf %241, %240 : vector<8x32xf32>
    %243 = arith.divf %241, %242 : vector<8x32xf32>
    %244 = vector.extract_strided_slice %233 {offsets = [0, 32], sizes = [8, 16], strides = [1, 1]} : vector<8x48xf32> to vector<8x16xf32>
    %245 = vector.extract_strided_slice %243 {offsets = [0, 0], sizes = [8, 16], strides = [1, 1]} : vector<8x32xf32> to vector<8x16xf32>
    %246 = vector.extract_strided_slice %235 {offsets = [0, 32], sizes = [8, 16], strides = [1, 1]} : vector<8x48xf32> to vector<8x16xf32>
    %247 = arith.addf %246, %14 : vector<8x16xf32>
    %248 = arith.mulf %245, %247 : vector<8x16xf32>
    %249 = arith.addf %244, %248 : vector<8x16xf32>
    %250 = math.tanh %249 : vector<8x16xf32>
    %251 = vector.extract_strided_slice %243 {offsets = [0, 16], sizes = [8, 16], strides = [1, 1]} : vector<8x32xf32> to vector<8x16xf32>
    %252 = arith.subf %198, %250 : vector<8x16xf32>
    %253 = arith.mulf %251, %252 : vector<8x16xf32>
    %254 = arith.addf %250, %253 : vector<8x16xf32>
    %255 = vector.shape_cast %204 : vector<8x1xf32> to vector<8x1xf32>
    %256 = vector.broadcast %255 : vector<8x1xf32> to vector<8x16xf32>
    %257 = arith.mulf %256, %254 : vector<8x16xf32>
    %258 = arith.subf %254, %198 : vector<8x16xf32>
    %259 = arith.mulf %256, %258 : vector<8x16xf32>
    %260 = arith.addf %198, %259 : vector<8x16xf32>
    %261 = arith.truncf %229 : vector<8x16xf32> to vector<8x16xbf16>
    %c0_66 = arith.constant 0 : index
    %c96 = arith.constant 96 : index
    %262 = vector.load %arg7[%c0_66, %c96] : memref<8x256xbf16, #tpu.memory_space<vmem>>, vector<8x16xbf16>
    tpu.vector_store %arg7[%c0_66, %c96], %261 {strides = array<i32>} : memref<8x256xbf16, #tpu.memory_space<vmem>>, vector<8x16xbf16>,
    %263 = arith.truncf %257 : vector<8x16xf32> to vector<8x16xbf16>
    %c0_67 = arith.constant 0 : index
    %c144 = arith.constant 144 : index
    %264 = vector.load %arg7[%c0_67, %c144] : memref<8x256xbf16, #tpu.memory_space<vmem>>, vector<8x16xbf16>
    tpu.vector_store %arg7[%c0_67, %c144], %263 {strides = array<i32>} : memref<8x256xbf16, #tpu.memory_space<vmem>>, vector<8x16xbf16>,
    %c32_68 = arith.constant 32 : index
    %c0_69 = arith.constant 0 : index
    %265 = vector.load %arg0[%c32_68, %c0_69] : memref<64x1xf32, #tpu.memory_space<vmem>>, vector<8x1xf32>
    %c24_70 = arith.constant 24 : index
    %c0_71 = arith.constant 0 : index
    %266 = vector.load %arg0[%c24_70, %c0_71] : memref<64x1xf32, #tpu.memory_space<vmem>>, vector<8x1xf32>
    %c32_72 = arith.constant 32 : index
    %c0_73 = arith.constant 0 : index
    %267 = vector.load %arg8[%c32_72, %c0_73] : memref<64x96xf32, #tpu.memory_space<vmem>>, vector<8x48xf32>
    %268 = arith.truncf %232 : vector<8x16xf32> to vector<8x16xbf16>
    %cst_74 = arith.constant dense<0.000000e+00> : vector<8x48xf32>
    %269 = tpu.matmul %268, %7, %cst_74 {dimension_numbers = #tpu.dot_dimension_numbers<[1], [0], [0], [1], [0, 0, 1, 1], [], []>} : vector<8x16xbf16>, vector<16x48xbf16>, vector<8x48xf32> -> vector<8x48xf32>
    %270 = vector.extract_strided_slice %267 {offsets = [0, 0], sizes = [8, 32], strides = [1, 1]} : vector<8x48xf32> to vector<8x32xf32>
    %271 = vector.extract_strided_slice %269 {offsets = [0, 0], sizes = [8, 32], strides = [1, 1]} : vector<8x48xf32> to vector<8x32xf32>
    %272 = arith.addf %270, %271 : vector<8x32xf32>
    %273 = arith.negf %272 : vector<8x32xf32>
    %274 = math.exp %273 : vector<8x32xf32>
    %cst_75 = arith.constant 1.000000e+00 : f32
    %275 = vector.broadcast %cst_75 : f32 to vector<8x32xf32>
    %276 = arith.addf %275, %274 : vector<8x32xf32>
    %277 = arith.divf %275, %276 : vector<8x32xf32>
    %278 = vector.extract_strided_slice %267 {offsets = [0, 32], sizes = [8, 16], strides = [1, 1]} : vector<8x48xf32> to vector<8x16xf32>
    %279 = vector.extract_strided_slice %277 {offsets = [0, 0], sizes = [8, 16], strides = [1, 1]} : vector<8x32xf32> to vector<8x16xf32>
    %280 = vector.extract_strided_slice %269 {offsets = [0, 32], sizes = [8, 16], strides = [1, 1]} : vector<8x48xf32> to vector<8x16xf32>
    %281 = arith.addf %280, %11 : vector<8x16xf32>
    %282 = arith.mulf %279, %281 : vector<8x16xf32>
    %283 = arith.addf %278, %282 : vector<8x16xf32>
    %284 = math.tanh %283 : vector<8x16xf32>
    %285 = vector.extract_strided_slice %277 {offsets = [0, 16], sizes = [8, 16], strides = [1, 1]} : vector<8x32xf32> to vector<8x16xf32>
    %286 = arith.subf %232, %284 : vector<8x16xf32>
    %287 = arith.mulf %285, %286 : vector<8x16xf32>
    %288 = arith.addf %284, %287 : vector<8x16xf32>
    %289 = vector.shape_cast %265 : vector<8x1xf32> to vector<8x1xf32>
    %290 = vector.broadcast %289 : vector<8x1xf32> to vector<8x16xf32>
    %291 = arith.mulf %290, %288 : vector<8x16xf32>
    %292 = arith.subf %288, %232 : vector<8x16xf32>
    %293 = arith.mulf %290, %292 : vector<8x16xf32>
    %294 = arith.addf %232, %293 : vector<8x16xf32>
    %c24_76 = arith.constant 24 : index
    %c48_77 = arith.constant 48 : index
    %295 = vector.load %arg8[%c24_76, %c48_77] : memref<64x96xf32, #tpu.memory_space<vmem>>, vector<8x48xf32>
    %296 = arith.truncf %260 : vector<8x16xf32> to vector<8x16xbf16>
    %cst_78 = arith.constant dense<0.000000e+00> : vector<8x48xf32>
    %297 = tpu.matmul %296, %8, %cst_78 {dimension_numbers = #tpu.dot_dimension_numbers<[1], [0], [0], [1], [0, 0, 1, 1], [], []>} : vector<8x16xbf16>, vector<16x48xbf16>, vector<8x48xf32> -> vector<8x48xf32>
    %298 = vector.extract_strided_slice %295 {offsets = [0, 0], sizes = [8, 32], strides = [1, 1]} : vector<8x48xf32> to vector<8x32xf32>
    %299 = vector.extract_strided_slice %297 {offsets = [0, 0], sizes = [8, 32], strides = [1, 1]} : vector<8x48xf32> to vector<8x32xf32>
    %300 = arith.addf %298, %299 : vector<8x32xf32>
    %301 = arith.negf %300 : vector<8x32xf32>
    %302 = math.exp %301 : vector<8x32xf32>
    %cst_79 = arith.constant 1.000000e+00 : f32
    %303 = vector.broadcast %cst_79 : f32 to vector<8x32xf32>
    %304 = arith.addf %303, %302 : vector<8x32xf32>
    %305 = arith.divf %303, %304 : vector<8x32xf32>
    %306 = vector.extract_strided_slice %295 {offsets = [0, 32], sizes = [8, 16], strides = [1, 1]} : vector<8x48xf32> to vector<8x16xf32>
    %307 = vector.extract_strided_slice %305 {offsets = [0, 0], sizes = [8, 16], strides = [1, 1]} : vector<8x32xf32> to vector<8x16xf32>
    %308 = vector.extract_strided_slice %297 {offsets = [0, 32], sizes = [8, 16], strides = [1, 1]} : vector<8x48xf32> to vector<8x16xf32>
    %309 = arith.addf %308, %14 : vector<8x16xf32>
    %310 = arith.mulf %307, %309 : vector<8x16xf32>
    %311 = arith.addf %306, %310 : vector<8x16xf32>
    %312 = math.tanh %311 : vector<8x16xf32>
    %313 = vector.extract_strided_slice %305 {offsets = [0, 16], sizes = [8, 16], strides = [1, 1]} : vector<8x32xf32> to vector<8x16xf32>
    %314 = arith.subf %260, %312 : vector<8x16xf32>
    %315 = arith.mulf %313, %314 : vector<8x16xf32>
    %316 = arith.addf %312, %315 : vector<8x16xf32>
    %317 = vector.shape_cast %266 : vector<8x1xf32> to vector<8x1xf32>
    %318 = vector.broadcast %317 : vector<8x1xf32> to vector<8x16xf32>
    %319 = arith.mulf %318, %316 : vector<8x16xf32>
    %320 = arith.subf %316, %260 : vector<8x16xf32>
    %321 = arith.mulf %318, %320 : vector<8x16xf32>
    %322 = arith.addf %260, %321 : vector<8x16xf32>
    %323 = arith.truncf %291 : vector<8x16xf32> to vector<8x16xbf16>
    %c0_80 = arith.constant 0 : index
    %c128 = arith.constant 128 : index
    %324 = vector.load %arg7[%c0_80, %c128] : memref<8x256xbf16, #tpu.memory_space<vmem>>, vector<8x16xbf16>
    tpu.vector_store %arg7[%c0_80, %c128], %323 {strides = array<i32>} : memref<8x256xbf16, #tpu.memory_space<vmem>>, vector<8x16xbf16>,
    %325 = arith.truncf %319 : vector<8x16xf32> to vector<8x16xbf16>
    %c0_81 = arith.constant 0 : index
    %c112 = arith.constant 112 : index
    %326 = vector.load %arg7[%c0_81, %c112] : memref<8x256xbf16, #tpu.memory_space<vmem>>, vector<8x16xbf16>
    tpu.vector_store %arg7[%c0_81, %c112], %325 {strides = array<i32>} : memref<8x256xbf16, #tpu.memory_space<vmem>>, vector<8x16xbf16>,
    %c40_82 = arith.constant 40 : index
    %c0_83 = arith.constant 0 : index
    %327 = vector.load %arg0[%c40_82, %c0_83] : memref<64x1xf32, #tpu.memory_space<vmem>>, vector<8x1xf32>
    %c16_84 = arith.constant 16 : index
    %c0_85 = arith.constant 0 : index
    %328 = vector.load %arg0[%c16_84, %c0_85] : memref<64x1xf32, #tpu.memory_space<vmem>>, vector<8x1xf32>
    %c40_86 = arith.constant 40 : index
    %c0_87 = arith.constant 0 : index
    %329 = vector.load %arg8[%c40_86, %c0_87] : memref<64x96xf32, #tpu.memory_space<vmem>>, vector<8x48xf32>
    %330 = arith.truncf %294 : vector<8x16xf32> to vector<8x16xbf16>
    %cst_88 = arith.constant dense<0.000000e+00> : vector<8x48xf32>
    %331 = tpu.matmul %330, %7, %cst_88 {dimension_numbers = #tpu.dot_dimension_numbers<[1], [0], [0], [1], [0, 0, 1, 1], [], []>} : vector<8x16xbf16>, vector<16x48xbf16>, vector<8x48xf32> -> vector<8x48xf32>
    %332 = vector.extract_strided_slice %329 {offsets = [0, 0], sizes = [8, 32], strides = [1, 1]} : vector<8x48xf32> to vector<8x32xf32>
    %333 = vector.extract_strided_slice %331 {offsets = [0, 0], sizes = [8, 32], strides = [1, 1]} : vector<8x48xf32> to vector<8x32xf32>
    %334 = arith.addf %332, %333 : vector<8x32xf32>
    %335 = arith.negf %334 : vector<8x32xf32>
    %336 = math.exp %335 : vector<8x32xf32>
    %cst_89 = arith.constant 1.000000e+00 : f32
    %337 = vector.broadcast %cst_89 : f32 to vector<8x32xf32>
    %338 = arith.addf %337, %336 : vector<8x32xf32>
    %339 = arith.divf %337, %338 : vector<8x32xf32>
    %340 = vector.extract_strided_slice %329 {offsets = [0, 32], sizes = [8, 16], strides = [1, 1]} : vector<8x48xf32> to vector<8x16xf32>
    %341 = vector.extract_strided_slice %339 {offsets = [0, 0], sizes = [8, 16], strides = [1, 1]} : vector<8x32xf32> to vector<8x16xf32>
    %342 = vector.extract_strided_slice %331 {offsets = [0, 32], sizes = [8, 16], strides = [1, 1]} : vector<8x48xf32> to vector<8x16xf32>
    %343 = arith.addf %342, %11 : vector<8x16xf32>
    %344 = arith.mulf %341, %343 : vector<8x16xf32>
    %345 = arith.addf %340, %344 : vector<8x16xf32>
    %346 = math.tanh %345 : vector<8x16xf32>
    %347 = vector.extract_strided_slice %339 {offsets = [0, 16], sizes = [8, 16], strides = [1, 1]} : vector<8x32xf32> to vector<8x16xf32>
    %348 = arith.subf %294, %346 : vector<8x16xf32>
    %349 = arith.mulf %347, %348 : vector<8x16xf32>
    %350 = arith.addf %346, %349 : vector<8x16xf32>
    %351 = vector.shape_cast %327 : vector<8x1xf32> to vector<8x1xf32>
    %352 = vector.broadcast %351 : vector<8x1xf32> to vector<8x16xf32>
    %353 = arith.mulf %352, %350 : vector<8x16xf32>
    %354 = arith.subf %350, %294 : vector<8x16xf32>
    %355 = arith.mulf %352, %354 : vector<8x16xf32>
    %356 = arith.addf %294, %355 : vector<8x16xf32>
    %c16_90 = arith.constant 16 : index
    %c48_91 = arith.constant 48 : index
    %357 = vector.load %arg8[%c16_90, %c48_91] : memref<64x96xf32, #tpu.memory_space<vmem>>, vector<8x48xf32>
    %358 = arith.truncf %322 : vector<8x16xf32> to vector<8x16xbf16>
    %cst_92 = arith.constant dense<0.000000e+00> : vector<8x48xf32>
    %359 = tpu.matmul %358, %8, %cst_92 {dimension_numbers = #tpu.dot_dimension_numbers<[1], [0], [0], [1], [0, 0, 1, 1], [], []>} : vector<8x16xbf16>, vector<16x48xbf16>, vector<8x48xf32> -> vector<8x48xf32>
    %360 = vector.extract_strided_slice %357 {offsets = [0, 0], sizes = [8, 32], strides = [1, 1]} : vector<8x48xf32> to vector<8x32xf32>
    %361 = vector.extract_strided_slice %359 {offsets = [0, 0], sizes = [8, 32], strides = [1, 1]} : vector<8x48xf32> to vector<8x32xf32>
    %362 = arith.addf %360, %361 : vector<8x32xf32>
    %363 = arith.negf %362 : vector<8x32xf32>
    %364 = math.exp %363 : vector<8x32xf32>
    %cst_93 = arith.constant 1.000000e+00 : f32
    %365 = vector.broadcast %cst_93 : f32 to vector<8x32xf32>
    %366 = arith.addf %365, %364 : vector<8x32xf32>
    %367 = arith.divf %365, %366 : vector<8x32xf32>
    %368 = vector.extract_strided_slice %357 {offsets = [0, 32], sizes = [8, 16], strides = [1, 1]} : vector<8x48xf32> to vector<8x16xf32>
    %369 = vector.extract_strided_slice %367 {offsets = [0, 0], sizes = [8, 16], strides = [1, 1]} : vector<8x32xf32> to vector<8x16xf32>
    %370 = vector.extract_strided_slice %359 {offsets = [0, 32], sizes = [8, 16], strides = [1, 1]} : vector<8x48xf32> to vector<8x16xf32>
    %371 = arith.addf %370, %14 : vector<8x16xf32>
    %372 = arith.mulf %369, %371 : vector<8x16xf32>
    %373 = arith.addf %368, %372 : vector<8x16xf32>
    %374 = math.tanh %373 : vector<8x16xf32>
    %375 = vector.extract_strided_slice %367 {offsets = [0, 16], sizes = [8, 16], strides = [1, 1]} : vector<8x32xf32> to vector<8x16xf32>
    %376 = arith.subf %322, %374 : vector<8x16xf32>
    %377 = arith.mulf %375, %376 : vector<8x16xf32>
    %378 = arith.addf %374, %377 : vector<8x16xf32>
    %379 = vector.shape_cast %328 : vector<8x1xf32> to vector<8x1xf32>
    %380 = vector.broadcast %379 : vector<8x1xf32> to vector<8x16xf32>
    %381 = arith.mulf %380, %378 : vector<8x16xf32>
    %382 = arith.subf %378, %322 : vector<8x16xf32>
    %383 = arith.mulf %380, %382 : vector<8x16xf32>
    %384 = arith.addf %322, %383 : vector<8x16xf32>
    %385 = arith.truncf %353 : vector<8x16xf32> to vector<8x16xbf16>
    %c0_94 = arith.constant 0 : index
    %c160 = arith.constant 160 : index
    %386 = vector.load %arg7[%c0_94, %c160] : memref<8x256xbf16, #tpu.memory_space<vmem>>, vector<8x16xbf16>
    tpu.vector_store %arg7[%c0_94, %c160], %385 {strides = array<i32>} : memref<8x256xbf16, #tpu.memory_space<vmem>>, vector<8x16xbf16>,
    %387 = arith.truncf %381 : vector<8x16xf32> to vector<8x16xbf16>
    %c0_95 = arith.constant 0 : index
    %c80 = arith.constant 80 : index
    %388 = vector.load %arg7[%c0_95, %c80] : memref<8x256xbf16, #tpu.memory_space<vmem>>, vector<8x16xbf16>
    tpu.vector_store %arg7[%c0_95, %c80], %387 {strides = array<i32>} : memref<8x256xbf16, #tpu.memory_space<vmem>>, vector<8x16xbf16>,
    %c48_96 = arith.constant 48 : index
    %c0_97 = arith.constant 0 : index
    %389 = vector.load %arg0[%c48_96, %c0_97] : memref<64x1xf32, #tpu.memory_space<vmem>>, vector<8x1xf32>
    %c8_98 = arith.constant 8 : index
    %c0_99 = arith.constant 0 : index
    %390 = vector.load %arg0[%c8_98, %c0_99] : memref<64x1xf32, #tpu.memory_space<vmem>>, vector<8x1xf32>
    %c48_100 = arith.constant 48 : index
    %c0_101 = arith.constant 0 : index
    %391 = vector.load %arg8[%c48_100, %c0_101] : memref<64x96xf32, #tpu.memory_space<vmem>>, vector<8x48xf32>
    %392 = arith.truncf %356 : vector<8x16xf32> to vector<8x16xbf16>
    %cst_102 = arith.constant dense<0.000000e+00> : vector<8x48xf32>
    %393 = tpu.matmul %392, %7, %cst_102 {dimension_numbers = #tpu.dot_dimension_numbers<[1], [0], [0], [1], [0, 0, 1, 1], [], []>} : vector<8x16xbf16>, vector<16x48xbf16>, vector<8x48xf32> -> vector<8x48xf32>
    %394 = vector.extract_strided_slice %391 {offsets = [0, 0], sizes = [8, 32], strides = [1, 1]} : vector<8x48xf32> to vector<8x32xf32>
    %395 = vector.extract_strided_slice %393 {offsets = [0, 0], sizes = [8, 32], strides = [1, 1]} : vector<8x48xf32> to vector<8x32xf32>
    %396 = arith.addf %394, %395 : vector<8x32xf32>
    %397 = arith.negf %396 : vector<8x32xf32>
    %398 = math.exp %397 : vector<8x32xf32>
    %cst_103 = arith.constant 1.000000e+00 : f32
    %399 = vector.broadcast %cst_103 : f32 to vector<8x32xf32>
    %400 = arith.addf %399, %398 : vector<8x32xf32>
    %401 = arith.divf %399, %400 : vector<8x32xf32>
    %402 = vector.extract_strided_slice %391 {offsets = [0, 32], sizes = [8, 16], strides = [1, 1]} : vector<8x48xf32> to vector<8x16xf32>
    %403 = vector.extract_strided_slice %401 {offsets = [0, 0], sizes = [8, 16], strides = [1, 1]} : vector<8x32xf32> to vector<8x16xf32>
    %404 = vector.extract_strided_slice %393 {offsets = [0, 32], sizes = [8, 16], strides = [1, 1]} : vector<8x48xf32> to vector<8x16xf32>
    %405 = arith.addf %404, %11 : vector<8x16xf32>
    %406 = arith.mulf %403, %405 : vector<8x16xf32>
    %407 = arith.addf %402, %406 : vector<8x16xf32>
    %408 = math.tanh %407 : vector<8x16xf32>
    %409 = vector.extract_strided_slice %401 {offsets = [0, 16], sizes = [8, 16], strides = [1, 1]} : vector<8x32xf32> to vector<8x16xf32>
    %410 = arith.subf %356, %408 : vector<8x16xf32>
    %411 = arith.mulf %409, %410 : vector<8x16xf32>
    %412 = arith.addf %408, %411 : vector<8x16xf32>
    %413 = vector.shape_cast %389 : vector<8x1xf32> to vector<8x1xf32>
    %414 = vector.broadcast %413 : vector<8x1xf32> to vector<8x16xf32>
    %415 = arith.mulf %414, %412 : vector<8x16xf32>
    %416 = arith.subf %412, %356 : vector<8x16xf32>
    %417 = arith.mulf %414, %416 : vector<8x16xf32>
    %418 = arith.addf %356, %417 : vector<8x16xf32>
    %c8_104 = arith.constant 8 : index
    %c48_105 = arith.constant 48 : index
    %419 = vector.load %arg8[%c8_104, %c48_105] : memref<64x96xf32, #tpu.memory_space<vmem>>, vector<8x48xf32>
    %420 = arith.truncf %384 : vector<8x16xf32> to vector<8x16xbf16>
    %cst_106 = arith.constant dense<0.000000e+00> : vector<8x48xf32>
    %421 = tpu.matmul %420, %8, %cst_106 {dimension_numbers = #tpu.dot_dimension_numbers<[1], [0], [0], [1], [0, 0, 1, 1], [], []>} : vector<8x16xbf16>, vector<16x48xbf16>, vector<8x48xf32> -> vector<8x48xf32>
    %422 = vector.extract_strided_slice %419 {offsets = [0, 0], sizes = [8, 32], strides = [1, 1]} : vector<8x48xf32> to vector<8x32xf32>
    %423 = vector.extract_strided_slice %421 {offsets = [0, 0], sizes = [8, 32], strides = [1, 1]} : vector<8x48xf32> to vector<8x32xf32>
    %424 = arith.addf %422, %423 : vector<8x32xf32>
    %425 = arith.negf %424 : vector<8x32xf32>
    %426 = math.exp %425 : vector<8x32xf32>
    %cst_107 = arith.constant 1.000000e+00 : f32
    %427 = vector.broadcast %cst_107 : f32 to vector<8x32xf32>
    %428 = arith.addf %427, %426 : vector<8x32xf32>
    %429 = arith.divf %427, %428 : vector<8x32xf32>
    %430 = vector.extract_strided_slice %419 {offsets = [0, 32], sizes = [8, 16], strides = [1, 1]} : vector<8x48xf32> to vector<8x16xf32>
    %431 = vector.extract_strided_slice %429 {offsets = [0, 0], sizes = [8, 16], strides = [1, 1]} : vector<8x32xf32> to vector<8x16xf32>
    %432 = vector.extract_strided_slice %421 {offsets = [0, 32], sizes = [8, 16], strides = [1, 1]} : vector<8x48xf32> to vector<8x16xf32>
    %433 = arith.addf %432, %14 : vector<8x16xf32>
    %434 = arith.mulf %431, %433 : vector<8x16xf32>
    %435 = arith.addf %430, %434 : vector<8x16xf32>
    %436 = math.tanh %435 : vector<8x16xf32>
    %437 = vector.extract_strided_slice %429 {offsets = [0, 16], sizes = [8, 16], strides = [1, 1]} : vector<8x32xf32> to vector<8x16xf32>
    %438 = arith.subf %384, %436 : vector<8x16xf32>
    %439 = arith.mulf %437, %438 : vector<8x16xf32>
    %440 = arith.addf %436, %439 : vector<8x16xf32>
    %441 = vector.shape_cast %390 : vector<8x1xf32> to vector<8x1xf32>
    %442 = vector.broadcast %441 : vector<8x1xf32> to vector<8x16xf32>
    %443 = arith.mulf %442, %440 : vector<8x16xf32>
    %444 = arith.subf %440, %384 : vector<8x16xf32>
    %445 = arith.mulf %442, %444 : vector<8x16xf32>
    %446 = arith.addf %384, %445 : vector<8x16xf32>
    %447 = arith.truncf %415 : vector<8x16xf32> to vector<8x16xbf16>
    %c0_108 = arith.constant 0 : index
    %c192 = arith.constant 192 : index
    %448 = vector.load %arg7[%c0_108, %c192] : memref<8x256xbf16, #tpu.memory_space<vmem>>, vector<8x16xbf16>
    tpu.vector_store %arg7[%c0_108, %c192], %447 {strides = array<i32>} : memref<8x256xbf16, #tpu.memory_space<vmem>>, vector<8x16xbf16>,
    %449 = arith.truncf %443 : vector<8x16xf32> to vector<8x16xbf16>
    %c0_109 = arith.constant 0 : index
    %c48_110 = arith.constant 48 : index
    %450 = vector.load %arg7[%c0_109, %c48_110] : memref<8x256xbf16, #tpu.memory_space<vmem>>, vector<8x16xbf16>
    tpu.vector_store %arg7[%c0_109, %c48_110], %449 {strides = array<i32>} : memref<8x256xbf16, #tpu.memory_space<vmem>>, vector<8x16xbf16>,
    %c56_111 = arith.constant 56 : index
    %c0_112 = arith.constant 0 : index
    %451 = vector.load %arg0[%c56_111, %c0_112] : memref<64x1xf32, #tpu.memory_space<vmem>>, vector<8x1xf32>
    %c0_113 = arith.constant 0 : index
    %c0_114 = arith.constant 0 : index
    %452 = vector.load %arg0[%c0_113, %c0_114] : memref<64x1xf32, #tpu.memory_space<vmem>>, vector<8x1xf32>
    %c56_115 = arith.constant 56 : index
    %c0_116 = arith.constant 0 : index
    %453 = vector.load %arg8[%c56_115, %c0_116] : memref<64x96xf32, #tpu.memory_space<vmem>>, vector<8x48xf32>
    %454 = arith.truncf %418 : vector<8x16xf32> to vector<8x16xbf16>
    %cst_117 = arith.constant dense<0.000000e+00> : vector<8x48xf32>
    %455 = tpu.matmul %454, %7, %cst_117 {dimension_numbers = #tpu.dot_dimension_numbers<[1], [0], [0], [1], [0, 0, 1, 1], [], []>} : vector<8x16xbf16>, vector<16x48xbf16>, vector<8x48xf32> -> vector<8x48xf32>
    %456 = vector.extract_strided_slice %453 {offsets = [0, 0], sizes = [8, 32], strides = [1, 1]} : vector<8x48xf32> to vector<8x32xf32>
    %457 = vector.extract_strided_slice %455 {offsets = [0, 0], sizes = [8, 32], strides = [1, 1]} : vector<8x48xf32> to vector<8x32xf32>
    %458 = arith.addf %456, %457 : vector<8x32xf32>
    %459 = arith.negf %458 : vector<8x32xf32>
    %460 = math.exp %459 : vector<8x32xf32>
    %cst_118 = arith.constant 1.000000e+00 : f32
    %461 = vector.broadcast %cst_118 : f32 to vector<8x32xf32>
    %462 = arith.addf %461, %460 : vector<8x32xf32>
    %463 = arith.divf %461, %462 : vector<8x32xf32>
    %464 = vector.extract_strided_slice %453 {offsets = [0, 32], sizes = [8, 16], strides = [1, 1]} : vector<8x48xf32> to vector<8x16xf32>
    %465 = vector.extract_strided_slice %463 {offsets = [0, 0], sizes = [8, 16], strides = [1, 1]} : vector<8x32xf32> to vector<8x16xf32>
    %466 = vector.extract_strided_slice %455 {offsets = [0, 32], sizes = [8, 16], strides = [1, 1]} : vector<8x48xf32> to vector<8x16xf32>
    %467 = arith.addf %466, %11 : vector<8x16xf32>
    %468 = arith.mulf %465, %467 : vector<8x16xf32>
    %469 = arith.addf %464, %468 : vector<8x16xf32>
    %470 = math.tanh %469 : vector<8x16xf32>
    %471 = vector.extract_strided_slice %463 {offsets = [0, 16], sizes = [8, 16], strides = [1, 1]} : vector<8x32xf32> to vector<8x16xf32>
    %472 = arith.subf %418, %470 : vector<8x16xf32>
    %473 = arith.mulf %471, %472 : vector<8x16xf32>
    %474 = arith.addf %470, %473 : vector<8x16xf32>
    %475 = vector.shape_cast %451 : vector<8x1xf32> to vector<8x1xf32>
    %476 = vector.broadcast %475 : vector<8x1xf32> to vector<8x16xf32>
    %477 = arith.mulf %476, %474 : vector<8x16xf32>
    %c0_119 = arith.constant 0 : index
    %c48_120 = arith.constant 48 : index
    %478 = vector.load %arg8[%c0_119, %c48_120] : memref<64x96xf32, #tpu.memory_space<vmem>>, vector<8x48xf32>
    %479 = arith.truncf %446 : vector<8x16xf32> to vector<8x16xbf16>
    %cst_121 = arith.constant dense<0.000000e+00> : vector<8x48xf32>
    %480 = tpu.matmul %479, %8, %cst_121 {dimension_numbers = #tpu.dot_dimension_numbers<[1], [0], [0], [1], [0, 0, 1, 1], [], []>} : vector<8x16xbf16>, vector<16x48xbf16>, vector<8x48xf32> -> vector<8x48xf32>
    %481 = vector.extract_strided_slice %478 {offsets = [0, 0], sizes = [8, 32], strides = [1, 1]} : vector<8x48xf32> to vector<8x32xf32>
    %482 = vector.extract_strided_slice %480 {offsets = [0, 0], sizes = [8, 32], strides = [1, 1]} : vector<8x48xf32> to vector<8x32xf32>
    %483 = arith.addf %481, %482 : vector<8x32xf32>
    %484 = arith.negf %483 : vector<8x32xf32>
    %485 = math.exp %484 : vector<8x32xf32>
    %cst_122 = arith.constant 1.000000e+00 : f32
    %486 = vector.broadcast %cst_122 : f32 to vector<8x32xf32>
    %487 = arith.addf %486, %485 : vector<8x32xf32>
    %488 = arith.divf %486, %487 : vector<8x32xf32>
    %489 = vector.extract_strided_slice %478 {offsets = [0, 32], sizes = [8, 16], strides = [1, 1]} : vector<8x48xf32> to vector<8x16xf32>
    %490 = vector.extract_strided_slice %488 {offsets = [0, 0], sizes = [8, 16], strides = [1, 1]} : vector<8x32xf32> to vector<8x16xf32>
    %491 = vector.extract_strided_slice %480 {offsets = [0, 32], sizes = [8, 16], strides = [1, 1]} : vector<8x48xf32> to vector<8x16xf32>
    %492 = arith.addf %491, %14 : vector<8x16xf32>
    %493 = arith.mulf %490, %492 : vector<8x16xf32>
    %494 = arith.addf %489, %493 : vector<8x16xf32>
    %495 = math.tanh %494 : vector<8x16xf32>
    %496 = vector.extract_strided_slice %488 {offsets = [0, 16], sizes = [8, 16], strides = [1, 1]} : vector<8x32xf32> to vector<8x16xf32>
    %497 = arith.subf %446, %495 : vector<8x16xf32>
    %498 = arith.mulf %496, %497 : vector<8x16xf32>
    %499 = arith.addf %495, %498 : vector<8x16xf32>
    %500 = vector.shape_cast %452 : vector<8x1xf32> to vector<8x1xf32>
    %501 = vector.broadcast %500 : vector<8x1xf32> to vector<8x16xf32>
    %502 = arith.mulf %501, %499 : vector<8x16xf32>
    %503 = arith.truncf %477 : vector<8x16xf32> to vector<8x16xbf16>
    %c0_123 = arith.constant 0 : index
    %c224 = arith.constant 224 : index
    %504 = vector.load %arg7[%c0_123, %c224] : memref<8x256xbf16, #tpu.memory_space<vmem>>, vector<8x16xbf16>
    tpu.vector_store %arg7[%c0_123, %c224], %503 {strides = array<i32>} : memref<8x256xbf16, #tpu.memory_space<vmem>>, vector<8x16xbf16>,
    %505 = arith.truncf %502 : vector<8x16xf32> to vector<8x16xbf16>
    %c0_124 = arith.constant 0 : index
    %c16_125 = arith.constant 16 : index
    %506 = vector.load %arg7[%c0_124, %c16_125] : memref<8x256xbf16, #tpu.memory_space<vmem>>, vector<8x16xbf16>
    tpu.vector_store %arg7[%c0_124, %c16_125], %505 {strides = array<i32>} : memref<8x256xbf16, #tpu.memory_space<vmem>>, vector<8x16xbf16>,
    return
  }
}

module attributes {stable_mosaic.version = 11 : i64} {
  func.func @kernel(%arg0: memref<8x1xf32, #tpu.memory_space<vmem>>, %arg1: memref<8x8xbf16, #tpu.memory_space<vmem>>, %arg2: memref<8x264xbf16, #tpu.memory_space<vmem>>, %arg3: memref<8x48xbf16, #tpu.memory_space<vmem>>, %arg4: memref<1x48xf32, #tpu.memory_space<vmem>>, %arg5: memref<8x24xbf16, #tpu.memory_space<vmem>>, %arg6: memref<8x24xbf16, #tpu.memory_space<vmem>>, %arg7: memref<1x16xf32, #tpu.memory_space<vmem>>, %arg8: memref<264x96xbf16, #tpu.memory_space<vmem>>, %arg9: memref<1x96xf32, #tpu.memory_space<vmem>>, %arg10: memref<16x48xbf16, #tpu.memory_space<vmem>>, %arg11: memref<16x48xbf16, #tpu.memory_space<vmem>>, %arg12: memref<1x32xf32, #tpu.memory_space<vmem>>, %arg13: memref<32x10xbf16, #tpu.memory_space<vmem>>, %arg14: memref<1x10xf32, #tpu.memory_space<vmem>>, %arg15: memref<8x16xf32, #tpu.memory_space<vmem>>, %arg16: memref<8x10xf32, #tpu.memory_space<vmem>>, %arg17: memref<8x48xf32, #tpu.memory_space<vmem>>, %arg18: memref<8x96xf32, #tpu.memory_space<vmem>>, %arg19: memref<8x32xbf16, #tpu.memory_space<vmem>>) attributes {dimension_semantics = [], scalar_prefetch = 0 : i64, scratch_operands = 3 : i64, tpu.core_type = #tpu.core_type<tc>} {
    %c0 = arith.constant 0 : index
    %c0_0 = arith.constant 0 : index
    %0 = vector.load %arg1[%c0, %c0_0] : memref<8x8xbf16, #tpu.memory_space<vmem>>, vector<8x8xbf16>
    %c0_1 = arith.constant 0 : index
    %c0_2 = arith.constant 0 : index
    %1 = vector.load %arg3[%c0_1, %c0_2] : memref<8x48xbf16, #tpu.memory_space<vmem>>, vector<8x48xbf16>
    %cst = arith.constant dense<0.000000e+00> : vector<8x48xf32>
    %2 = tpu.matmul %0, %1, %cst {dimension_numbers = #tpu.dot_dimension_numbers<[1], [0], [0], [1], [0, 0, 1, 1], [], []>} : vector<8x8xbf16>, vector<8x48xbf16>, vector<8x48xf32> -> vector<8x48xf32>
    %c0_3 = arith.constant 0 : index
    %c0_4 = arith.constant 0 : index
    %3 = vector.load %arg4[%c0_3, %c0_4] : memref<1x48xf32, #tpu.memory_space<vmem>>, vector<1x48xf32>
    %4 = vector.broadcast %3 : vector<1x48xf32> to vector<8x48xf32>
    %5 = arith.addf %2, %4 : vector<8x48xf32>
    %c0_5 = arith.constant 0 : index
    %c0_6 = arith.constant 0 : index
    %6 = vector.load %arg17[%c0_5, %c0_6] : memref<8x48xf32, #tpu.memory_space<vmem>>, vector<8x48xf32>
    tpu.vector_store %arg17[%c0_5, %c0_6], %5 {strides = array<i32>} : memref<8x48xf32, #tpu.memory_space<vmem>>, vector<8x48xf32>,
    %c0_7 = arith.constant 0 : index
    %c0_8 = arith.constant 0 : index
    %7 = vector.load %arg2[%c0_7, %c0_8] : memref<8x264xbf16, #tpu.memory_space<vmem>>, vector<8x264xbf16>
    %c0_9 = arith.constant 0 : index
    %c0_10 = arith.constant 0 : index
    %8 = vector.load %arg8[%c0_9, %c0_10] : memref<264x96xbf16, #tpu.memory_space<vmem>>, vector<264x96xbf16>
    %cst_11 = arith.constant dense<0.000000e+00> : vector<8x96xf32>
    %9 = tpu.matmul %7, %8, %cst_11 {dimension_numbers = #tpu.dot_dimension_numbers<[1], [0], [0], [1], [0, 0, 1, 1], [], []>} : vector<8x264xbf16>, vector<264x96xbf16>, vector<8x96xf32> -> vector<8x96xf32>
    %c0_12 = arith.constant 0 : index
    %c0_13 = arith.constant 0 : index
    %10 = vector.load %arg9[%c0_12, %c0_13] : memref<1x96xf32, #tpu.memory_space<vmem>>, vector<1x96xf32>
    %11 = vector.broadcast %10 : vector<1x96xf32> to vector<8x96xf32>
    %12 = arith.addf %9, %11 : vector<8x96xf32>
    %c0_14 = arith.constant 0 : index
    %c0_15 = arith.constant 0 : index
    %13 = vector.load %arg18[%c0_14, %c0_15] : memref<8x96xf32, #tpu.memory_space<vmem>>, vector<8x96xf32>
    tpu.vector_store %arg18[%c0_14, %c0_15], %12 {strides = array<i32>} : memref<8x96xf32, #tpu.memory_space<vmem>>, vector<8x96xf32>,
    %c0_16 = arith.constant 0 : index
    %c0_17 = arith.constant 0 : index
    %14 = vector.load %arg5[%c0_16, %c0_17] : memref<8x24xbf16, #tpu.memory_space<vmem>>, vector<8x24xbf16>
    %c0_18 = arith.constant 0 : index
    %c0_19 = arith.constant 0 : index
    %15 = vector.load %arg6[%c0_18, %c0_19] : memref<8x24xbf16, #tpu.memory_space<vmem>>, vector<8x24xbf16>
    %c0_20 = arith.constant 0 : index
    %c0_21 = arith.constant 0 : index
    %16 = vector.load %arg10[%c0_20, %c0_21] : memref<16x48xbf16, #tpu.memory_space<vmem>>, vector<16x48xbf16>
    %c0_22 = arith.constant 0 : index
    %c0_23 = arith.constant 0 : index
    %17 = vector.load %arg11[%c0_22, %c0_23] : memref<16x48xbf16, #tpu.memory_space<vmem>>, vector<16x48xbf16>
    %c0_24 = arith.constant 0 : index
    %c0_25 = arith.constant 0 : index
    %18 = vector.load %arg7[%c0_24, %c0_25] : memref<1x16xf32, #tpu.memory_space<vmem>>, vector<1x8xf32>
    %19 = vector.shape_cast %18 : vector<1x8xf32> to vector<1x8xf32>
    %20 = vector.broadcast %19 : vector<1x8xf32> to vector<2x8xf32>
    %c0_26 = arith.constant 0 : index
    %c8 = arith.constant 8 : index
    %21 = vector.load %arg7[%c0_26, %c8] : memref<1x16xf32, #tpu.memory_space<vmem>>, vector<1x8xf32>
    %22 = vector.shape_cast %21 : vector<1x8xf32> to vector<1x8xf32>
    %23 = vector.broadcast %22 : vector<1x8xf32> to vector<2x8xf32>
    %c0_27 = arith.constant 0 : index
    %c0_28 = arith.constant 0 : index
    %24 = vector.load %arg12[%c0_27, %c0_28] : memref<1x32xf32, #tpu.memory_space<vmem>>, vector<1x16xf32>
    %25 = vector.shape_cast %24 : vector<1x16xf32> to vector<1x16xf32>
    %26 = vector.broadcast %25 : vector<1x16xf32> to vector<2x16xf32>
    %c0_29 = arith.constant 0 : index
    %c16 = arith.constant 16 : index
    %27 = vector.load %arg12[%c0_29, %c16] : memref<1x32xf32, #tpu.memory_space<vmem>>, vector<1x16xf32>
    %28 = vector.shape_cast %27 : vector<1x16xf32> to vector<1x16xf32>
    %29 = vector.broadcast %28 : vector<1x16xf32> to vector<2x16xf32>
    %cst_30 = arith.constant 0.000000e+00 : f32
    %30 = vector.broadcast %cst_30 : f32 to vector<2x8xf32>
    %cst_31 = arith.constant 0.000000e+00 : f32
    %31 = vector.broadcast %cst_31 : f32 to vector<2x8xf32>
    %cst_32 = arith.constant 0.000000e+00 : f32
    %32 = vector.broadcast %cst_32 : f32 to vector<2x16xf32>
    %cst_33 = arith.constant 0.000000e+00 : f32
    %33 = vector.broadcast %cst_33 : f32 to vector<2x16xf32>
    %c0_34 = arith.constant 0 : index
    %c0_35 = arith.constant 0 : index
    %34 = vector.load %arg0[%c0_34, %c0_35] : memref<8x1xf32, #tpu.memory_space<vmem>>, vector<2x1xf32>
    %c6 = arith.constant 6 : index
    %c0_36 = arith.constant 0 : index
    %35 = vector.load %arg0[%c6, %c0_36] : memref<8x1xf32, #tpu.memory_space<vmem>>, vector<2x1xf32>
    %c0_37 = arith.constant 0 : index
    %c0_38 = arith.constant 0 : index
    %36 = vector.load %arg17[%c0_37, %c0_38] : memref<8x48xf32, #tpu.memory_space<vmem>>, vector<2x24xf32>
    %37 = arith.truncf %30 : vector<2x8xf32> to vector<2x8xbf16>
    %cst_39 = arith.constant dense<0.000000e+00> : vector<2x24xf32>
    %38 = tpu.matmul %37, %14, %cst_39 {dimension_numbers = #tpu.dot_dimension_numbers<[1], [0], [0], [1], [0, 0, 1, 1], [], []>} : vector<2x8xbf16>, vector<8x24xbf16>, vector<2x24xf32> -> vector<2x24xf32>
    %39 = vector.extract_strided_slice %36 {offsets = [0, 0], sizes = [2, 16], strides = [1, 1]} : vector<2x24xf32> to vector<2x16xf32>
    %40 = vector.extract_strided_slice %38 {offsets = [0, 0], sizes = [2, 16], strides = [1, 1]} : vector<2x24xf32> to vector<2x16xf32>
    %41 = arith.addf %39, %40 : vector<2x16xf32>
    %42 = arith.negf %41 : vector<2x16xf32>
    %43 = math.exp %42 : vector<2x16xf32>
    %cst_40 = arith.constant 1.000000e+00 : f32
    %44 = vector.broadcast %cst_40 : f32 to vector<2x16xf32>
    %45 = arith.addf %44, %43 : vector<2x16xf32>
    %46 = arith.divf %44, %45 : vector<2x16xf32>
    %47 = vector.extract_strided_slice %36 {offsets = [0, 16], sizes = [2, 8], strides = [1, 1]} : vector<2x24xf32> to vector<2x8xf32>
    %48 = vector.extract_strided_slice %46 {offsets = [0, 0], sizes = [2, 8], strides = [1, 1]} : vector<2x16xf32> to vector<2x8xf32>
    %49 = vector.extract_strided_slice %38 {offsets = [0, 16], sizes = [2, 8], strides = [1, 1]} : vector<2x24xf32> to vector<2x8xf32>
    %50 = arith.addf %49, %20 : vector<2x8xf32>
    %51 = arith.mulf %48, %50 : vector<2x8xf32>
    %52 = arith.addf %47, %51 : vector<2x8xf32>
    %53 = math.tanh %52 : vector<2x8xf32>
    %54 = vector.extract_strided_slice %46 {offsets = [0, 8], sizes = [2, 8], strides = [1, 1]} : vector<2x16xf32> to vector<2x8xf32>
    %55 = arith.subf %30, %53 : vector<2x8xf32>
    %56 = arith.mulf %54, %55 : vector<2x8xf32>
    %57 = arith.addf %53, %56 : vector<2x8xf32>
    %58 = vector.shape_cast %34 : vector<2x1xf32> to vector<2x1xf32>
    %59 = vector.broadcast %58 : vector<2x1xf32> to vector<2x8xf32>
    %60 = arith.mulf %59, %57 : vector<2x8xf32>
    %61 = arith.subf %57, %30 : vector<2x8xf32>
    %62 = arith.mulf %59, %61 : vector<2x8xf32>
    %63 = arith.addf %30, %62 : vector<2x8xf32>
    %c0_41 = arith.constant 0 : index
    %c0_42 = arith.constant 0 : index
    %64 = vector.load %arg18[%c0_41, %c0_42] : memref<8x96xf32, #tpu.memory_space<vmem>>, vector<2x48xf32>
    %65 = arith.truncf %32 : vector<2x16xf32> to vector<2x16xbf16>
    %cst_43 = arith.constant dense<0.000000e+00> : vector<2x48xf32>
    %66 = tpu.matmul %65, %16, %cst_43 {dimension_numbers = #tpu.dot_dimension_numbers<[1], [0], [0], [1], [0, 0, 1, 1], [], []>} : vector<2x16xbf16>, vector<16x48xbf16>, vector<2x48xf32> -> vector<2x48xf32>
    %67 = vector.extract_strided_slice %64 {offsets = [0, 0], sizes = [2, 32], strides = [1, 1]} : vector<2x48xf32> to vector<2x32xf32>
    %68 = vector.extract_strided_slice %66 {offsets = [0, 0], sizes = [2, 32], strides = [1, 1]} : vector<2x48xf32> to vector<2x32xf32>
    %69 = arith.addf %67, %68 : vector<2x32xf32>
    %70 = arith.negf %69 : vector<2x32xf32>
    %71 = math.exp %70 : vector<2x32xf32>
    %cst_44 = arith.constant 1.000000e+00 : f32
    %72 = vector.broadcast %cst_44 : f32 to vector<2x32xf32>
    %73 = arith.addf %72, %71 : vector<2x32xf32>
    %74 = arith.divf %72, %73 : vector<2x32xf32>
    %75 = vector.extract_strided_slice %64 {offsets = [0, 32], sizes = [2, 16], strides = [1, 1]} : vector<2x48xf32> to vector<2x16xf32>
    %76 = vector.extract_strided_slice %74 {offsets = [0, 0], sizes = [2, 16], strides = [1, 1]} : vector<2x32xf32> to vector<2x16xf32>
    %77 = vector.extract_strided_slice %66 {offsets = [0, 32], sizes = [2, 16], strides = [1, 1]} : vector<2x48xf32> to vector<2x16xf32>
    %78 = arith.addf %77, %26 : vector<2x16xf32>
    %79 = arith.mulf %76, %78 : vector<2x16xf32>
    %80 = arith.addf %75, %79 : vector<2x16xf32>
    %81 = math.tanh %80 : vector<2x16xf32>
    %82 = vector.extract_strided_slice %74 {offsets = [0, 16], sizes = [2, 16], strides = [1, 1]} : vector<2x32xf32> to vector<2x16xf32>
    %83 = arith.subf %32, %81 : vector<2x16xf32>
    %84 = arith.mulf %82, %83 : vector<2x16xf32>
    %85 = arith.addf %81, %84 : vector<2x16xf32>
    %86 = vector.shape_cast %34 : vector<2x1xf32> to vector<2x1xf32>
    %87 = vector.broadcast %86 : vector<2x1xf32> to vector<2x16xf32>
    %88 = arith.mulf %87, %85 : vector<2x16xf32>
    %89 = arith.subf %85, %32 : vector<2x16xf32>
    %90 = arith.mulf %87, %89 : vector<2x16xf32>
    %91 = arith.addf %32, %90 : vector<2x16xf32>
    %c6_45 = arith.constant 6 : index
    %c24 = arith.constant 24 : index
    %92 = vector.load %arg17[%c6_45, %c24] : memref<8x48xf32, #tpu.memory_space<vmem>>, vector<2x24xf32>
    %93 = arith.truncf %31 : vector<2x8xf32> to vector<2x8xbf16>
    %cst_46 = arith.constant dense<0.000000e+00> : vector<2x24xf32>
    %94 = tpu.matmul %93, %15, %cst_46 {dimension_numbers = #tpu.dot_dimension_numbers<[1], [0], [0], [1], [0, 0, 1, 1], [], []>} : vector<2x8xbf16>, vector<8x24xbf16>, vector<2x24xf32> -> vector<2x24xf32>
    %95 = vector.extract_strided_slice %92 {offsets = [0, 0], sizes = [2, 16], strides = [1, 1]} : vector<2x24xf32> to vector<2x16xf32>
    %96 = vector.extract_strided_slice %94 {offsets = [0, 0], sizes = [2, 16], strides = [1, 1]} : vector<2x24xf32> to vector<2x16xf32>
    %97 = arith.addf %95, %96 : vector<2x16xf32>
    %98 = arith.negf %97 : vector<2x16xf32>
    %99 = math.exp %98 : vector<2x16xf32>
    %cst_47 = arith.constant 1.000000e+00 : f32
    %100 = vector.broadcast %cst_47 : f32 to vector<2x16xf32>
    %101 = arith.addf %100, %99 : vector<2x16xf32>
    %102 = arith.divf %100, %101 : vector<2x16xf32>
    %103 = vector.extract_strided_slice %92 {offsets = [0, 16], sizes = [2, 8], strides = [1, 1]} : vector<2x24xf32> to vector<2x8xf32>
    %104 = vector.extract_strided_slice %102 {offsets = [0, 0], sizes = [2, 8], strides = [1, 1]} : vector<2x16xf32> to vector<2x8xf32>
    %105 = vector.extract_strided_slice %94 {offsets = [0, 16], sizes = [2, 8], strides = [1, 1]} : vector<2x24xf32> to vector<2x8xf32>
    %106 = arith.addf %105, %23 : vector<2x8xf32>
    %107 = arith.mulf %104, %106 : vector<2x8xf32>
    %108 = arith.addf %103, %107 : vector<2x8xf32>
    %109 = math.tanh %108 : vector<2x8xf32>
    %110 = vector.extract_strided_slice %102 {offsets = [0, 8], sizes = [2, 8], strides = [1, 1]} : vector<2x16xf32> to vector<2x8xf32>
    %111 = arith.subf %31, %109 : vector<2x8xf32>
    %112 = arith.mulf %110, %111 : vector<2x8xf32>
    %113 = arith.addf %109, %112 : vector<2x8xf32>
    %114 = vector.shape_cast %35 : vector<2x1xf32> to vector<2x1xf32>
    %115 = vector.broadcast %114 : vector<2x1xf32> to vector<2x8xf32>
    %116 = arith.mulf %115, %113 : vector<2x8xf32>
    %117 = arith.subf %113, %31 : vector<2x8xf32>
    %118 = arith.mulf %115, %117 : vector<2x8xf32>
    %119 = arith.addf %31, %118 : vector<2x8xf32>
    %c6_48 = arith.constant 6 : index
    %c48 = arith.constant 48 : index
    %120 = vector.load %arg18[%c6_48, %c48] : memref<8x96xf32, #tpu.memory_space<vmem>>, vector<2x48xf32>
    %121 = arith.truncf %33 : vector<2x16xf32> to vector<2x16xbf16>
    %cst_49 = arith.constant dense<0.000000e+00> : vector<2x48xf32>
    %122 = tpu.matmul %121, %17, %cst_49 {dimension_numbers = #tpu.dot_dimension_numbers<[1], [0], [0], [1], [0, 0, 1, 1], [], []>} : vector<2x16xbf16>, vector<16x48xbf16>, vector<2x48xf32> -> vector<2x48xf32>
    %123 = vector.extract_strided_slice %120 {offsets = [0, 0], sizes = [2, 32], strides = [1, 1]} : vector<2x48xf32> to vector<2x32xf32>
    %124 = vector.extract_strided_slice %122 {offsets = [0, 0], sizes = [2, 32], strides = [1, 1]} : vector<2x48xf32> to vector<2x32xf32>
    %125 = arith.addf %123, %124 : vector<2x32xf32>
    %126 = arith.negf %125 : vector<2x32xf32>
    %127 = math.exp %126 : vector<2x32xf32>
    %cst_50 = arith.constant 1.000000e+00 : f32
    %128 = vector.broadcast %cst_50 : f32 to vector<2x32xf32>
    %129 = arith.addf %128, %127 : vector<2x32xf32>
    %130 = arith.divf %128, %129 : vector<2x32xf32>
    %131 = vector.extract_strided_slice %120 {offsets = [0, 32], sizes = [2, 16], strides = [1, 1]} : vector<2x48xf32> to vector<2x16xf32>
    %132 = vector.extract_strided_slice %130 {offsets = [0, 0], sizes = [2, 16], strides = [1, 1]} : vector<2x32xf32> to vector<2x16xf32>
    %133 = vector.extract_strided_slice %122 {offsets = [0, 32], sizes = [2, 16], strides = [1, 1]} : vector<2x48xf32> to vector<2x16xf32>
    %134 = arith.addf %133, %29 : vector<2x16xf32>
    %135 = arith.mulf %132, %134 : vector<2x16xf32>
    %136 = arith.addf %131, %135 : vector<2x16xf32>
    %137 = math.tanh %136 : vector<2x16xf32>
    %138 = vector.extract_strided_slice %130 {offsets = [0, 16], sizes = [2, 16], strides = [1, 1]} : vector<2x32xf32> to vector<2x16xf32>
    %139 = arith.subf %33, %137 : vector<2x16xf32>
    %140 = arith.mulf %138, %139 : vector<2x16xf32>
    %141 = arith.addf %137, %140 : vector<2x16xf32>
    %142 = vector.shape_cast %35 : vector<2x1xf32> to vector<2x1xf32>
    %143 = vector.broadcast %142 : vector<2x1xf32> to vector<2x16xf32>
    %144 = arith.mulf %143, %141 : vector<2x16xf32>
    %145 = arith.subf %141, %33 : vector<2x16xf32>
    %146 = arith.mulf %143, %145 : vector<2x16xf32>
    %147 = arith.addf %33, %146 : vector<2x16xf32>
    %c0_51 = arith.constant 0 : index
    %c0_52 = arith.constant 0 : index
    %148 = vector.load %arg15[%c0_51, %c0_52] : memref<8x16xf32, #tpu.memory_space<vmem>>, vector<2x8xf32>
    tpu.vector_store %arg15[%c0_51, %c0_52], %60 {strides = array<i32>} : memref<8x16xf32, #tpu.memory_space<vmem>>, vector<2x8xf32>,
    %c6_53 = arith.constant 6 : index
    %c8_54 = arith.constant 8 : index
    %149 = vector.load %arg15[%c6_53, %c8_54] : memref<8x16xf32, #tpu.memory_space<vmem>>, vector<2x8xf32>
    tpu.vector_store %arg15[%c6_53, %c8_54], %116 {strides = array<i32>} : memref<8x16xf32, #tpu.memory_space<vmem>>, vector<2x8xf32>,
    %150 = arith.truncf %88 : vector<2x16xf32> to vector<2x16xbf16>
    %c0_55 = arith.constant 0 : index
    %c0_56 = arith.constant 0 : index
    %151 = vector.load %arg19[%c0_55, %c0_56] : memref<8x32xbf16, #tpu.memory_space<vmem>>, vector<2x16xbf16>
    tpu.vector_store %arg19[%c0_55, %c0_56], %150 {strides = array<i32>} : memref<8x32xbf16, #tpu.memory_space<vmem>>, vector<2x16xbf16>,
    %152 = arith.truncf %144 : vector<2x16xf32> to vector<2x16xbf16>
    %c6_57 = arith.constant 6 : index
    %c16_58 = arith.constant 16 : index
    %153 = vector.load %arg19[%c6_57, %c16_58] : memref<8x32xbf16, #tpu.memory_space<vmem>>, vector<2x16xbf16>
    tpu.vector_store %arg19[%c6_57, %c16_58], %152 {strides = array<i32>} : memref<8x32xbf16, #tpu.memory_space<vmem>>, vector<2x16xbf16>,
    %c2 = arith.constant 2 : index
    %c0_59 = arith.constant 0 : index
    %154 = vector.load %arg0[%c2, %c0_59] : memref<8x1xf32, #tpu.memory_space<vmem>>, vector<2x1xf32>
    %c4 = arith.constant 4 : index
    %c0_60 = arith.constant 0 : index
    %155 = vector.load %arg0[%c4, %c0_60] : memref<8x1xf32, #tpu.memory_space<vmem>>, vector<2x1xf32>
    %c2_61 = arith.constant 2 : index
    %c0_62 = arith.constant 0 : index
    %156 = vector.load %arg17[%c2_61, %c0_62] : memref<8x48xf32, #tpu.memory_space<vmem>>, vector<2x24xf32>
    %157 = arith.truncf %63 : vector<2x8xf32> to vector<2x8xbf16>
    %cst_63 = arith.constant dense<0.000000e+00> : vector<2x24xf32>
    %158 = tpu.matmul %157, %14, %cst_63 {dimension_numbers = #tpu.dot_dimension_numbers<[1], [0], [0], [1], [0, 0, 1, 1], [], []>} : vector<2x8xbf16>, vector<8x24xbf16>, vector<2x24xf32> -> vector<2x24xf32>
    %159 = vector.extract_strided_slice %156 {offsets = [0, 0], sizes = [2, 16], strides = [1, 1]} : vector<2x24xf32> to vector<2x16xf32>
    %160 = vector.extract_strided_slice %158 {offsets = [0, 0], sizes = [2, 16], strides = [1, 1]} : vector<2x24xf32> to vector<2x16xf32>
    %161 = arith.addf %159, %160 : vector<2x16xf32>
    %162 = arith.negf %161 : vector<2x16xf32>
    %163 = math.exp %162 : vector<2x16xf32>
    %cst_64 = arith.constant 1.000000e+00 : f32
    %164 = vector.broadcast %cst_64 : f32 to vector<2x16xf32>
    %165 = arith.addf %164, %163 : vector<2x16xf32>
    %166 = arith.divf %164, %165 : vector<2x16xf32>
    %167 = vector.extract_strided_slice %156 {offsets = [0, 16], sizes = [2, 8], strides = [1, 1]} : vector<2x24xf32> to vector<2x8xf32>
    %168 = vector.extract_strided_slice %166 {offsets = [0, 0], sizes = [2, 8], strides = [1, 1]} : vector<2x16xf32> to vector<2x8xf32>
    %169 = vector.extract_strided_slice %158 {offsets = [0, 16], sizes = [2, 8], strides = [1, 1]} : vector<2x24xf32> to vector<2x8xf32>
    %170 = arith.addf %169, %20 : vector<2x8xf32>
    %171 = arith.mulf %168, %170 : vector<2x8xf32>
    %172 = arith.addf %167, %171 : vector<2x8xf32>
    %173 = math.tanh %172 : vector<2x8xf32>
    %174 = vector.extract_strided_slice %166 {offsets = [0, 8], sizes = [2, 8], strides = [1, 1]} : vector<2x16xf32> to vector<2x8xf32>
    %175 = arith.subf %63, %173 : vector<2x8xf32>
    %176 = arith.mulf %174, %175 : vector<2x8xf32>
    %177 = arith.addf %173, %176 : vector<2x8xf32>
    %178 = vector.shape_cast %154 : vector<2x1xf32> to vector<2x1xf32>
    %179 = vector.broadcast %178 : vector<2x1xf32> to vector<2x8xf32>
    %180 = arith.mulf %179, %177 : vector<2x8xf32>
    %181 = arith.subf %177, %63 : vector<2x8xf32>
    %182 = arith.mulf %179, %181 : vector<2x8xf32>
    %183 = arith.addf %63, %182 : vector<2x8xf32>
    %c2_65 = arith.constant 2 : index
    %c0_66 = arith.constant 0 : index
    %184 = vector.load %arg18[%c2_65, %c0_66] : memref<8x96xf32, #tpu.memory_space<vmem>>, vector<2x48xf32>
    %185 = arith.truncf %91 : vector<2x16xf32> to vector<2x16xbf16>
    %cst_67 = arith.constant dense<0.000000e+00> : vector<2x48xf32>
    %186 = tpu.matmul %185, %16, %cst_67 {dimension_numbers = #tpu.dot_dimension_numbers<[1], [0], [0], [1], [0, 0, 1, 1], [], []>} : vector<2x16xbf16>, vector<16x48xbf16>, vector<2x48xf32> -> vector<2x48xf32>
    %187 = vector.extract_strided_slice %184 {offsets = [0, 0], sizes = [2, 32], strides = [1, 1]} : vector<2x48xf32> to vector<2x32xf32>
    %188 = vector.extract_strided_slice %186 {offsets = [0, 0], sizes = [2, 32], strides = [1, 1]} : vector<2x48xf32> to vector<2x32xf32>
    %189 = arith.addf %187, %188 : vector<2x32xf32>
    %190 = arith.negf %189 : vector<2x32xf32>
    %191 = math.exp %190 : vector<2x32xf32>
    %cst_68 = arith.constant 1.000000e+00 : f32
    %192 = vector.broadcast %cst_68 : f32 to vector<2x32xf32>
    %193 = arith.addf %192, %191 : vector<2x32xf32>
    %194 = arith.divf %192, %193 : vector<2x32xf32>
    %195 = vector.extract_strided_slice %184 {offsets = [0, 32], sizes = [2, 16], strides = [1, 1]} : vector<2x48xf32> to vector<2x16xf32>
    %196 = vector.extract_strided_slice %194 {offsets = [0, 0], sizes = [2, 16], strides = [1, 1]} : vector<2x32xf32> to vector<2x16xf32>
    %197 = vector.extract_strided_slice %186 {offsets = [0, 32], sizes = [2, 16], strides = [1, 1]} : vector<2x48xf32> to vector<2x16xf32>
    %198 = arith.addf %197, %26 : vector<2x16xf32>
    %199 = arith.mulf %196, %198 : vector<2x16xf32>
    %200 = arith.addf %195, %199 : vector<2x16xf32>
    %201 = math.tanh %200 : vector<2x16xf32>
    %202 = vector.extract_strided_slice %194 {offsets = [0, 16], sizes = [2, 16], strides = [1, 1]} : vector<2x32xf32> to vector<2x16xf32>
    %203 = arith.subf %91, %201 : vector<2x16xf32>
    %204 = arith.mulf %202, %203 : vector<2x16xf32>
    %205 = arith.addf %201, %204 : vector<2x16xf32>
    %206 = vector.shape_cast %154 : vector<2x1xf32> to vector<2x1xf32>
    %207 = vector.broadcast %206 : vector<2x1xf32> to vector<2x16xf32>
    %208 = arith.mulf %207, %205 : vector<2x16xf32>
    %209 = arith.subf %205, %91 : vector<2x16xf32>
    %210 = arith.mulf %207, %209 : vector<2x16xf32>
    %211 = arith.addf %91, %210 : vector<2x16xf32>
    %c4_69 = arith.constant 4 : index
    %c24_70 = arith.constant 24 : index
    %212 = vector.load %arg17[%c4_69, %c24_70] : memref<8x48xf32, #tpu.memory_space<vmem>>, vector<2x24xf32>
    %213 = arith.truncf %119 : vector<2x8xf32> to vector<2x8xbf16>
    %cst_71 = arith.constant dense<0.000000e+00> : vector<2x24xf32>
    %214 = tpu.matmul %213, %15, %cst_71 {dimension_numbers = #tpu.dot_dimension_numbers<[1], [0], [0], [1], [0, 0, 1, 1], [], []>} : vector<2x8xbf16>, vector<8x24xbf16>, vector<2x24xf32> -> vector<2x24xf32>
    %215 = vector.extract_strided_slice %212 {offsets = [0, 0], sizes = [2, 16], strides = [1, 1]} : vector<2x24xf32> to vector<2x16xf32>
    %216 = vector.extract_strided_slice %214 {offsets = [0, 0], sizes = [2, 16], strides = [1, 1]} : vector<2x24xf32> to vector<2x16xf32>
    %217 = arith.addf %215, %216 : vector<2x16xf32>
    %218 = arith.negf %217 : vector<2x16xf32>
    %219 = math.exp %218 : vector<2x16xf32>
    %cst_72 = arith.constant 1.000000e+00 : f32
    %220 = vector.broadcast %cst_72 : f32 to vector<2x16xf32>
    %221 = arith.addf %220, %219 : vector<2x16xf32>
    %222 = arith.divf %220, %221 : vector<2x16xf32>
    %223 = vector.extract_strided_slice %212 {offsets = [0, 16], sizes = [2, 8], strides = [1, 1]} : vector<2x24xf32> to vector<2x8xf32>
    %224 = vector.extract_strided_slice %222 {offsets = [0, 0], sizes = [2, 8], strides = [1, 1]} : vector<2x16xf32> to vector<2x8xf32>
    %225 = vector.extract_strided_slice %214 {offsets = [0, 16], sizes = [2, 8], strides = [1, 1]} : vector<2x24xf32> to vector<2x8xf32>
    %226 = arith.addf %225, %23 : vector<2x8xf32>
    %227 = arith.mulf %224, %226 : vector<2x8xf32>
    %228 = arith.addf %223, %227 : vector<2x8xf32>
    %229 = math.tanh %228 : vector<2x8xf32>
    %230 = vector.extract_strided_slice %222 {offsets = [0, 8], sizes = [2, 8], strides = [1, 1]} : vector<2x16xf32> to vector<2x8xf32>
    %231 = arith.subf %119, %229 : vector<2x8xf32>
    %232 = arith.mulf %230, %231 : vector<2x8xf32>
    %233 = arith.addf %229, %232 : vector<2x8xf32>
    %234 = vector.shape_cast %155 : vector<2x1xf32> to vector<2x1xf32>
    %235 = vector.broadcast %234 : vector<2x1xf32> to vector<2x8xf32>
    %236 = arith.mulf %235, %233 : vector<2x8xf32>
    %237 = arith.subf %233, %119 : vector<2x8xf32>
    %238 = arith.mulf %235, %237 : vector<2x8xf32>
    %239 = arith.addf %119, %238 : vector<2x8xf32>
    %c4_73 = arith.constant 4 : index
    %c48_74 = arith.constant 48 : index
    %240 = vector.load %arg18[%c4_73, %c48_74] : memref<8x96xf32, #tpu.memory_space<vmem>>, vector<2x48xf32>
    %241 = arith.truncf %147 : vector<2x16xf32> to vector<2x16xbf16>
    %cst_75 = arith.constant dense<0.000000e+00> : vector<2x48xf32>
    %242 = tpu.matmul %241, %17, %cst_75 {dimension_numbers = #tpu.dot_dimension_numbers<[1], [0], [0], [1], [0, 0, 1, 1], [], []>} : vector<2x16xbf16>, vector<16x48xbf16>, vector<2x48xf32> -> vector<2x48xf32>
    %243 = vector.extract_strided_slice %240 {offsets = [0, 0], sizes = [2, 32], strides = [1, 1]} : vector<2x48xf32> to vector<2x32xf32>
    %244 = vector.extract_strided_slice %242 {offsets = [0, 0], sizes = [2, 32], strides = [1, 1]} : vector<2x48xf32> to vector<2x32xf32>
    %245 = arith.addf %243, %244 : vector<2x32xf32>
    %246 = arith.negf %245 : vector<2x32xf32>
    %247 = math.exp %246 : vector<2x32xf32>
    %cst_76 = arith.constant 1.000000e+00 : f32
    %248 = vector.broadcast %cst_76 : f32 to vector<2x32xf32>
    %249 = arith.addf %248, %247 : vector<2x32xf32>
    %250 = arith.divf %248, %249 : vector<2x32xf32>
    %251 = vector.extract_strided_slice %240 {offsets = [0, 32], sizes = [2, 16], strides = [1, 1]} : vector<2x48xf32> to vector<2x16xf32>
    %252 = vector.extract_strided_slice %250 {offsets = [0, 0], sizes = [2, 16], strides = [1, 1]} : vector<2x32xf32> to vector<2x16xf32>
    %253 = vector.extract_strided_slice %242 {offsets = [0, 32], sizes = [2, 16], strides = [1, 1]} : vector<2x48xf32> to vector<2x16xf32>
    %254 = arith.addf %253, %29 : vector<2x16xf32>
    %255 = arith.mulf %252, %254 : vector<2x16xf32>
    %256 = arith.addf %251, %255 : vector<2x16xf32>
    %257 = math.tanh %256 : vector<2x16xf32>
    %258 = vector.extract_strided_slice %250 {offsets = [0, 16], sizes = [2, 16], strides = [1, 1]} : vector<2x32xf32> to vector<2x16xf32>
    %259 = arith.subf %147, %257 : vector<2x16xf32>
    %260 = arith.mulf %258, %259 : vector<2x16xf32>
    %261 = arith.addf %257, %260 : vector<2x16xf32>
    %262 = vector.shape_cast %155 : vector<2x1xf32> to vector<2x1xf32>
    %263 = vector.broadcast %262 : vector<2x1xf32> to vector<2x16xf32>
    %264 = arith.mulf %263, %261 : vector<2x16xf32>
    %265 = arith.subf %261, %147 : vector<2x16xf32>
    %266 = arith.mulf %263, %265 : vector<2x16xf32>
    %267 = arith.addf %147, %266 : vector<2x16xf32>
    %c2_77 = arith.constant 2 : index
    %c0_78 = arith.constant 0 : index
    %268 = vector.load %arg15[%c2_77, %c0_78] : memref<8x16xf32, #tpu.memory_space<vmem>>, vector<2x8xf32>
    tpu.vector_store %arg15[%c2_77, %c0_78], %180 {strides = array<i32>} : memref<8x16xf32, #tpu.memory_space<vmem>>, vector<2x8xf32>,
    %c4_79 = arith.constant 4 : index
    %c8_80 = arith.constant 8 : index
    %269 = vector.load %arg15[%c4_79, %c8_80] : memref<8x16xf32, #tpu.memory_space<vmem>>, vector<2x8xf32>
    tpu.vector_store %arg15[%c4_79, %c8_80], %236 {strides = array<i32>} : memref<8x16xf32, #tpu.memory_space<vmem>>, vector<2x8xf32>,
    %270 = arith.truncf %208 : vector<2x16xf32> to vector<2x16xbf16>
    %c2_81 = arith.constant 2 : index
    %c0_82 = arith.constant 0 : index
    %271 = vector.load %arg19[%c2_81, %c0_82] : memref<8x32xbf16, #tpu.memory_space<vmem>>, vector<2x16xbf16>
    tpu.vector_store %arg19[%c2_81, %c0_82], %270 {strides = array<i32>} : memref<8x32xbf16, #tpu.memory_space<vmem>>, vector<2x16xbf16>,
    %272 = arith.truncf %264 : vector<2x16xf32> to vector<2x16xbf16>
    %c4_83 = arith.constant 4 : index
    %c16_84 = arith.constant 16 : index
    %273 = vector.load %arg19[%c4_83, %c16_84] : memref<8x32xbf16, #tpu.memory_space<vmem>>, vector<2x16xbf16>
    tpu.vector_store %arg19[%c4_83, %c16_84], %272 {strides = array<i32>} : memref<8x32xbf16, #tpu.memory_space<vmem>>, vector<2x16xbf16>,
    %c4_85 = arith.constant 4 : index
    %c0_86 = arith.constant 0 : index
    %274 = vector.load %arg0[%c4_85, %c0_86] : memref<8x1xf32, #tpu.memory_space<vmem>>, vector<2x1xf32>
    %c2_87 = arith.constant 2 : index
    %c0_88 = arith.constant 0 : index
    %275 = vector.load %arg0[%c2_87, %c0_88] : memref<8x1xf32, #tpu.memory_space<vmem>>, vector<2x1xf32>
    %c4_89 = arith.constant 4 : index
    %c0_90 = arith.constant 0 : index
    %276 = vector.load %arg17[%c4_89, %c0_90] : memref<8x48xf32, #tpu.memory_space<vmem>>, vector<2x24xf32>
    %277 = arith.truncf %183 : vector<2x8xf32> to vector<2x8xbf16>
    %cst_91 = arith.constant dense<0.000000e+00> : vector<2x24xf32>
    %278 = tpu.matmul %277, %14, %cst_91 {dimension_numbers = #tpu.dot_dimension_numbers<[1], [0], [0], [1], [0, 0, 1, 1], [], []>} : vector<2x8xbf16>, vector<8x24xbf16>, vector<2x24xf32> -> vector<2x24xf32>
    %279 = vector.extract_strided_slice %276 {offsets = [0, 0], sizes = [2, 16], strides = [1, 1]} : vector<2x24xf32> to vector<2x16xf32>
    %280 = vector.extract_strided_slice %278 {offsets = [0, 0], sizes = [2, 16], strides = [1, 1]} : vector<2x24xf32> to vector<2x16xf32>
    %281 = arith.addf %279, %280 : vector<2x16xf32>
    %282 = arith.negf %281 : vector<2x16xf32>
    %283 = math.exp %282 : vector<2x16xf32>
    %cst_92 = arith.constant 1.000000e+00 : f32
    %284 = vector.broadcast %cst_92 : f32 to vector<2x16xf32>
    %285 = arith.addf %284, %283 : vector<2x16xf32>
    %286 = arith.divf %284, %285 : vector<2x16xf32>
    %287 = vector.extract_strided_slice %276 {offsets = [0, 16], sizes = [2, 8], strides = [1, 1]} : vector<2x24xf32> to vector<2x8xf32>
    %288 = vector.extract_strided_slice %286 {offsets = [0, 0], sizes = [2, 8], strides = [1, 1]} : vector<2x16xf32> to vector<2x8xf32>
    %289 = vector.extract_strided_slice %278 {offsets = [0, 16], sizes = [2, 8], strides = [1, 1]} : vector<2x24xf32> to vector<2x8xf32>
    %290 = arith.addf %289, %20 : vector<2x8xf32>
    %291 = arith.mulf %288, %290 : vector<2x8xf32>
    %292 = arith.addf %287, %291 : vector<2x8xf32>
    %293 = math.tanh %292 : vector<2x8xf32>
    %294 = vector.extract_strided_slice %286 {offsets = [0, 8], sizes = [2, 8], strides = [1, 1]} : vector<2x16xf32> to vector<2x8xf32>
    %295 = arith.subf %183, %293 : vector<2x8xf32>
    %296 = arith.mulf %294, %295 : vector<2x8xf32>
    %297 = arith.addf %293, %296 : vector<2x8xf32>
    %298 = vector.shape_cast %274 : vector<2x1xf32> to vector<2x1xf32>
    %299 = vector.broadcast %298 : vector<2x1xf32> to vector<2x8xf32>
    %300 = arith.mulf %299, %297 : vector<2x8xf32>
    %301 = arith.subf %297, %183 : vector<2x8xf32>
    %302 = arith.mulf %299, %301 : vector<2x8xf32>
    %303 = arith.addf %183, %302 : vector<2x8xf32>
    %c4_93 = arith.constant 4 : index
    %c0_94 = arith.constant 0 : index
    %304 = vector.load %arg18[%c4_93, %c0_94] : memref<8x96xf32, #tpu.memory_space<vmem>>, vector<2x48xf32>
    %305 = arith.truncf %211 : vector<2x16xf32> to vector<2x16xbf16>
    %cst_95 = arith.constant dense<0.000000e+00> : vector<2x48xf32>
    %306 = tpu.matmul %305, %16, %cst_95 {dimension_numbers = #tpu.dot_dimension_numbers<[1], [0], [0], [1], [0, 0, 1, 1], [], []>} : vector<2x16xbf16>, vector<16x48xbf16>, vector<2x48xf32> -> vector<2x48xf32>
    %307 = vector.extract_strided_slice %304 {offsets = [0, 0], sizes = [2, 32], strides = [1, 1]} : vector<2x48xf32> to vector<2x32xf32>
    %308 = vector.extract_strided_slice %306 {offsets = [0, 0], sizes = [2, 32], strides = [1, 1]} : vector<2x48xf32> to vector<2x32xf32>
    %309 = arith.addf %307, %308 : vector<2x32xf32>
    %310 = arith.negf %309 : vector<2x32xf32>
    %311 = math.exp %310 : vector<2x32xf32>
    %cst_96 = arith.constant 1.000000e+00 : f32
    %312 = vector.broadcast %cst_96 : f32 to vector<2x32xf32>
    %313 = arith.addf %312, %311 : vector<2x32xf32>
    %314 = arith.divf %312, %313 : vector<2x32xf32>
    %315 = vector.extract_strided_slice %304 {offsets = [0, 32], sizes = [2, 16], strides = [1, 1]} : vector<2x48xf32> to vector<2x16xf32>
    %316 = vector.extract_strided_slice %314 {offsets = [0, 0], sizes = [2, 16], strides = [1, 1]} : vector<2x32xf32> to vector<2x16xf32>
    %317 = vector.extract_strided_slice %306 {offsets = [0, 32], sizes = [2, 16], strides = [1, 1]} : vector<2x48xf32> to vector<2x16xf32>
    %318 = arith.addf %317, %26 : vector<2x16xf32>
    %319 = arith.mulf %316, %318 : vector<2x16xf32>
    %320 = arith.addf %315, %319 : vector<2x16xf32>
    %321 = math.tanh %320 : vector<2x16xf32>
    %322 = vector.extract_strided_slice %314 {offsets = [0, 16], sizes = [2, 16], strides = [1, 1]} : vector<2x32xf32> to vector<2x16xf32>
    %323 = arith.subf %211, %321 : vector<2x16xf32>
    %324 = arith.mulf %322, %323 : vector<2x16xf32>
    %325 = arith.addf %321, %324 : vector<2x16xf32>
    %326 = vector.shape_cast %274 : vector<2x1xf32> to vector<2x1xf32>
    %327 = vector.broadcast %326 : vector<2x1xf32> to vector<2x16xf32>
    %328 = arith.mulf %327, %325 : vector<2x16xf32>
    %329 = arith.subf %325, %211 : vector<2x16xf32>
    %330 = arith.mulf %327, %329 : vector<2x16xf32>
    %331 = arith.addf %211, %330 : vector<2x16xf32>
    %c2_97 = arith.constant 2 : index
    %c24_98 = arith.constant 24 : index
    %332 = vector.load %arg17[%c2_97, %c24_98] : memref<8x48xf32, #tpu.memory_space<vmem>>, vector<2x24xf32>
    %333 = arith.truncf %239 : vector<2x8xf32> to vector<2x8xbf16>
    %cst_99 = arith.constant dense<0.000000e+00> : vector<2x24xf32>
    %334 = tpu.matmul %333, %15, %cst_99 {dimension_numbers = #tpu.dot_dimension_numbers<[1], [0], [0], [1], [0, 0, 1, 1], [], []>} : vector<2x8xbf16>, vector<8x24xbf16>, vector<2x24xf32> -> vector<2x24xf32>
    %335 = vector.extract_strided_slice %332 {offsets = [0, 0], sizes = [2, 16], strides = [1, 1]} : vector<2x24xf32> to vector<2x16xf32>
    %336 = vector.extract_strided_slice %334 {offsets = [0, 0], sizes = [2, 16], strides = [1, 1]} : vector<2x24xf32> to vector<2x16xf32>
    %337 = arith.addf %335, %336 : vector<2x16xf32>
    %338 = arith.negf %337 : vector<2x16xf32>
    %339 = math.exp %338 : vector<2x16xf32>
    %cst_100 = arith.constant 1.000000e+00 : f32
    %340 = vector.broadcast %cst_100 : f32 to vector<2x16xf32>
    %341 = arith.addf %340, %339 : vector<2x16xf32>
    %342 = arith.divf %340, %341 : vector<2x16xf32>
    %343 = vector.extract_strided_slice %332 {offsets = [0, 16], sizes = [2, 8], strides = [1, 1]} : vector<2x24xf32> to vector<2x8xf32>
    %344 = vector.extract_strided_slice %342 {offsets = [0, 0], sizes = [2, 8], strides = [1, 1]} : vector<2x16xf32> to vector<2x8xf32>
    %345 = vector.extract_strided_slice %334 {offsets = [0, 16], sizes = [2, 8], strides = [1, 1]} : vector<2x24xf32> to vector<2x8xf32>
    %346 = arith.addf %345, %23 : vector<2x8xf32>
    %347 = arith.mulf %344, %346 : vector<2x8xf32>
    %348 = arith.addf %343, %347 : vector<2x8xf32>
    %349 = math.tanh %348 : vector<2x8xf32>
    %350 = vector.extract_strided_slice %342 {offsets = [0, 8], sizes = [2, 8], strides = [1, 1]} : vector<2x16xf32> to vector<2x8xf32>
    %351 = arith.subf %239, %349 : vector<2x8xf32>
    %352 = arith.mulf %350, %351 : vector<2x8xf32>
    %353 = arith.addf %349, %352 : vector<2x8xf32>
    %354 = vector.shape_cast %275 : vector<2x1xf32> to vector<2x1xf32>
    %355 = vector.broadcast %354 : vector<2x1xf32> to vector<2x8xf32>
    %356 = arith.mulf %355, %353 : vector<2x8xf32>
    %357 = arith.subf %353, %239 : vector<2x8xf32>
    %358 = arith.mulf %355, %357 : vector<2x8xf32>
    %359 = arith.addf %239, %358 : vector<2x8xf32>
    %c2_101 = arith.constant 2 : index
    %c48_102 = arith.constant 48 : index
    %360 = vector.load %arg18[%c2_101, %c48_102] : memref<8x96xf32, #tpu.memory_space<vmem>>, vector<2x48xf32>
    %361 = arith.truncf %267 : vector<2x16xf32> to vector<2x16xbf16>
    %cst_103 = arith.constant dense<0.000000e+00> : vector<2x48xf32>
    %362 = tpu.matmul %361, %17, %cst_103 {dimension_numbers = #tpu.dot_dimension_numbers<[1], [0], [0], [1], [0, 0, 1, 1], [], []>} : vector<2x16xbf16>, vector<16x48xbf16>, vector<2x48xf32> -> vector<2x48xf32>
    %363 = vector.extract_strided_slice %360 {offsets = [0, 0], sizes = [2, 32], strides = [1, 1]} : vector<2x48xf32> to vector<2x32xf32>
    %364 = vector.extract_strided_slice %362 {offsets = [0, 0], sizes = [2, 32], strides = [1, 1]} : vector<2x48xf32> to vector<2x32xf32>
    %365 = arith.addf %363, %364 : vector<2x32xf32>
    %366 = arith.negf %365 : vector<2x32xf32>
    %367 = math.exp %366 : vector<2x32xf32>
    %cst_104 = arith.constant 1.000000e+00 : f32
    %368 = vector.broadcast %cst_104 : f32 to vector<2x32xf32>
    %369 = arith.addf %368, %367 : vector<2x32xf32>
    %370 = arith.divf %368, %369 : vector<2x32xf32>
    %371 = vector.extract_strided_slice %360 {offsets = [0, 32], sizes = [2, 16], strides = [1, 1]} : vector<2x48xf32> to vector<2x16xf32>
    %372 = vector.extract_strided_slice %370 {offsets = [0, 0], sizes = [2, 16], strides = [1, 1]} : vector<2x32xf32> to vector<2x16xf32>
    %373 = vector.extract_strided_slice %362 {offsets = [0, 32], sizes = [2, 16], strides = [1, 1]} : vector<2x48xf32> to vector<2x16xf32>
    %374 = arith.addf %373, %29 : vector<2x16xf32>
    %375 = arith.mulf %372, %374 : vector<2x16xf32>
    %376 = arith.addf %371, %375 : vector<2x16xf32>
    %377 = math.tanh %376 : vector<2x16xf32>
    %378 = vector.extract_strided_slice %370 {offsets = [0, 16], sizes = [2, 16], strides = [1, 1]} : vector<2x32xf32> to vector<2x16xf32>
    %379 = arith.subf %267, %377 : vector<2x16xf32>
    %380 = arith.mulf %378, %379 : vector<2x16xf32>
    %381 = arith.addf %377, %380 : vector<2x16xf32>
    %382 = vector.shape_cast %275 : vector<2x1xf32> to vector<2x1xf32>
    %383 = vector.broadcast %382 : vector<2x1xf32> to vector<2x16xf32>
    %384 = arith.mulf %383, %381 : vector<2x16xf32>
    %385 = arith.subf %381, %267 : vector<2x16xf32>
    %386 = arith.mulf %383, %385 : vector<2x16xf32>
    %387 = arith.addf %267, %386 : vector<2x16xf32>
    %c4_105 = arith.constant 4 : index
    %c0_106 = arith.constant 0 : index
    %388 = vector.load %arg15[%c4_105, %c0_106] : memref<8x16xf32, #tpu.memory_space<vmem>>, vector<2x8xf32>
    tpu.vector_store %arg15[%c4_105, %c0_106], %300 {strides = array<i32>} : memref<8x16xf32, #tpu.memory_space<vmem>>, vector<2x8xf32>,
    %c2_107 = arith.constant 2 : index
    %c8_108 = arith.constant 8 : index
    %389 = vector.load %arg15[%c2_107, %c8_108] : memref<8x16xf32, #tpu.memory_space<vmem>>, vector<2x8xf32>
    tpu.vector_store %arg15[%c2_107, %c8_108], %356 {strides = array<i32>} : memref<8x16xf32, #tpu.memory_space<vmem>>, vector<2x8xf32>,
    %390 = arith.truncf %328 : vector<2x16xf32> to vector<2x16xbf16>
    %c4_109 = arith.constant 4 : index
    %c0_110 = arith.constant 0 : index
    %391 = vector.load %arg19[%c4_109, %c0_110] : memref<8x32xbf16, #tpu.memory_space<vmem>>, vector<2x16xbf16>
    tpu.vector_store %arg19[%c4_109, %c0_110], %390 {strides = array<i32>} : memref<8x32xbf16, #tpu.memory_space<vmem>>, vector<2x16xbf16>,
    %392 = arith.truncf %384 : vector<2x16xf32> to vector<2x16xbf16>
    %c2_111 = arith.constant 2 : index
    %c16_112 = arith.constant 16 : index
    %393 = vector.load %arg19[%c2_111, %c16_112] : memref<8x32xbf16, #tpu.memory_space<vmem>>, vector<2x16xbf16>
    tpu.vector_store %arg19[%c2_111, %c16_112], %392 {strides = array<i32>} : memref<8x32xbf16, #tpu.memory_space<vmem>>, vector<2x16xbf16>,
    %c6_113 = arith.constant 6 : index
    %c0_114 = arith.constant 0 : index
    %394 = vector.load %arg0[%c6_113, %c0_114] : memref<8x1xf32, #tpu.memory_space<vmem>>, vector<2x1xf32>
    %c0_115 = arith.constant 0 : index
    %c0_116 = arith.constant 0 : index
    %395 = vector.load %arg0[%c0_115, %c0_116] : memref<8x1xf32, #tpu.memory_space<vmem>>, vector<2x1xf32>
    %c6_117 = arith.constant 6 : index
    %c0_118 = arith.constant 0 : index
    %396 = vector.load %arg17[%c6_117, %c0_118] : memref<8x48xf32, #tpu.memory_space<vmem>>, vector<2x24xf32>
    %397 = arith.truncf %303 : vector<2x8xf32> to vector<2x8xbf16>
    %cst_119 = arith.constant dense<0.000000e+00> : vector<2x24xf32>
    %398 = tpu.matmul %397, %14, %cst_119 {dimension_numbers = #tpu.dot_dimension_numbers<[1], [0], [0], [1], [0, 0, 1, 1], [], []>} : vector<2x8xbf16>, vector<8x24xbf16>, vector<2x24xf32> -> vector<2x24xf32>
    %399 = vector.extract_strided_slice %396 {offsets = [0, 0], sizes = [2, 16], strides = [1, 1]} : vector<2x24xf32> to vector<2x16xf32>
    %400 = vector.extract_strided_slice %398 {offsets = [0, 0], sizes = [2, 16], strides = [1, 1]} : vector<2x24xf32> to vector<2x16xf32>
    %401 = arith.addf %399, %400 : vector<2x16xf32>
    %402 = arith.negf %401 : vector<2x16xf32>
    %403 = math.exp %402 : vector<2x16xf32>
    %cst_120 = arith.constant 1.000000e+00 : f32
    %404 = vector.broadcast %cst_120 : f32 to vector<2x16xf32>
    %405 = arith.addf %404, %403 : vector<2x16xf32>
    %406 = arith.divf %404, %405 : vector<2x16xf32>
    %407 = vector.extract_strided_slice %396 {offsets = [0, 16], sizes = [2, 8], strides = [1, 1]} : vector<2x24xf32> to vector<2x8xf32>
    %408 = vector.extract_strided_slice %406 {offsets = [0, 0], sizes = [2, 8], strides = [1, 1]} : vector<2x16xf32> to vector<2x8xf32>
    %409 = vector.extract_strided_slice %398 {offsets = [0, 16], sizes = [2, 8], strides = [1, 1]} : vector<2x24xf32> to vector<2x8xf32>
    %410 = arith.addf %409, %20 : vector<2x8xf32>
    %411 = arith.mulf %408, %410 : vector<2x8xf32>
    %412 = arith.addf %407, %411 : vector<2x8xf32>
    %413 = math.tanh %412 : vector<2x8xf32>
    %414 = vector.extract_strided_slice %406 {offsets = [0, 8], sizes = [2, 8], strides = [1, 1]} : vector<2x16xf32> to vector<2x8xf32>
    %415 = arith.subf %303, %413 : vector<2x8xf32>
    %416 = arith.mulf %414, %415 : vector<2x8xf32>
    %417 = arith.addf %413, %416 : vector<2x8xf32>
    %418 = vector.shape_cast %394 : vector<2x1xf32> to vector<2x1xf32>
    %419 = vector.broadcast %418 : vector<2x1xf32> to vector<2x8xf32>
    %420 = arith.mulf %419, %417 : vector<2x8xf32>
    %c6_121 = arith.constant 6 : index
    %c0_122 = arith.constant 0 : index
    %421 = vector.load %arg18[%c6_121, %c0_122] : memref<8x96xf32, #tpu.memory_space<vmem>>, vector<2x48xf32>
    %422 = arith.truncf %331 : vector<2x16xf32> to vector<2x16xbf16>
    %cst_123 = arith.constant dense<0.000000e+00> : vector<2x48xf32>
    %423 = tpu.matmul %422, %16, %cst_123 {dimension_numbers = #tpu.dot_dimension_numbers<[1], [0], [0], [1], [0, 0, 1, 1], [], []>} : vector<2x16xbf16>, vector<16x48xbf16>, vector<2x48xf32> -> vector<2x48xf32>
    %424 = vector.extract_strided_slice %421 {offsets = [0, 0], sizes = [2, 32], strides = [1, 1]} : vector<2x48xf32> to vector<2x32xf32>
    %425 = vector.extract_strided_slice %423 {offsets = [0, 0], sizes = [2, 32], strides = [1, 1]} : vector<2x48xf32> to vector<2x32xf32>
    %426 = arith.addf %424, %425 : vector<2x32xf32>
    %427 = arith.negf %426 : vector<2x32xf32>
    %428 = math.exp %427 : vector<2x32xf32>
    %cst_124 = arith.constant 1.000000e+00 : f32
    %429 = vector.broadcast %cst_124 : f32 to vector<2x32xf32>
    %430 = arith.addf %429, %428 : vector<2x32xf32>
    %431 = arith.divf %429, %430 : vector<2x32xf32>
    %432 = vector.extract_strided_slice %421 {offsets = [0, 32], sizes = [2, 16], strides = [1, 1]} : vector<2x48xf32> to vector<2x16xf32>
    %433 = vector.extract_strided_slice %431 {offsets = [0, 0], sizes = [2, 16], strides = [1, 1]} : vector<2x32xf32> to vector<2x16xf32>
    %434 = vector.extract_strided_slice %423 {offsets = [0, 32], sizes = [2, 16], strides = [1, 1]} : vector<2x48xf32> to vector<2x16xf32>
    %435 = arith.addf %434, %26 : vector<2x16xf32>
    %436 = arith.mulf %433, %435 : vector<2x16xf32>
    %437 = arith.addf %432, %436 : vector<2x16xf32>
    %438 = math.tanh %437 : vector<2x16xf32>
    %439 = vector.extract_strided_slice %431 {offsets = [0, 16], sizes = [2, 16], strides = [1, 1]} : vector<2x32xf32> to vector<2x16xf32>
    %440 = arith.subf %331, %438 : vector<2x16xf32>
    %441 = arith.mulf %439, %440 : vector<2x16xf32>
    %442 = arith.addf %438, %441 : vector<2x16xf32>
    %443 = vector.shape_cast %394 : vector<2x1xf32> to vector<2x1xf32>
    %444 = vector.broadcast %443 : vector<2x1xf32> to vector<2x16xf32>
    %445 = arith.mulf %444, %442 : vector<2x16xf32>
    %c0_125 = arith.constant 0 : index
    %c24_126 = arith.constant 24 : index
    %446 = vector.load %arg17[%c0_125, %c24_126] : memref<8x48xf32, #tpu.memory_space<vmem>>, vector<2x24xf32>
    %447 = arith.truncf %359 : vector<2x8xf32> to vector<2x8xbf16>
    %cst_127 = arith.constant dense<0.000000e+00> : vector<2x24xf32>
    %448 = tpu.matmul %447, %15, %cst_127 {dimension_numbers = #tpu.dot_dimension_numbers<[1], [0], [0], [1], [0, 0, 1, 1], [], []>} : vector<2x8xbf16>, vector<8x24xbf16>, vector<2x24xf32> -> vector<2x24xf32>
    %449 = vector.extract_strided_slice %446 {offsets = [0, 0], sizes = [2, 16], strides = [1, 1]} : vector<2x24xf32> to vector<2x16xf32>
    %450 = vector.extract_strided_slice %448 {offsets = [0, 0], sizes = [2, 16], strides = [1, 1]} : vector<2x24xf32> to vector<2x16xf32>
    %451 = arith.addf %449, %450 : vector<2x16xf32>
    %452 = arith.negf %451 : vector<2x16xf32>
    %453 = math.exp %452 : vector<2x16xf32>
    %cst_128 = arith.constant 1.000000e+00 : f32
    %454 = vector.broadcast %cst_128 : f32 to vector<2x16xf32>
    %455 = arith.addf %454, %453 : vector<2x16xf32>
    %456 = arith.divf %454, %455 : vector<2x16xf32>
    %457 = vector.extract_strided_slice %446 {offsets = [0, 16], sizes = [2, 8], strides = [1, 1]} : vector<2x24xf32> to vector<2x8xf32>
    %458 = vector.extract_strided_slice %456 {offsets = [0, 0], sizes = [2, 8], strides = [1, 1]} : vector<2x16xf32> to vector<2x8xf32>
    %459 = vector.extract_strided_slice %448 {offsets = [0, 16], sizes = [2, 8], strides = [1, 1]} : vector<2x24xf32> to vector<2x8xf32>
    %460 = arith.addf %459, %23 : vector<2x8xf32>
    %461 = arith.mulf %458, %460 : vector<2x8xf32>
    %462 = arith.addf %457, %461 : vector<2x8xf32>
    %463 = math.tanh %462 : vector<2x8xf32>
    %464 = vector.extract_strided_slice %456 {offsets = [0, 8], sizes = [2, 8], strides = [1, 1]} : vector<2x16xf32> to vector<2x8xf32>
    %465 = arith.subf %359, %463 : vector<2x8xf32>
    %466 = arith.mulf %464, %465 : vector<2x8xf32>
    %467 = arith.addf %463, %466 : vector<2x8xf32>
    %468 = vector.shape_cast %395 : vector<2x1xf32> to vector<2x1xf32>
    %469 = vector.broadcast %468 : vector<2x1xf32> to vector<2x8xf32>
    %470 = arith.mulf %469, %467 : vector<2x8xf32>
    %c0_129 = arith.constant 0 : index
    %c48_130 = arith.constant 48 : index
    %471 = vector.load %arg18[%c0_129, %c48_130] : memref<8x96xf32, #tpu.memory_space<vmem>>, vector<2x48xf32>
    %472 = arith.truncf %387 : vector<2x16xf32> to vector<2x16xbf16>
    %cst_131 = arith.constant dense<0.000000e+00> : vector<2x48xf32>
    %473 = tpu.matmul %472, %17, %cst_131 {dimension_numbers = #tpu.dot_dimension_numbers<[1], [0], [0], [1], [0, 0, 1, 1], [], []>} : vector<2x16xbf16>, vector<16x48xbf16>, vector<2x48xf32> -> vector<2x48xf32>
    %474 = vector.extract_strided_slice %471 {offsets = [0, 0], sizes = [2, 32], strides = [1, 1]} : vector<2x48xf32> to vector<2x32xf32>
    %475 = vector.extract_strided_slice %473 {offsets = [0, 0], sizes = [2, 32], strides = [1, 1]} : vector<2x48xf32> to vector<2x32xf32>
    %476 = arith.addf %474, %475 : vector<2x32xf32>
    %477 = arith.negf %476 : vector<2x32xf32>
    %478 = math.exp %477 : vector<2x32xf32>
    %cst_132 = arith.constant 1.000000e+00 : f32
    %479 = vector.broadcast %cst_132 : f32 to vector<2x32xf32>
    %480 = arith.addf %479, %478 : vector<2x32xf32>
    %481 = arith.divf %479, %480 : vector<2x32xf32>
    %482 = vector.extract_strided_slice %471 {offsets = [0, 32], sizes = [2, 16], strides = [1, 1]} : vector<2x48xf32> to vector<2x16xf32>
    %483 = vector.extract_strided_slice %481 {offsets = [0, 0], sizes = [2, 16], strides = [1, 1]} : vector<2x32xf32> to vector<2x16xf32>
    %484 = vector.extract_strided_slice %473 {offsets = [0, 32], sizes = [2, 16], strides = [1, 1]} : vector<2x48xf32> to vector<2x16xf32>
    %485 = arith.addf %484, %29 : vector<2x16xf32>
    %486 = arith.mulf %483, %485 : vector<2x16xf32>
    %487 = arith.addf %482, %486 : vector<2x16xf32>
    %488 = math.tanh %487 : vector<2x16xf32>
    %489 = vector.extract_strided_slice %481 {offsets = [0, 16], sizes = [2, 16], strides = [1, 1]} : vector<2x32xf32> to vector<2x16xf32>
    %490 = arith.subf %387, %488 : vector<2x16xf32>
    %491 = arith.mulf %489, %490 : vector<2x16xf32>
    %492 = arith.addf %488, %491 : vector<2x16xf32>
    %493 = vector.shape_cast %395 : vector<2x1xf32> to vector<2x1xf32>
    %494 = vector.broadcast %493 : vector<2x1xf32> to vector<2x16xf32>
    %495 = arith.mulf %494, %492 : vector<2x16xf32>
    %c6_133 = arith.constant 6 : index
    %c0_134 = arith.constant 0 : index
    %496 = vector.load %arg15[%c6_133, %c0_134] : memref<8x16xf32, #tpu.memory_space<vmem>>, vector<2x8xf32>
    tpu.vector_store %arg15[%c6_133, %c0_134], %420 {strides = array<i32>} : memref<8x16xf32, #tpu.memory_space<vmem>>, vector<2x8xf32>,
    %c0_135 = arith.constant 0 : index
    %c8_136 = arith.constant 8 : index
    %497 = vector.load %arg15[%c0_135, %c8_136] : memref<8x16xf32, #tpu.memory_space<vmem>>, vector<2x8xf32>
    tpu.vector_store %arg15[%c0_135, %c8_136], %470 {strides = array<i32>} : memref<8x16xf32, #tpu.memory_space<vmem>>, vector<2x8xf32>,
    %498 = arith.truncf %445 : vector<2x16xf32> to vector<2x16xbf16>
    %c6_137 = arith.constant 6 : index
    %c0_138 = arith.constant 0 : index
    %499 = vector.load %arg19[%c6_137, %c0_138] : memref<8x32xbf16, #tpu.memory_space<vmem>>, vector<2x16xbf16>
    tpu.vector_store %arg19[%c6_137, %c0_138], %498 {strides = array<i32>} : memref<8x32xbf16, #tpu.memory_space<vmem>>, vector<2x16xbf16>,
    %500 = arith.truncf %495 : vector<2x16xf32> to vector<2x16xbf16>
    %c0_139 = arith.constant 0 : index
    %c16_140 = arith.constant 16 : index
    %501 = vector.load %arg19[%c0_139, %c16_140] : memref<8x32xbf16, #tpu.memory_space<vmem>>, vector<2x16xbf16>
    tpu.vector_store %arg19[%c0_139, %c16_140], %500 {strides = array<i32>} : memref<8x32xbf16, #tpu.memory_space<vmem>>, vector<2x16xbf16>,
    %c0_141 = arith.constant 0 : index
    %c0_142 = arith.constant 0 : index
    %502 = vector.load %arg19[%c0_141, %c0_142] : memref<8x32xbf16, #tpu.memory_space<vmem>>, vector<8x32xbf16>
    %c0_143 = arith.constant 0 : index
    %c0_144 = arith.constant 0 : index
    %503 = vector.load %arg13[%c0_143, %c0_144] : memref<32x10xbf16, #tpu.memory_space<vmem>>, vector<32x10xbf16>
    %cst_145 = arith.constant dense<0.000000e+00> : vector<8x10xf32>
    %504 = tpu.matmul %502, %503, %cst_145 {dimension_numbers = #tpu.dot_dimension_numbers<[1], [0], [0], [1], [0, 0, 1, 1], [], []>} : vector<8x32xbf16>, vector<32x10xbf16>, vector<8x10xf32> -> vector<8x10xf32>
    %c0_146 = arith.constant 0 : index
    %c0_147 = arith.constant 0 : index
    %505 = vector.load %arg14[%c0_146, %c0_147] : memref<1x10xf32, #tpu.memory_space<vmem>>, vector<1x10xf32>
    %506 = vector.broadcast %505 : vector<1x10xf32> to vector<8x10xf32>
    %507 = arith.addf %504, %506 : vector<8x10xf32>
    %c0_148 = arith.constant 0 : index
    %c0_149 = arith.constant 0 : index
    %508 = vector.load %arg16[%c0_148, %c0_149] : memref<8x10xf32, #tpu.memory_space<vmem>>, vector<8x10xf32>
    tpu.vector_store %arg16[%c0_148, %c0_149], %507 {strides = array<i32>} : memref<8x10xf32, #tpu.memory_space<vmem>>, vector<8x10xf32>,
    return
  }
}

</mosaic_0001>

<bundles_post_ra>
// kernel: lt.37
= control target key start
LH: loop header
LB: loop body
LE: loop exit
PB: predicated region body
PF: predicated region fallthrough
CT: control target
= control target key end

     0   :  { %vm7_vm0 = vcmask 31744   ;;  %vm13_vm1 = vcmask 64544   ;;  %s39_s0 = inlined_call_operand.vmem [shape: s32[2,4], index: 0, kind: input, shape index: {}]   ;;  %s40_s1 = inlined_call_operand.vmem [shape: s32[8], index: 1, kind: output, shape index: {}]  }
   0x1   :  { %v4_v0 = vld [vmem:[%s39_s0] sm:$0x3]  ;;  %s22_s0 = smov 4  }
   0x2   :  { %5 = vst [vmem:[#allocation1] sm:$0x3] %v4_v0 }
   0x9   :  { %v10_v1 = vld [vmem:[#allocation1 + $0x1] sm:$0x1]   ;;  %v6_v2 = vld [vmem:[#allocation1] sm:$0x1]  }
   0xa   :  { %11 = vrot.lane.b32.xlu0 %v10_v1, %s22_s0  ;;  %8 = vst.msk [vmem:[#allocation0] sm:$0x1] %vm7_vm0, %v6_v2  }
  0x7c   :  { %v12_v3 = vpop.permute.xlu0 %11  }
  0x7d   :  { %14 = vst.msk [vmem:[#allocation0] sm:$0x1] %vm13_vm1, %v12_v3  }
  0x84   :  { %v17_v4 = vld [vmem:[#allocation0] sm:$0x1] }
  0x85   :  { %20 = vst [vmem:[%s40_s1] sm:$0x1] %v17_v4 }

// kernel: forward.2
= control target key start
LH: loop header
LB: loop body
LE: loop exit
PB: predicated region body
PF: predicated region fallthrough
CT: control target
= control target key end

     0   :  { %v1607_v2 = vmov 0   ;;  %vm67_vm0 = vcmask 130048   ;;  %vm109_vm1 = vcmask 785408   ;;  %s1609_s16 = smov 48   ;;  %s1611_s18 = smov 96   ;;  %s2182_s5 = inlined_call_operand.vmem [shape: bf16[16,48], index: 5, kind: input, shape index: {}]   ;;  %s2183_s6 = inlined_call_operand.vmem [shape: f32[1,32], index: 6, kind: input, shape index: {}]   ;;  %s2184_s2 = inlined_call_operand.vmem [shape: bf16[16,96], index: 2, kind: input, shape index: {}]   ;;  %s2185_s1 = inlined_call_operand.vmem [shape: bf16[64,16], index: 1, kind: input, shape index: {}]   ;;  %s2186_s4 = inlined_call_operand.vmem [shape: bf16[16,48], index: 4, kind: input, shape index: {}]   ;;  %s2187_s3 = inlined_call_operand.vmem [shape: f32[1,96], index: 3, kind: input, shape index: {}]   ;;  %s2188_s0 = inlined_call_operand.vmem [shape: f32[64,1], index: 0, kind: input, shape index: {}]   ;;  %s2189_s7 = inlined_call_operand.vmem [shape: bf16[8,256], index: 7, kind: output, shape index: {}]  }
   0x1   :  { %v1657_v0 = vld [vmem:[%s2182_s5] sm:$0xff]  ;;  %1506 = vset.pattern.permute.xlu0 %v1607_v2  ;;  %1507 = vset.pattern.permute.xlu2 %v1607_v2  ;;  %s1608_s5 = smov 16   ;;  %v1493_v6 = vld [vmem:[%s2185_s1 + $0x8] sm:$0xff]  ;;  %v1494_v7 = vld [vmem:[%s2185_s1 + $0x10] sm:$0xff]  ;;  %s1612_s19 = smov 112  }
   0x2   :  { %v1662_v1 = vld [vmem:[%s2183_s6] ss:$0 sm:$0xff]  ;;  %1508 = vset.pattern.permute.xlu1 %v1607_v2  ;;  %217 = vmatpush.bf16.msra.mxu2 %v1657_v0  ;;  %v1495_v8 = vld [vmem:[%s2185_s1 + $0x18] sm:$0xff]  ;;  %s1613_s12 = smov 64  }
   0x3   :  { %v1496_v3 = vld [vmem:[%s2184_s2] sm:$0xff]  ;;  %247 = vrot.lane.b32.xlu0 %v1662_v1, %s1608_s5  ;;  %v126_v50 = vld [vmem:[%s2188_s0 + $0x38] sm:$0xff] }
   0x4   :  { %v1670_v4 = vld [vmem:[%s2186_s4] sm:$0xff]  ;;  %87 = vmatpush.bf16.msra.mxu0 %v1496_v3 }
   0x5   :  { %v1492_v5 = vld [vmem:[%s2185_s1] sm:$0xff]  ;;  %144 = vmatpush.bf16.msra.mxu1 %v1670_v4  ;;  %311 = vmatpush.bf16.msra.mxu3 %v1670_v4  ;;  %s1610_s1 = smov 32  }
   0x6   :  { %218 = vmatmul.bf16.vlgmr.msra.gmra.mxu2 %v1607_v2  ;;  %v1510_v9 = vld [vmem:[%s2187_s3] ss:$0 sm:$0xff] }
   0x7   :  { %1450 = vmatmul.msk.bf16.vlgmr.msra.gmra.mxu0 %vm67_vm0, %v1492_v5  ;;  %469 = vmatpush.bf16.msrb.mxu2 %v1670_v4 }
   0x8   :  { %145 = vmatmul.bf16.vlgmr.msra.gmra.mxu1 %v1607_v2  ;;  %1121 = vmatpush.bf16.msrb.mxu0 %v1670_v4 }
   0x9   :  { %384 = vmatpush.bf16.msrb.mxu1 %v1657_v0  ;;  %542 = vmatpush.bf16.msrb.mxu3 %v1657_v0 }
   0xb   :  { %708 = vmatpush.bf16.msra.mxu2 %v1657_v0 }
   0xd   :  { %635 = vmatpush.bf16.msra.mxu1 %v1670_v4 }
  0x17   :  { %1451 = vmatmul.msk.bf16.gmra.mxu0 %vm67_vm0, %v1493_v6 }
  0x27   :  { %1452 = vmatmul.msk.bf16.gmra.mxu0 %vm67_vm0, %v1494_v7 }
  0x37   :  { %1453 = vmatmul.msk.bf16.gmra.mxu0 %vm67_vm0, %v1495_v8 }
  0x75   :  { %v1704_v13 = vpop.permute.xlu0 %247 }
  0x84   :  { %v89_v10 = vpop.f32.mrf.mxu0 }
  0x85   :  { %v1702_v11 = vpop.f32.mrf.mxu1  ;;  %v90_v12 = vadd.f32 %v1510_v9, %v89_v10 }
  0x87   :  { %110 = vst.msk [vmem:[#allocation2] sm:$0xff] %vm109_vm1, %v90_v12 }
  0x89   :  { %v219_v14 = vpop.f32.mrf.mxu2 }
  0x8a   :  { %224 = vrot.lane.b32.xlu0 %v219_v14, %s1609_s16  ;;  %v250_v15 = vadd.f32 %v1704_v13, %v219_v14 }
  0x8c   :  { %252 = vrot.lane.b32.xlu1 %v250_v15, %s1608_s5  ;;  %v91_v16 = vpop.f32.mrf.mxu0 }
  0x8d   :  { %v148_v17 = vpop.f32.mrf.mxu1  ;;  %v92_v18 = vadd.f32 %v1510_v9, %v91_v16 }
  0x8e   :  { %v127_v59 = vld [vmem:[#allocation2] sm:$0xff] }
  0x8f   :  { %111 = vst.msk [vmem:[#allocation2 + $0x8] sm:$0xff] %vm109_vm1, %v92_v18  ;;  %v150_v60 = vadd.f32 %v1702_v11, %v127_v59 }
  0x91   :  { %v221_v19 = vpop.f32.mrf.mxu2  ;;  %v1458_v61 = vmul.f32 -1.442695, %v150_v60 }
  0x92   :  { %275 = vperm.xlu0 %1506, %v126_v50  }
  0x94   :  { %v94_v20 = vpop.f32.mrf.mxu0 }
  0x95   :  { %v95_v21 = vadd.f32 %v1510_v9, %v94_v20  ;;  %v125_v20 = vld [vmem:[%s2188_s0] sm:$0xff] }
  0x97   :  { %112 = vst.msk [vmem:[#allocation2 + $0x10] sm:$0xff] %vm109_vm1, %v95_v21 }
  0x9c   :  { %v96_v22 = vpop.f32.mrf.mxu0 }
  0x9d   :  { %v97_v23 = vadd.f32 %v1510_v9, %v96_v22 }
  0x9f   :  { %113 = vst.msk [vmem:[#allocation2 + $0x18] sm:$0xff] %vm109_vm1, %v97_v23 }
  0xa4   :  { %v99_v24 = vpop.f32.mrf.mxu0 }
  0xa5   :  { %v100_v25 = vadd.f32 %v1510_v9, %v99_v24 }
  0xa7   :  { %114 = vst.msk [vmem:[#allocation2 + $0x20] sm:$0xff] %vm109_vm1, %v100_v25 }
  0xac   :  { %v101_v26 = vpop.f32.mrf.mxu0 }
  0xad   :  { %v102_v27 = vadd.f32 %v1510_v9, %v101_v26 }
  0xaf   :  { %115 = vst.msk [vmem:[#allocation2 + $0x28] sm:$0xff] %vm109_vm1, %v102_v27 }
  0xb4   :  { %v104_v28 = vpop.f32.mrf.mxu0 }
  0xb5   :  { %v105_v29 = vadd.f32 %v1510_v9, %v104_v28 }
  0xb7   :  { %116 = vst.msk [vmem:[#allocation2 + $0x30] sm:$0xff] %vm109_vm1, %v105_v29 }
  0xbc   :  { %v106_v30 = vpop.f32.mrf.mxu0 }
  0xbd   :  { %v107_v31 = vadd.f32 %v1510_v9, %v106_v30 }
  0xbf   :  { %117 = vst.msk [vmem:[#allocation2 + $0x38] sm:$0xff] %vm109_vm1, %v107_v31  ;;  %v369_v31 = vld [vmem:[#allocation2 + $0x30] sm:$0xff] }
  0xc6   :  { %v203_v33 = vld [vmem:[#allocation2 + $0x38] sm:$0xff] }
  0xfc   :  { %v225_v32 = vpop.permute.xlu0 %224 }
  0xfd   :  { %v227_v34 = vadd.f32 %v225_v32, %v203_v33 }
  0xfe   :  { %v253_v47 = vpop.permute.xlu1 %252 }
  0xff   :  { %v1463_v35 = vmul.f32 -1.442695, %v227_v34 }
 0x101   :  { %1511 = vpow2.f32 %v1463_v35 }
 0x104   :  { %v276_v6 = vpop.permute.xlu0 %275 }
 0x107   :  { %v1512_v36 = vpop.eup %1511 }
 0x108   :  { %v231_v37 = vadd.f32 1.0, %v1512_v36 }
 0x10a   :  { %1513 = vrcp.f32 %v231_v37  ;;  %v243_v41 = vand.u32 2147483648, %v231_v37  ;;  %v241_v43 = vand.u32 2147483647, %v231_v37  ;;  %vm237_vm3 = vweird.f32 %v231_v37 }
 0x10c   :  { %v244_v45 = vor.u32 1.1754944e-38, %v243_v41  ;;  %vm242_vm5 = vcmp.eq.f32.partialorder %v241_v43, 8.507059e+37 }
 0x110   :  { %v1514_v38 = vpop.eup %1513 }
 0x111   :  { %v233_v39 = vmul.f32 %v1514_v38, %v231_v37  ;;  %vm238_vm2 = vweird.f32 %v1514_v38 }
 0x112   :  { %vm239_vm4 = vmor %vm237_vm3, %vm238_vm2 }
 0x113   :  { %v234_v40 = vsub.f32 1.0, %v233_v39 }
 0x115   :  { %v235_v42 = vmul.f32 %v1514_v38, %v234_v40 }
 0x117   :  { %v236_v44 = vadd.f32 %v1514_v38, %v235_v42 }
 0x119   :  { %v240_v46 = vsel %vm239_vm4, %v1514_v38, %v236_v44 }
 0x11a   :  { %v245_v48 = vsel %vm242_vm5, %v244_v45, %v240_v46 }
 0x11b   :  { %v255_v49 = vmul.f32 %v253_v47, %v245_v48 }
 0x11d   :  { %257 = vrot.lane.b32.xlu1 %v255_v49, %s1610_s1 }
 0x125   :  { %170 = vrot.lane.b32.xlu1 %v1662_v1, %s1610_s1 }
 0x18f   :  { %v258_v51 = vpop.permute.xlu1 %257 }
 0x190   :  { %v260_v52 = vadd.f32 %v258_v51, %v203_v33 }
 0x192   :  { %1515 = vtanh.f32 %v260_v52 }
 0x193   :  { %1517 = vpow2.f32 %v1458_v61 }
 0x197   :  { %v1723_v53 = vpop.permute.xlu1 %170 }
 0x198   :  { %v1516_v54 = vpop.eup %1515  ;;  %v173_v55 = vadd.f32 %v1723_v53, %v1702_v11 }
 0x199   :  { %v262_v56 = vsub.f32 0.0, %v1516_v54  ;;  %v1518_v62 = vpop.eup %1517 }
 0x19a   :  { %175 = vrot.lane.b32.xlu1 %v173_v55, %s1611_s18  ;;  %v154_v63 = vadd.f32 1.0, %v1518_v62  ;;  %v295_v55 = vld [vmem:[%s2188_s0 + $0x30] sm:$0xff] }
 0x19b   :  { %264 = vrot.lane.b32.xlu2 %v262_v56, %s1612_s19 }
 0x19c   :  { %1519 = vrcp.f32 %v154_v63  ;;  %vm160_vm6 = vweird.f32 %v154_v63  ;;  %v166_v10 = vand.u32 2147483648, %v154_v63  ;;  %v164_v14 = vand.u32 2147483647, %v154_v63 }
 0x19e   :  { %v167_v15 = vor.u32 1.1754944e-38, %v166_v10  ;;  %vm165_vm9 = vcmp.eq.f32.partialorder %v164_v14, 8.507059e+37 }
 0x1a2   :  { %v1520_v1 = vpop.eup %1519 }
 0x1a3   :  { %v156_v2 = vmul.f32 %v1520_v1, %v154_v63  ;;  %vm161_vm7 = vweird.f32 %v1520_v1 }
 0x1a4   :  { %vm162_vm8 = vmor %vm160_vm6, %vm161_vm7 }
 0x1a5   :  { %v157_v3 = vsub.f32 1.0, %v156_v2 }
 0x1a7   :  { %v158_v7 = vmul.f32 %v1520_v1, %v157_v3  ;;  %v1769_v3 = vld [vmem:[#allocation2 + $0x8] sm:$0xff] }
 0x1a9   :  { %v159_v12 = vadd.f32 %v1520_v1, %v158_v7 }
 0x1ab   :  { %v163_v16 = vsel %vm162_vm8, %v1520_v1, %v159_v12 }
 0x1ac   :  { %v168_v18 = vsel %vm165_vm9, %v167_v15, %v163_v16 }
 0x1f5   :  { %v265_v57 = vpop.permute.xlu2 %264 }
 0x1f6   :  { %v267_v58 = vmul.f32 %v265_v57, %v245_v48 }
 0x1f8   :  { %269 = vrot.lane.b32.xlu2 %v267_v58, %s1608_s5 }
 0x20c   :  { %v176_v17 = vpop.permute.xlu1 %175 }
 0x20d   :  { %v178_v19 = vmul.f32 %v176_v17, %v168_v18 }
 0x252   :  { %v270_v5 = vpop.permute.xlu2 %269 }
 0x253   :  { %v272_v8 = vadd.f32 %v1516_v54, %v270_v5 }
 0x255   :  { %v1731_v9 = vmul.f32 %v276_v6, %v272_v8 }
 0x257   :  { %v1735_v11 = vpack.c.bf16 %v1731_v9, %v1731_v9 }
 0x259   :  { %372 = vrot.lane.b32.xlu2 %v1735_v11, %s1609_s16 }
 0x261   :  { %180 = vrot.lane.b32.xlu2 %v178_v19, %s1610_s1 }
 0x269   :  { %198 = vperm.xlu2 %1507, %v125_v20  }
 0x2b3   :  { %v373_v21 = vpop.permute.xlu2 %372 }
 0x2b4   :  { %1466 = vmatmul.msk.bf16.vlgmr.msrb.gmra.mxu1 %vm67_vm0, %v373_v21 }
 0x2b5   :  { %874 = vmatpush.bf16.msrb.mxu1 %v1657_v0 }
 0x2bb   :  { %v181_v22 = vpop.permute.xlu2 %180 }
 0x2bc   :  { %v183_v23 = vadd.f32 %v181_v22, %v127_v59 }
 0x2be   :  { %1521 = vtanh.f32 %v183_v23 }
 0x2c3   :  { %v199_v38 = vpop.permute.xlu2 %198 }
 0x2c4   :  { %v1522_v24 = vpop.eup %1521 }
 0x2c5   :  { %v185_v25 = vsub.f32 0.0, %v1522_v24 }
 0x2c7   :  { %187 = vrot.lane.b32.xlu0 %v185_v25, %s1612_s19 }
 0x331   :  { %v386_v26 = vpop.f32.mrf.mxu1 }
 0x332   :  { %v414_v27 = vadd.f32 %v386_v26, %v1704_v13  ;;  %391 = vrot.lane.b32.xlu0 %v386_v26, %s1609_s16 }
 0x334   :  { %416 = vrot.lane.b32.xlu2 %v414_v27, %s1608_s5 }
 0x339   :  { %v388_v28 = vpop.f32.mrf.mxu1  ;;  %v188_v29 = vpop.permute.xlu0 %187 }
 0x33a   :  { %v190_v30 = vmul.f32 %v188_v29, %v168_v18 }
 0x33c   :  { %192 = vrot.lane.b32.xlu1 %v190_v30, %s1608_s5 }
 0x38e   :  { %v417_v51 = vpop.permute.xlu2 %416 }
 0x3a4   :  { %v392_v32 = vpop.permute.xlu0 %391 }
 0x3a5   :  { %v394_v33 = vadd.f32 %v392_v32, %v369_v31 }
 0x3a7   :  { %v1467_v34 = vmul.f32 -1.442695, %v394_v33 }
 0x3a9   :  { %1523 = vpow2.f32 %v1467_v34 }
 0x3ae   :  { %v193_v35 = vpop.permute.xlu1 %192 }
 0x3af   :  { %v1524_v36 = vpop.eup %1523  ;;  %v195_v37 = vadd.f32 %v1522_v24, %v193_v35 }
 0x3b0   :  { %v398_v39 = vadd.f32 1.0, %v1524_v36 }
 0x3b1   :  { %v1750_v40 = vmul.f32 %v199_v38, %v195_v37 }
 0x3b2   :  { %1525 = vrcp.f32 %v398_v39  ;;  %v410_v45 = vand.u32 2147483648, %v398_v39  ;;  %v408_v47 = vand.u32 2147483647, %v398_v39  ;;  %vm404_vm11 = vweird.f32 %v398_v39 }
 0x3b3   :  { %v1754_v41 = vpack.c.bf16 %v1750_v40, %v1750_v40 }
 0x3b4   :  { %v411_v49 = vor.u32 1.1754944e-38, %v410_v45  ;;  %vm409_vm13 = vcmp.eq.f32.partialorder %v408_v47, 8.507059e+37 }
 0x3b5   :  { %299 = vrot.lane.b32.xlu1 %v1754_v41, %s1611_s18 }
 0x3b8   :  { %v1526_v42 = vpop.eup %1525 }
 0x3b9   :  { %v400_v43 = vmul.f32 %v1526_v42, %v398_v39  ;;  %vm405_vm10 = vweird.f32 %v1526_v42 }
 0x3ba   :  { %vm406_vm12 = vmor %vm404_vm11, %vm405_vm10 }
 0x3bb   :  { %v401_v44 = vsub.f32 1.0, %v400_v43 }
 0x3bd   :  { %v402_v46 = vmul.f32 %v1526_v42, %v401_v44 }
 0x3bf   :  { %v403_v48 = vadd.f32 %v1526_v42, %v402_v46 }
 0x3c1   :  { %v407_v50 = vsel %vm406_vm12, %v1526_v42, %v403_v48 }
 0x3c2   :  { %v412_v52 = vsel %vm409_vm13, %v411_v49, %v407_v50  ;;  %v1807_v50 = vld [vmem:[#allocation2 + $0x28] sm:$0xff] }
 0x3c3   :  { %v419_v54 = vmul.f32 %v417_v51, %v412_v52 }
 0x3c5   :  { %421 = vrot.lane.b32.xlu0 %v419_v54, %s1610_s1 }
 0x3cd   :  { %439 = vperm.xlu0 %1506, %v295_v55  }
 0x427   :  { %v300_v56 = vpop.permute.xlu1 %299 }
 0x428   :  { %1464 = vmatmul.msk.bf16.vlgmr.msra.gmra.mxu3 %vm67_vm0, %v300_v56 }
 0x429   :  { %801 = vmatpush.bf16.msra.mxu3 %v1670_v4 }
 0x437   :  { %v422_v57 = vpop.permute.xlu0 %421 }
 0x438   :  { %v424_v58 = vadd.f32 %v422_v57, %v369_v31 }
 0x43a   :  { %1527 = vtanh.f32 %v424_v58 }
 0x43f   :  { %v1776_v19 = vpop.permute.xlu0 %439 }
 0x440   :  { %v1528_v59 = vpop.eup %1527 }
 0x441   :  { %v426_v60 = vsub.f32 %v1731_v9, %v1528_v59 }
 0x443   :  { %428 = vrot.lane.b32.xlu1 %v426_v60, %s1612_s19 }
 0x4ab   :  { %v313_v61 = vpop.f32.mrf.mxu3 }
 0x4ac   :  { %v337_v62 = vadd.f32 %v313_v61, %v1723_v53  ;;  %v317_v5 = vadd.f32 %v313_v61, %v1769_v3 }
 0x4ae   :  { %339 = vrot.lane.b32.xlu1 %v337_v62, %s1611_s18  ;;  %v1465_v6 = vmul.f32 -1.442695, %v317_v5 }
 0x4b0   :  { %1529 = vpow2.f32 %v1465_v6 }
 0x4b3   :  { %v315_v63 = vpop.f32.mrf.mxu3 }
 0x4b5   :  { %v429_v1 = vpop.permute.xlu1 %428 }
 0x4b6   :  { %v431_v2 = vmul.f32 %v429_v1, %v412_v52  ;;  %v1530_v7 = vpop.eup %1529 }
 0x4b7   :  { %v321_v8 = vadd.f32 1.0, %v1530_v7 }
 0x4b8   :  { %433 = vrot.lane.b32.xlu2 %v431_v2, %s1608_s5 }
 0x4b9   :  { %1531 = vrcp.f32 %v321_v8  ;;  %v333_v23 = vand.u32 2147483648, %v321_v8  ;;  %vm327_vm15 = vweird.f32 %v321_v8  ;;  %v331_v25 = vand.u32 2147483647, %v321_v8 }
 0x4bb   :  { %v334_v27 = vor.u32 1.1754944e-38, %v333_v23  ;;  %vm332_vm2 = vcmp.eq.f32.partialorder %v331_v25, 8.507059e+37  ;;  %v1828_v25 = vld [vmem:[#allocation2 + $0x10] sm:$0xff] }
 0x4bf   :  { %v1532_v10 = vpop.eup %1531 }
 0x4c0   :  { %v323_v12 = vmul.f32 %v1532_v10, %v321_v8  ;;  %vm328_vm14 = vweird.f32 %v1532_v10 }
 0x4c1   :  { %vm329_vm1 = vmor %vm327_vm15, %vm328_vm14 }
 0x4c2   :  { %v324_v14 = vsub.f32 1.0, %v323_v12 }
 0x4c4   :  { %v325_v18 = vmul.f32 %v1532_v10, %v324_v14 }
 0x4c6   :  { %v326_v22 = vadd.f32 %v1532_v10, %v325_v18 }
 0x4c8   :  { %v330_v26 = vsel %vm329_vm1, %v1532_v10, %v326_v22 }
 0x4c9   :  { %v335_v28 = vsel %vm332_vm2, %v334_v27, %v330_v26 }
 0x512   :  { %v434_v15 = vpop.permute.xlu2 %433 }
 0x513   :  { %v1772_v16 = vadd.f32 %v1528_v59, %v434_v15 }
 0x515   :  { %v443_v17 = vsub.f32 %v1772_v16, %v1731_v9 }
 0x517   :  { %v444_v20 = vmul.f32 %v443_v17, %v1776_v19  ;;  %v1822_v17 = vld [vmem:[%s2188_s0 + $0x28] sm:$0xff] }
 0x519   :  { %v1780_v21 = vadd.f32 %v444_v20, %v1731_v9  ;;  %v1789_v9 = vld [vmem:[%s2188_s0 + $0x8] sm:$0xff] }
 0x51b   :  { %v528_v24 = vpack.c.bf16 %v1780_v21, %v1780_v21 }
 0x51d   :  { %530 = vrot.lane.b32.xlu2 %v528_v24, %s1609_s16 }
 0x520   :  { %v340_v29 = vpop.permute.xlu1 %339 }
 0x521   :  { %v342_v30 = vmul.f32 %v340_v29, %v335_v28 }
 0x523   :  { %344 = vrot.lane.b32.xlu0 %v342_v30, %s1610_s1 }
 0x52b   :  { %362 = vperm.xlu0 %1506, %v1789_v9  }
 0x577   :  { %v531_v31 = vpop.permute.xlu2 %530 }
 0x578   :  { %1470 = vmatmul.msk.bf16.vlgmr.msrb.gmra.mxu3 %vm67_vm0, %v531_v31 }
 0x579   :  { %1038 = vmatpush.bf16.msrb.mxu3 %v1657_v0 }
 0x595   :  { %v345_v32 = vpop.permute.xlu0 %344 }
 0x596   :  { %v347_v33 = vadd.f32 %v345_v32, %v1769_v3 }
 0x598   :  { %1533 = vtanh.f32 %v347_v33 }
 0x59d   :  { %v363_v45 = vpop.permute.xlu0 %362 }
 0x59e   :  { %v1534_v34 = vpop.eup %1533 }
 0x59f   :  { %v349_v35 = vsub.f32 %v1750_v40, %v1534_v34 }
 0x5a1   :  { %351 = vrot.lane.b32.xlu1 %v349_v35, %s1612_s19 }
 0x5fb   :  { %v544_v36 = vpop.f32.mrf.mxu3 }
 0x5fc   :  { %v572_v37 = vadd.f32 %v544_v36, %v1704_v13 }
 0x5fe   :  { %574 = vrot.lane.b32.xlu0 %v572_v37, %s1608_s5 }
 0x603   :  { %v546_v38 = vpop.f32.mrf.mxu3 }
 0x613   :  { %v352_v39 = vpop.permute.xlu1 %351 }
 0x614   :  { %v354_v42 = vmul.f32 %v352_v39, %v335_v28 }
 0x616   :  { %356 = vrot.lane.b32.xlu2 %v354_v42, %s1608_s5 }
 0x61e   :  { %549 = vrot.lane.b32.xlu2 %v544_v36, %s1609_s16 }
 0x670   :  { %v357_v43 = vpop.permute.xlu2 %356  ;;  %v575_v5 = vpop.permute.xlu0 %574 }
 0x671   :  { %v359_v44 = vadd.f32 %v1534_v34, %v357_v43 }
 0x673   :  { %v1801_v46 = vmul.f32 %v363_v45, %v359_v44  ;;  %v366_v47 = vsub.f32 %v359_v44, %v1750_v40 }
 0x675   :  { %v367_v48 = vmul.f32 %v366_v47, %v363_v45 }
 0x677   :  { %v1805_v49 = vadd.f32 %v367_v48, %v1750_v40 }
 0x678   :  { %v550_v51 = vpop.permute.xlu2 %549 }
 0x679   :  { %v552_v52 = vadd.f32 %v550_v51, %v1807_v50  ;;  %v455_v54 = vpack.c.bf16 %v1805_v49, %v1805_v49 }
 0x67b   :  { %v1471_v55 = vmul.f32 -1.442695, %v552_v52  ;;  %457 = vrot.lane.b32.xlu1 %v455_v54, %s1611_s18 }
 0x67d   :  { %1535 = vpow2.f32 %v1471_v55  ;;  %v1848_v55 = vld [vmem:[%s2188_s0 + $0x10] sm:$0xff] }
 0x683   :  { %v1536_v56 = vpop.eup %1535 }
 0x684   :  { %v556_v57 = vadd.f32 1.0, %v1536_v56 }
 0x686   :  { %1537 = vrcp.f32 %v556_v57  ;;  %v568_v40 = vand.u32 2147483648, %v556_v57  ;;  %v566_v62 = vand.u32 2147483647, %v556_v57  ;;  %vm562_vm4 = vweird.f32 %v556_v57 }
 0x688   :  { %v569_v1 = vor.u32 1.1754944e-38, %v568_v40  ;;  %vm567_vm6 = vcmp.eq.f32.partialorder %v566_v62, 8.507059e+37 }
 0x68c   :  { %v1538_v58 = vpop.eup %1537 }
 0x68d   :  { %v558_v59 = vmul.f32 %v1538_v58, %v556_v57  ;;  %vm563_vm3 = vweird.f32 %v1538_v58 }
 0x68e   :  { %vm564_vm5 = vmor %vm562_vm4, %vm563_vm3 }
 0x68f   :  { %v559_v60 = vsub.f32 1.0, %v558_v59 }
 0x691   :  { %v560_v61 = vmul.f32 %v1538_v58, %v559_v60 }
 0x693   :  { %v561_v63 = vadd.f32 %v1538_v58, %v560_v61 }
 0x695   :  { %v565_v2 = vsel %vm564_vm5, %v1538_v58, %v561_v63 }
 0x696   :  { %v570_v6 = vsel %vm567_vm6, %v569_v1, %v565_v2 }
 0x697   :  { %v577_v7 = vmul.f32 %v575_v5, %v570_v6 }
 0x699   :  { %579 = vrot.lane.b32.xlu1 %v577_v7, %s1610_s1 }
 0x6a1   :  { %597 = vperm.xlu1 %1508, %v1822_v17  }
 0x6ed   :  { %v458_v8 = vpop.permute.xlu1 %457 }
 0x6ee   :  { %1468 = vmatmul.msk.bf16.vlgmr.msrb.gmra.mxu2 %vm67_vm0, %v458_v8 }
 0x6ef   :  { %965 = vmatpush.bf16.msrb.mxu2 %v1670_v4 }
 0x70b   :  { %v580_v10 = vpop.permute.xlu1 %579 }
 0x70c   :  { %v582_v12 = vadd.f32 %v580_v10, %v1807_v50 }
 0x70e   :  { %1539 = vtanh.f32 %v582_v12  ;;  %v1869_v12 = vld [vmem:[#allocation2 + $0x20] sm:$0xff] }
 0x713   :  { %v1836_v48 = vpop.permute.xlu1 %597 }
 0x714   :  { %v1540_v14 = vpop.eup %1539 }
 0x715   :  { %v584_v15 = vsub.f32 %v1780_v21, %v1540_v14 }
 0x717   :  { %586 = vrot.lane.b32.xlu2 %v584_v15, %s1612_s19 }
 0x771   :  { %v471_v18 = vpop.f32.mrf.mxu2  ;;  %v587_v20 = vpop.permute.xlu2 %586 }
 0x772   :  { %v495_v22 = vadd.f32 %v471_v18, %v1723_v53  ;;  %v589_v23 = vmul.f32 %v587_v20, %v570_v6  ;;  %v475_v26 = vadd.f32 %v471_v18, %v1828_v25 }
 0x774   :  { %497 = vrot.lane.b32.xlu2 %v495_v22, %s1611_s18  ;;  %591 = vrot.lane.b32.xlu0 %v589_v23, %s1608_s5  ;;  %v1469_v27 = vmul.f32 -1.442695, %v475_v26 }
 0x776   :  { %1541 = vpow2.f32 %v1469_v27 }
 0x779   :  { %v473_v24 = vpop.f32.mrf.mxu2 }
 0x77c   :  { %v1542_v28 = vpop.eup %1541 }
 0x77d   :  { %v479_v29 = vadd.f32 1.0, %v1542_v28 }
 0x77f   :  { %1543 = vrcp.f32 %v479_v29  ;;  %v491_v35 = vand.u32 2147483648, %v479_v29  ;;  %vm485_vm8 = vweird.f32 %v479_v29  ;;  %v489_v36 = vand.u32 2147483647, %v479_v29 }
 0x781   :  { %v492_v38 = vor.u32 1.1754944e-38, %v491_v35  ;;  %vm490_vm10 = vcmp.eq.f32.partialorder %v489_v36, 8.507059e+37 }
 0x785   :  { %v1544_v30 = vpop.eup %1543 }
 0x786   :  { %v481_v31 = vmul.f32 %v1544_v30, %v479_v29  ;;  %vm486_vm7 = vweird.f32 %v1544_v30 }
 0x787   :  { %vm487_vm9 = vmor %vm485_vm8, %vm486_vm7 }
 0x788   :  { %v482_v32 = vsub.f32 1.0, %v481_v31 }
 0x78a   :  { %v483_v33 = vmul.f32 %v1544_v30, %v482_v32 }
 0x78c   :  { %v484_v34 = vadd.f32 %v1544_v30, %v483_v33 }
 0x78e   :  { %v488_v37 = vsel %vm487_vm9, %v1544_v30, %v484_v34 }
 0x78f   :  { %v493_v39 = vsel %vm490_vm10, %v492_v38, %v488_v37 }
 0x7ce   :  { %v498_v42 = vpop.permute.xlu2 %497 }
 0x7cf   :  { %v500_v43 = vmul.f32 %v498_v42, %v493_v39  ;;  %v1881_v42 = vld [vmem:[%s2188_s0 + $0x20] sm:$0xff] }
 0x7d1   :  { %502 = vrot.lane.b32.xlu0 %v500_v43, %s1610_s1 }
 0x7e6   :  { %v592_v44 = vpop.permute.xlu0 %591 }
 0x7e7   :  { %v1832_v45 = vadd.f32 %v1540_v14, %v592_v44 }
 0x7e9   :  { %v601_v47 = vsub.f32 %v1832_v45, %v1780_v21 }
 0x7eb   :  { %v602_v51 = vmul.f32 %v601_v47, %v1836_v48 }
 0x7ed   :  { %v1840_v52 = vadd.f32 %v602_v51, %v1780_v21  ;;  %v1886_v51 = vld [vmem:[#allocation2 + $0x18] sm:$0xff] }
 0x7ef   :  { %v694_v54 = vpack.c.bf16 %v1840_v52, %v1840_v52 }
 0x7f1   :  { %696 = vrot.lane.b32.xlu1 %v694_v54, %s1609_s16 }
 0x7f9   :  { %520 = vperm.xlu1 %1508, %v1848_v55  }
 0x843   :  { %v503_v56 = vpop.permute.xlu0 %502 }
 0x844   :  { %v505_v57 = vadd.f32 %v503_v56, %v1828_v25 }
 0x846   :  { %1545 = vtanh.f32 %v505_v57 }
 0x84c   :  { %v1546_v58 = vpop.eup %1545 }
 0x84d   :  { %v507_v21 = vsub.f32 %v1805_v49, %v1546_v58 }
 0x84f   :  { %509 = vrot.lane.b32.xlu2 %v507_v21, %s1612_s19 }
 0x863   :  { %v697_v59 = vpop.permute.xlu1 %696 }
 0x864   :  { %1474 = vmatmul.msk.bf16.vlgmr.msra.gmra.mxu2 %vm67_vm0, %v697_v59 }
 0x865   :  { %1285 = vmatpush.bf16.msra.mxu2 %v1670_v4 }
 0x86b   :  { %v521_v5 = vpop.permute.xlu1 %520 }
 0x8a9   :  { %v510_v60 = vpop.permute.xlu2 %509 }
 0x8aa   :  { %v512_v40 = vmul.f32 %v510_v60, %v493_v39 }
 0x8ac   :  { %514 = vrot.lane.b32.xlu0 %v512_v40, %s1608_s5 }
 0x8e7   :  { %v710_v61 = vpop.f32.mrf.mxu2 }
 0x8e8   :  { %v738_v62 = vadd.f32 %v710_v61, %v1704_v13  ;;  %715 = vrot.lane.b32.xlu0 %v710_v61, %s1609_s16 }
 0x8ea   :  { %740 = vrot.lane.b32.xlu1 %v738_v62, %s1608_s5 }
 0x8ef   :  { %v712_v63 = vpop.f32.mrf.mxu2 }
 0x91e   :  { %v515_v1 = vpop.permute.xlu0 %514 }
 0x91f   :  { %v517_v2 = vadd.f32 %v1546_v58, %v515_v1 }
 0x921   :  { %v1860_v6 = vmul.f32 %v521_v5, %v517_v2  ;;  %v524_v7 = vsub.f32 %v517_v2, %v1805_v49 }
 0x923   :  { %v525_v4 = vmul.f32 %v524_v7, %v521_v5 }
 0x925   :  { %v1864_v8 = vadd.f32 %v525_v4, %v1805_v49 }
 0x927   :  { %v621_v10 = vpack.c.bf16 %v1864_v8, %v1864_v8 }
 0x929   :  { %623 = vrot.lane.b32.xlu2 %v621_v10, %s1611_s18 }
 0x95a   :  { %v716_v14 = vpop.permute.xlu0 %715 }
 0x95b   :  { %v718_v15 = vadd.f32 %v716_v14, %v1869_v12 }
 0x95c   :  { %v741_v33 = vpop.permute.xlu1 %740 }
 0x95d   :  { %v1475_v18 = vmul.f32 -1.442695, %v718_v15 }
 0x95f   :  { %1547 = vpow2.f32 %v1475_v18 }
 0x965   :  { %v1548_v20 = vpop.eup %1547 }
 0x966   :  { %v722_v22 = vadd.f32 1.0, %v1548_v20 }
 0x968   :  { %1549 = vrcp.f32 %v722_v22  ;;  %v734_v49 = vand.u32 2147483648, %v722_v22  ;;  %v732_v28 = vand.u32 2147483647, %v722_v22  ;;  %vm728_vm12 = vweird.f32 %v722_v22 }
 0x96a   :  { %v735_v30 = vor.u32 1.1754944e-38, %v734_v49  ;;  %vm733_vm14 = vcmp.eq.f32.partialorder %v732_v28, 8.507059e+37  ;;  %v618_v49 = vld [vmem:[%s2188_s0 + $0x18] sm:$0xff] }
 0x96e   :  { %v1550_v23 = vpop.eup %1549 }
 0x96f   :  { %v724_v24 = vmul.f32 %v1550_v23, %v722_v22  ;;  %vm729_vm11 = vweird.f32 %v1550_v23 }
 0x970   :  { %vm730_vm13 = vmor %vm728_vm12, %vm729_vm11 }
 0x971   :  { %v725_v26 = vsub.f32 1.0, %v724_v24 }
 0x973   :  { %v726_v27 = vmul.f32 %v1550_v23, %v725_v26 }
 0x975   :  { %v727_v29 = vadd.f32 %v1550_v23, %v726_v27 }
 0x977   :  { %v731_v31 = vsel %vm730_vm13, %v1550_v23, %v727_v29 }
 0x978   :  { %v736_v32 = vsel %vm733_vm14, %v735_v30, %v731_v31 }
 0x979   :  { %v743_v34 = vmul.f32 %v741_v33, %v736_v32 }
 0x97b   :  { %745 = vrot.lane.b32.xlu2 %v743_v34, %s1610_s1 }
 0x983   :  { %v624_v35 = vpop.permute.xlu2 %623 }
 0x984   :  { %1472 = vmatmul.msk.bf16.vlgmr.msra.gmra.mxu1 %vm67_vm0, %v624_v35 }
 0x985   :  { %1194 = vmatpush.bf16.msra.mxu1 %v1657_v0 }
 0x9d5   :  { %v746_v36 = vpop.permute.xlu2 %745 }
 0x9d6   :  { %v748_v37 = vadd.f32 %v746_v36, %v1869_v12 }
 0x9d8   :  { %1551 = vtanh.f32 %v748_v37 }
 0x9de   :  { %v1552_v38 = vpop.eup %1551 }
 0x9df   :  { %v750_v39 = vsub.f32 %v1840_v52, %v1552_v38 }
 0x9e1   :  { %752 = vrot.lane.b32.xlu0 %v750_v39, %s1612_s19 }
 0x9e9   :  { %763 = vperm.xlu0 %1506, %v1881_v42  }
 0xa01   :  { %v637_v43 = vpop.f32.mrf.mxu1 }
 0xa02   :  { %v661_v44 = vadd.f32 %v637_v43, %v1723_v53  ;;  %v641_v54 = vadd.f32 %v637_v43, %v1886_v51 }
 0xa04   :  { %663 = vrot.lane.b32.xlu1 %v661_v44, %s1611_s18  ;;  %v1473_v56 = vmul.f32 -1.442695, %v641_v54 }
 0xa06   :  { %1553 = vpow2.f32 %v1473_v56 }
 0xa09   :  { %v639_v47 = vpop.f32.mrf.mxu1 }
 0xa0c   :  { %v1554_v57 = vpop.eup %1553 }
 0xa0d   :  { %v645_v59 = vadd.f32 1.0, %v1554_v57 }
 0xa0f   :  { %1555 = vrcp.f32 %v645_v59  ;;  %v657_v1 = vand.u32 2147483648, %v645_v59  ;;  %vm651_vm1 = vweird.f32 %v645_v59  ;;  %v655_v2 = vand.u32 2147483647, %v645_v59 }
 0xa11   :  { %v658_v7 = vor.u32 1.1754944e-38, %v657_v1  ;;  %vm656_vm3 = vcmp.eq.f32.partialorder %v655_v2, 8.507059e+37 }
 0xa15   :  { %v1556_v60 = vpop.eup %1555 }
 0xa16   :  { %v647_v40 = vmul.f32 %v1556_v60, %v645_v59  ;;  %vm652_vm15 = vweird.f32 %v1556_v60 }
 0xa17   :  { %vm653_vm2 = vmor %vm651_vm1, %vm652_vm15 }
 0xa18   :  { %v648_v61 = vsub.f32 1.0, %v647_v40 }
 0xa1a   :  { %v649_v62 = vmul.f32 %v1556_v60, %v648_v61 }
 0xa1c   :  { %v650_v63 = vadd.f32 %v1556_v60, %v649_v62 }
 0xa1e   :  { %v654_v5 = vsel %vm653_vm2, %v1556_v60, %v650_v63 }
 0xa1f   :  { %v659_v4 = vsel %vm656_vm3, %v658_v7, %v654_v5 }
 0xa53   :  { %v753_v58 = vpop.permute.xlu0 %752 }
 0xa54   :  { %v755_v21 = vmul.f32 %v753_v58, %v736_v32 }
 0xa56   :  { %757 = vrot.lane.b32.xlu2 %v755_v21, %s1608_s5 }
 0xa5b   :  { %v1895_v22 = vpop.permute.xlu0 %763 }
 0xa76   :  { %v664_v10 = vpop.permute.xlu1 %663 }
 0xa77   :  { %v666_v14 = vmul.f32 %v664_v10, %v659_v4 }
 0xa79   :  { %668 = vrot.lane.b32.xlu1 %v666_v14, %s1610_s1 }
 0xab0   :  { %v758_v15 = vpop.permute.xlu2 %757 }
 0xab1   :  { %v1891_v18 = vadd.f32 %v1552_v38, %v758_v15 }
 0xab3   :  { %v767_v20 = vsub.f32 %v1891_v18, %v1840_v52 }
 0xab5   :  { %v768_v23 = vmul.f32 %v767_v20, %v1895_v22 }
 0xab7   :  { %v1899_v24 = vadd.f32 %v768_v23, %v1840_v52 }
 0xab9   :  { %v860_v26 = vpack.c.bf16 %v1899_v24, %v1899_v24 }
 0xabb   :  { %862 = vrot.lane.b32.xlu2 %v860_v26, %s1609_s16 }
 0xac3   :  { %686 = vperm.xlu2 %1507, %v618_v49  }
 0xaeb   :  { %v669_v27 = vpop.permute.xlu1 %668 }
 0xaec   :  { %v671_v28 = vadd.f32 %v669_v27, %v1886_v51 }
 0xaee   :  { %1557 = vtanh.f32 %v671_v28 }
 0xaf4   :  { %v1558_v29 = vpop.eup %1557 }
 0xaf5   :  { %v673_v30 = vsub.f32 %v1864_v8, %v1558_v29 }
 0xaf7   :  { %675 = vrot.lane.b32.xlu0 %v673_v30, %s1612_s19 }
 0xb15   :  { %v863_v52 = vpop.permute.xlu2 %862 }
 0xb16   :  { %1478 = vmatmul.msk.bf16.vlgmr.msrb.gmra.mxu1 %vm67_vm0, %v863_v52 }
 0xb1d   :  { %v687_v38 = vpop.permute.xlu2 %686 }
 0xb69   :  { %v676_v31 = vpop.permute.xlu0 %675 }
 0xb6a   :  { %v678_v32 = vmul.f32 %v676_v31, %v659_v4 }
 0xb6c   :  { %680 = vrot.lane.b32.xlu1 %v678_v32, %s1608_s5 }
 0xb93   :  { %v876_v33 = vpop.f32.mrf.mxu1 }
 0xb94   :  { %v904_v34 = vadd.f32 %v876_v33, %v1704_v13  ;;  %881 = vrot.lane.b32.xlu1 %v876_v33, %s1609_s16 }
 0xb96   :  { %906 = vrot.lane.b32.xlu2 %v904_v34, %s1608_s5 }
 0xb9b   :  { %v878_v35 = vpop.f32.mrf.mxu1 }
 0xbde   :  { %v681_v36 = vpop.permute.xlu1 %680 }
 0xbdf   :  { %v683_v37 = vadd.f32 %v1558_v29, %v681_v36 }
 0xbe1   :  { %v1915_v39 = vmul.f32 %v687_v38, %v683_v37  ;;  %v690_v43 = vsub.f32 %v683_v37, %v1864_v8 }
 0xbe3   :  { %v691_v44 = vmul.f32 %v690_v43, %v687_v38 }
 0xbe5   :  { %v1919_v47 = vadd.f32 %v691_v44, %v1864_v8 }
 0xbe7   :  { %v787_v54 = vpack.c.bf16 %v1919_v47, %v1919_v47 }
 0xbe9   :  { %789 = vrot.lane.b32.xlu0 %v787_v54, %s1611_s18 }
 0xbf0   :  { %v907_v7 = vpop.permute.xlu2 %906 }
 0xc06   :  { %v882_v56 = vpop.permute.xlu1 %881 }
 0xc07   :  { %v884_v57 = vadd.f32 %v882_v56, %v1886_v51 }
 0xc09   :  { %v1479_v58 = vmul.f32 -1.442695, %v884_v57 }
 0xc0b   :  { %1559 = vpow2.f32 %v1479_v58 }
 0xc11   :  { %v1560_v21 = vpop.eup %1559 }
 0xc12   :  { %v888_v59 = vadd.f32 1.0, %v1560_v21 }
 0xc14   :  { %1561 = vrcp.f32 %v888_v59  ;;  %v900_v62 = vand.u32 2147483648, %v888_v59  ;;  %v898_v8 = vand.u32 2147483647, %v888_v59  ;;  %vm894_vm5 = vweird.f32 %v888_v59 }
 0xc16   :  { %v901_v2 = vor.u32 1.1754944e-38, %v900_v62  ;;  %vm899_vm7 = vcmp.eq.f32.partialorder %v898_v8, 8.507059e+37 }
 0xc1a   :  { %v1562_v60 = vpop.eup %1561 }
 0xc1b   :  { %v890_v40 = vmul.f32 %v1562_v60, %v888_v59  ;;  %vm895_vm4 = vweird.f32 %v1562_v60 }
 0xc1c   :  { %vm896_vm6 = vmor %vm894_vm5, %vm895_vm4 }
 0xc1d   :  { %v891_v61 = vsub.f32 1.0, %v890_v40 }
 0xc1f   :  { %v892_v63 = vmul.f32 %v1562_v60, %v891_v61 }
 0xc21   :  { %v893_v1 = vadd.f32 %v1562_v60, %v892_v63 }
 0xc23   :  { %v897_v5 = vsel %vm896_vm6, %v1562_v60, %v893_v1 }
 0xc24   :  { %v902_v4 = vsel %vm899_vm7, %v901_v2, %v897_v5 }
 0xc25   :  { %v909_v10 = vmul.f32 %v907_v7, %v902_v4 }
 0xc27   :  { %911 = vrot.lane.b32.xlu0 %v909_v10, %s1610_s1 }
 0xc5b   :  { %v790_v14 = vpop.permute.xlu0 %789 }
 0xc5c   :  { %1476 = vmatmul.msk.bf16.vlgmr.msra.gmra.mxu3 %vm67_vm0, %v790_v14 }
 0xc5d   :  { %1355 = vmatpush.bf16.msra.mxu3 %v1657_v0 }
 0xc99   :  { %v912_v15 = vpop.permute.xlu0 %911 }
 0xc9a   :  { %v914_v20 = vadd.f32 %v912_v15, %v1886_v51 }
 0xc9c   :  { %1563 = vtanh.f32 %v914_v20 }
 0xca2   :  { %v1564_v23 = vpop.eup %1563 }
 0xca3   :  { %v916_v26 = vsub.f32 %v1899_v24, %v1564_v23 }
 0xca5   :  { %918 = vrot.lane.b32.xlu2 %v916_v26, %s1612_s19 }
 0xcad   :  { %929 = vperm.xlu2 %1507, %v618_v49  }
 0xcdf   :  { %v803_v27 = vpop.f32.mrf.mxu3 }
 0xce0   :  { %v827_v28 = vadd.f32 %v803_v27, %v1723_v53  ;;  %v807_v0 = vadd.f32 %v803_v27, %v1869_v12 }
 0xce2   :  { %829 = vrot.lane.b32.xlu1 %v827_v28, %s1611_s18  ;;  %v1477_v51 = vmul.f32 -1.442695, %v807_v0 }
 0xce4   :  { %1565 = vpow2.f32 %v1477_v51 }
 0xce7   :  { %v805_v29 = vpop.f32.mrf.mxu3 }
 0xcea   :  { %v1566_v31 = vpop.eup %1565 }
 0xceb   :  { %v811_v32 = vadd.f32 1.0, %v1566_v31 }
 0xced   :  { %1567 = vrcp.f32 %v811_v32  ;;  %v823_v37 = vand.u32 2147483648, %v811_v32  ;;  %vm817_vm9 = vweird.f32 %v811_v32  ;;  %v821_v38 = vand.u32 2147483647, %v811_v32 }
 0xcef   :  { %v824_v44 = vor.u32 1.1754944e-38, %v823_v37  ;;  %vm822_vm11 = vcmp.eq.f32.partialorder %v821_v38, 8.507059e+37 }
 0xcf3   :  { %v1568_v33 = vpop.eup %1567 }
 0xcf4   :  { %v813_v34 = vmul.f32 %v1568_v33, %v811_v32  ;;  %vm818_vm8 = vweird.f32 %v1568_v33 }
 0xcf5   :  { %vm819_vm10 = vmor %vm817_vm9, %vm818_vm8 }
 0xcf6   :  { %v814_v49 = vsub.f32 1.0, %v813_v34 }
 0xcf8   :  { %v815_v35 = vmul.f32 %v1568_v33, %v814_v49 }
 0xcfa   :  { %v816_v36 = vadd.f32 %v1568_v33, %v815_v35 }
 0xcfc   :  { %v820_v43 = vsel %vm819_vm10, %v1568_v33, %v816_v36 }
 0xcfd   :  { %v825_v54 = vsel %vm822_vm11, %v824_v44, %v820_v43 }
 0xcff   :  { %v919_v30 = vpop.permute.xlu2 %918 }
 0xd00   :  { %v921_v52 = vmul.f32 %v919_v30, %v902_v4 }
 0xd02   :  { %923 = vrot.lane.b32.xlu1 %v921_v52, %s1608_s5 }
 0xd07   :  { %v1940_v60 = vpop.permute.xlu2 %929 }
 0xd54   :  { %v830_v56 = vpop.permute.xlu1 %829 }
 0xd55   :  { %v832_v57 = vmul.f32 %v830_v56, %v825_v54 }
 0xd57   :  { %834 = vrot.lane.b32.xlu0 %v832_v57, %s1610_s1 }
 0xd74   :  { %v924_v58 = vpop.permute.xlu1 %923 }
 0xd75   :  { %v1936_v21 = vadd.f32 %v1564_v23, %v924_v58 }
 0xd77   :  { %v933_v59 = vsub.f32 %v1936_v21, %v1899_v24 }
 0xd79   :  { %v934_v40 = vmul.f32 %v933_v59, %v1940_v60 }
 0xd7b   :  { %v1944_v61 = vadd.f32 %v934_v40, %v1899_v24 }
 0xd7d   :  { %v1024_v62 = vpack.c.bf16 %v1944_v61, %v1944_v61 }
 0xd7f   :  { %1026 = vrot.lane.b32.xlu1 %v1024_v62, %s1609_s16 }
 0xdc9   :  { %v835_v63 = vpop.permute.xlu0 %834 }
 0xdca   :  { %v837_v8 = vadd.f32 %v835_v63, %v1869_v12 }
 0xdcc   :  { %1569 = vtanh.f32 %v837_v8 }
 0xdd2   :  { %v1570_v1 = vpop.eup %1569 }
 0xdd3   :  { %v839_v2 = vsub.f32 %v1919_v47, %v1570_v1 }
 0xdd5   :  { %841 = vrot.lane.b32.xlu0 %v839_v2, %s1612_s19 }
 0xddd   :  { %852 = vperm.xlu0 %1506, %v1881_v42  }
 0xdf1   :  { %v1027_v5 = vpop.permute.xlu1 %1026 }
 0xdf2   :  { %1482 = vmatmul.msk.bf16.vlgmr.msrb.gmra.mxu3 %vm67_vm0, %v1027_v5 }
 0xe47   :  { %v842_v24 = vpop.permute.xlu0 %841 }
 0xe48   :  { %v844_v7 = vmul.f32 %v842_v24, %v825_v54 }
 0xe4a   :  { %846 = vrot.lane.b32.xlu2 %v844_v7, %s1608_s5 }
 0xe4f   :  { %v1962_v20 = vpop.permute.xlu0 %852 }
 0xe75   :  { %v1040_v4 = vpop.f32.mrf.mxu3 }
 0xe76   :  { %v1068_v10 = vadd.f32 %v1040_v4, %v1704_v13  ;;  %1045 = vrot.lane.b32.xlu2 %v1040_v4, %s1609_s16 }
 0xe78   :  { %1070 = vrot.lane.b32.xlu0 %v1068_v10, %s1608_s5 }
 0xe7d   :  { %v1042_v12 = vpop.f32.mrf.mxu3 }
 0xea4   :  { %v847_v14 = vpop.permute.xlu2 %846 }
 0xea5   :  { %v1958_v15 = vadd.f32 %v1570_v1, %v847_v14 }
 0xea7   :  { %v856_v42 = vsub.f32 %v1958_v15, %v1919_v47 }
 0xea9   :  { %v857_v23 = vmul.f32 %v856_v42, %v1962_v20 }
 0xeab   :  { %v1966_v26 = vadd.f32 %v857_v23, %v1919_v47 }
 0xead   :  { %v951_v27 = vpack.c.bf16 %v1966_v26, %v1966_v26 }
 0xeaf   :  { %953 = vrot.lane.b32.xlu1 %v951_v27, %s1611_s18 }
 0xed0   :  { %v1046_v28 = vpop.permute.xlu2 %1045 }
 0xed1   :  { %v1048_v29 = vadd.f32 %v1046_v28, %v1828_v25 }
 0xed3   :  { %v1483_v30 = vmul.f32 -1.442695, %v1048_v29 }
 0xed5   :  { %1571 = vpow2.f32 %v1483_v30 }
 0xedb   :  { %v1572_v52 = vpop.eup %1571 }
 0xedc   :  { %v1052_v0 = vadd.f32 1.0, %v1572_v52 }
 0xede   :  { %1573 = vrcp.f32 %v1052_v0  ;;  %v1064_v33 = vand.u32 2147483648, %v1052_v0  ;;  %v1062_v47 = vand.u32 2147483647, %v1052_v0  ;;  %vm1058_vm13 = vweird.f32 %v1052_v0 }
 0xee0   :  { %v1065_v35 = vor.u32 1.1754944e-38, %v1064_v33  ;;  %vm1063_vm15 = vcmp.eq.f32.partialorder %v1062_v47, 8.507059e+37 }
 0xee4   :  { %v1574_v51 = vpop.eup %1573 }
 0xee5   :  { %v1054_v31 = vmul.f32 %v1574_v51, %v1052_v0  ;;  %vm1059_vm12 = vweird.f32 %v1574_v51 }
 0xee6   :  { %vm1060_vm14 = vmor %vm1058_vm13, %vm1059_vm12 }
 0xee7   :  { %v1055_v32 = vsub.f32 1.0, %v1054_v31 }
 0xee9   :  { %v1056_v34 = vmul.f32 %v1574_v51, %v1055_v32 }
 0xeea   :  { %v1071_v38 = vpop.permute.xlu0 %1070 }
 0xeeb   :  { %v1057_v49 = vadd.f32 %v1574_v51, %v1056_v34 }
 0xeed   :  { %v1061_v36 = vsel %vm1060_vm14, %v1574_v51, %v1057_v49 }
 0xeee   :  { %v1066_v37 = vsel %vm1063_vm15, %v1065_v35, %v1061_v36 }
 0xeef   :  { %v1073_v43 = vmul.f32 %v1071_v38, %v1066_v37 }
 0xef1   :  { %1075 = vrot.lane.b32.xlu1 %v1073_v43, %s1610_s1 }
 0xf21   :  { %v954_v44 = vpop.permute.xlu1 %953 }
 0xf22   :  { %1480 = vmatmul.msk.bf16.vlgmr.msrb.gmra.mxu2 %vm67_vm0, %v954_v44 }
 0xf63   :  { %v1076_v54 = vpop.permute.xlu1 %1075 }
 0xf64   :  { %v1078_v56 = vadd.f32 %v1076_v54, %v1828_v25 }
 0xf66   :  { %1575 = vtanh.f32 %v1078_v56 }
 0xf6c   :  { %v1576_v57 = vpop.eup %1575 }
 0xf6d   :  { %v1080_v58 = vsub.f32 %v1944_v61, %v1576_v57 }
 0xf6f   :  { %1082 = vrot.lane.b32.xlu0 %v1080_v58, %s1612_s19 }
 0xf77   :  { %1093 = vperm.xlu0 %1506, %v1848_v55  }
 0xfa5   :  { %v967_v59 = vpop.f32.mrf.mxu2 }
 0xfa6   :  { %v991_v40 = vadd.f32 %v967_v59, %v1723_v53  ;;  %v971_v63 = vadd.f32 %v967_v59, %v1807_v50 }
 0xfa8   :  { %993 = vrot.lane.b32.xlu2 %v991_v40, %s1611_s18  ;;  %v1481_v8 = vmul.f32 -1.442695, %v971_v63 }
 0xfaa   :  { %1577 = vpow2.f32 %v1481_v8 }
 0xfad   :  { %v969_v62 = vpop.f32.mrf.mxu2 }
 0xfb0   :  { %v1578_v1 = vpop.eup %1577 }
 0xfb1   :  { %v975_v2 = vadd.f32 1.0, %v1578_v1 }
 0xfb3   :  { %1579 = vrcp.f32 %v975_v2  ;;  %v987_v12 = vand.u32 2147483648, %v975_v2  ;;  %vm981_vm2 = vweird.f32 %v975_v2  ;;  %v985_v14 = vand.u32 2147483647, %v975_v2 }
 0xfb5   :  { %v988_v23 = vor.u32 1.1754944e-38, %v987_v12  ;;  %vm986_vm4 = vcmp.eq.f32.partialorder %v985_v14, 8.507059e+37 }
 0xfb9   :  { %v1580_v24 = vpop.eup %1579 }
 0xfba   :  { %v977_v7 = vmul.f32 %v1580_v24, %v975_v2  ;;  %vm982_vm1 = vweird.f32 %v1580_v24 }
 0xfbb   :  { %vm983_vm3 = vmor %vm981_vm2, %vm982_vm1 }
 0xfbc   :  { %v978_v55 = vsub.f32 1.0, %v977_v7 }
 0xfbe   :  { %v979_v4 = vmul.f32 %v1580_v24, %v978_v55 }
 0xfc0   :  { %v980_v10 = vadd.f32 %v1580_v24, %v979_v4 }
 0xfc2   :  { %v984_v42 = vsel %vm983_vm3, %v1580_v24, %v980_v10 }
 0xfc3   :  { %v989_v28 = vsel %vm986_vm4, %v988_v23, %v984_v42 }
 0xfe1   :  { %v1083_v25 = vpop.permute.xlu0 %1082 }
 0xfe2   :  { %v1085_v5 = vmul.f32 %v1083_v25, %v1066_v37 }
 0xfe4   :  { %1087 = vrot.lane.b32.xlu2 %v1085_v5, %s1608_s5 }
 0xfe9   :  { %v1987_v51 = vpop.permute.xlu0 %1093 }
0x1002   :  { %v994_v27 = vpop.permute.xlu2 %993 }
0x1003   :  { %v996_v29 = vmul.f32 %v994_v27, %v989_v28 }
0x1005   :  { %998 = vrot.lane.b32.xlu1 %v996_v29, %s1610_s1 }
0x103e   :  { %v1088_v30 = vpop.permute.xlu2 %1087 }
0x103f   :  { %v1983_v52 = vadd.f32 %v1576_v57, %v1088_v30 }
0x1041   :  { %v1097_v0 = vsub.f32 %v1983_v52, %v1944_v61 }
0x1043   :  { %v1098_v31 = vmul.f32 %v1097_v0, %v1987_v51 }
0x1045   :  { %v1991_v32 = vadd.f32 %v1098_v31, %v1944_v61 }
0x1047   :  { %v1180_v33 = vpack.c.bf16 %v1991_v32, %v1991_v32 }
0x1049   :  { %1182 = vrot.lane.b32.xlu2 %v1180_v33, %s1609_s16 }
0x1077   :  { %v999_v34 = vpop.permute.xlu1 %998 }
0x1078   :  { %v1001_v47 = vadd.f32 %v999_v34, %v1807_v50 }
0x107a   :  { %1581 = vtanh.f32 %v1001_v47  ;;  %v1106_v47 = vld [vmem:[#allocation2 + $0x30] sm:$0xff] }
0x1080   :  { %v1582_v49 = vpop.eup %1581 }
0x1081   :  { %v1003_v35 = vsub.f32 %v1966_v26, %v1582_v49 }
0x1083   :  { %1005 = vrot.lane.b32.xlu1 %v1003_v35, %s1612_s19 }
0x108b   :  { %1016 = vperm.xlu1 %1508, %v1822_v17  }
0x10a3   :  { %v1183_v36 = vpop.permute.xlu2 %1182 }
0x10a4   :  { %1486 = vmatmul.msk.bf16.vlgmr.msra.gmra.mxu1 %vm67_vm0, %v1183_v36 }
0x10f5   :  { %v1006_v61 = vpop.permute.xlu1 %1005 }
0x10f6   :  { %v1008_v37 = vmul.f32 %v1006_v61, %v989_v28 }
0x10f8   :  { %1010 = vrot.lane.b32.xlu0 %v1008_v37, %s1608_s5 }
0x10fd   :  { %v1017_v56 = vpop.permute.xlu1 %1016 }
0x1121   :  { %v1196_v38 = vpop.f32.mrf.mxu1 }
0x1122   :  { %v1224_v43 = vadd.f32 %v1196_v38, %v1704_v13  ;;  %1201 = vrot.lane.b32.xlu0 %v1196_v38, %s1609_s16 }
0x1124   :  { %1226 = vrot.lane.b32.xlu1 %v1224_v43, %s1608_s5 }
0x1129   :  { %v1198_v50 = vpop.f32.mrf.mxu1 }
0x116a   :  { %v1011_v44 = vpop.permute.xlu0 %1010 }
0x116b   :  { %v1013_v54 = vadd.f32 %v1582_v49, %v1011_v44 }
0x116d   :  { %v2005_v57 = vmul.f32 %v1017_v56, %v1013_v54  ;;  %v1020_v17 = vsub.f32 %v1013_v54, %v1966_v26 }
0x116f   :  { %v1021_v58 = vmul.f32 %v1020_v17, %v1017_v56 }
0x1171   :  { %v2009_v59 = vadd.f32 %v1021_v58, %v1966_v26 }
0x1173   :  { %v1107_v40 = vpack.c.bf16 %v2009_v59, %v2009_v59 }
0x1175   :  { %1109 = vrot.lane.b32.xlu2 %v1107_v40, %s1611_s18 }
0x1194   :  { %v1202_v62 = vpop.permute.xlu0 %1201 }
0x1195   :  { %v1204_v63 = vadd.f32 %v1202_v62, %v1769_v3 }
0x1196   :  { %v1227_v42 = vpop.permute.xlu1 %1226 }
0x1197   :  { %v1487_v8 = vmul.f32 -1.442695, %v1204_v63 }
0x1199   :  { %1583 = vpow2.f32 %v1487_v8  ;;  %v1104_v8 = vld [vmem:[%s2188_s0 + $0x30] sm:$0xff] }
0x119f   :  { %v1584_v1 = vpop.eup %1583 }
0x11a0   :  { %v1208_v25 = vadd.f32 1.0, %v1584_v1 }
0x11a2   :  { %1585 = vrcp.f32 %v1208_v25  ;;  %v1220_v7 = vand.u32 2147483648, %v1208_v25  ;;  %v1218_v26 = vand.u32 2147483647, %v1208_v25  ;;  %vm1214_vm6 = vweird.f32 %v1208_v25 }
0x11a4   :  { %v1221_v10 = vor.u32 1.1754944e-38, %v1220_v7  ;;  %vm1219_vm8 = vcmp.eq.f32.partialorder %v1218_v26, 8.507059e+37 }
0x11a8   :  { %v1586_v2 = vpop.eup %1585 }
0x11a9   :  { %v1210_v5 = vmul.f32 %v1586_v2, %v1208_v25  ;;  %vm1215_vm5 = vweird.f32 %v1586_v2 }
0x11aa   :  { %vm1216_vm7 = vmor %vm1214_vm6, %vm1215_vm5  ;;  %vm292_vm5 = vcmask 1044352   ;;  %vm450_vm6 = vcmask 781952  }
0x11ab   :  { %v1211_v24 = vsub.f32 1.0, %v1210_v5 }
0x11ad   :  { %v1212_v55 = vmul.f32 %v1586_v2, %v1211_v24 }
0x11af   :  { %v1213_v4 = vadd.f32 %v1586_v2, %v1212_v55 }
0x11b1   :  { %v1217_v12 = vsel %vm1216_vm7, %v1586_v2, %v1213_v4  ;;  %vm285_vm7 = vcmask 125952  }
0x11b2   :  { %v1222_v14 = vsel %vm1219_vm8, %v1221_v10, %v1217_v12  ;;  %vm447_vm8 = vcmask 388352  }
0x11b3   :  { %v1229_v23 = vmul.f32 %v1227_v42, %v1222_v14 }
0x11b5   :  { %1231 = vrot.lane.b32.xlu0 %v1229_v23, %s1610_s1 }
0x11cf   :  { %v1110_v27 = vpop.permute.xlu2 %1109 }
0x11d0   :  { %1484 = vmatmul.msk.bf16.vlgmr.msrb.gmra.mxu0 %vm67_vm0, %v1110_v27 }
0x1227   :  { %v1232_v28 = vpop.permute.xlu0 %1231 }
0x1228   :  { %v1234_v29 = vadd.f32 %v1232_v28, %v1769_v3 }
0x122a   :  { %1587 = vtanh.f32 %v1234_v29 }
0x1230   :  { %v1588_v31 = vpop.eup %1587 }
0x1231   :  { %v1236_v34 = vsub.f32 %v1991_v32, %v1588_v31 }
0x124d   :  { %v1123_v30 = vpop.f32.mrf.mxu0 }
0x124e   :  { %v1147_v0 = vadd.f32 %v1123_v30, %v1723_v53  ;;  %v1127_v49 = vadd.f32 %v1123_v30, %v1106_v47 }
0x1250   :  { %1149 = vrot.lane.b32.xlu2 %v1147_v0, %s1611_s18  ;;  %v1485_v35 = vmul.f32 -1.442695, %v1127_v49 }
0x1252   :  { %1589 = vpow2.f32 %v1485_v35 }
0x1255   :  { %v1125_v33 = vpop.f32.mrf.mxu0 }
0x1258   :  { %1238 = vrot.lane.b32.xlu2 %v1236_v34, %s1612_s19  ;;  %v1590_v36 = vpop.eup %1589 }
0x1259   :  { %v1131_v3 = vadd.f32 1.0, %v1590_v36  ;;  %v1340_v36 = vld [vmem:[#allocation2] sm:$0xff] }
0x125b   :  { %1591 = vrcp.f32 %v1131_v3  ;;  %v1143_v44 = vand.u32 2147483648, %v1131_v3  ;;  %vm1137_vm10 = vweird.f32 %v1131_v3  ;;  %v1141_v54 = vand.u32 2147483647, %v1131_v3 }
0x125d   :  { %v1144_v17 = vor.u32 1.1754944e-38, %v1143_v44  ;;  %vm1142_vm12 = vcmp.eq.f32.partialorder %v1141_v54, 8.507059e+37 }
0x1260   :  { %1249 = vperm.xlu2 %1507, %v1789_v9  }
0x1261   :  { %v1592_v61 = vpop.eup %1591 }
0x1262   :  { %v1133_v37 = vmul.f32 %v1592_v61, %v1131_v3  ;;  %vm1138_vm9 = vweird.f32 %v1592_v61 }
0x1263   :  { %vm1139_vm11 = vmor %vm1137_vm10, %vm1138_vm9  ;;  %vm616_vm9 = vcmask 519552   ;;  %vm609_vm10 = vcmask 650752  }
0x1264   :  { %v1134_v38 = vsub.f32 1.0, %v1133_v37 }
0x1266   :  { %v1135_v43 = vmul.f32 %v1592_v61, %v1134_v38 }
0x1268   :  { %v1136_v50 = vadd.f32 %v1592_v61, %v1135_v43 }
0x126a   :  { %v1140_v56 = vsel %vm1139_vm11, %v1592_v61, %v1136_v50  ;;  %vm775_vm11 = vcmask 913152  }
0x126b   :  { %v1145_v58 = vsel %vm1142_vm12, %v1144_v17, %v1140_v56  ;;  %vm782_vm12 = vcmask 257152  }
0x12aa   :  { %v1150_v9 = vpop.permute.xlu2 %1149 }
0x12ab   :  { %v1152_v40 = vmul.f32 %v1150_v9, %v1145_v58 }
0x12ad   :  { %1154 = vrot.lane.b32.xlu1 %v1152_v40, %s1610_s1 }
0x12b2   :  { %v1239_v62 = vpop.permute.xlu2 %1238 }
0x12b3   :  { %v1241_v63 = vmul.f32 %v1239_v62, %v1222_v14 }
0x12b5   :  { %1243 = vrot.lane.b32.xlu1 %v1241_v63, %s1608_s5 }
0x12ba   :  { %v2033_v26 = vpop.permute.xlu2 %1249 }
0x12bd   :  { %1172 = vperm.xlu1 %1508, %v1104_v8  }
0x131f   :  { %v1155_v1 = vpop.permute.xlu1 %1154 }
0x1320   :  { %v1157_v25 = vadd.f32 %v1155_v1, %v1106_v47 }
0x1322   :  { %1593 = vtanh.f32 %v1157_v25  ;;  %v1270_v25 = vld [vmem:[#allocation2 + $0x38] sm:$0xff] }
0x1327   :  { %v1244_v2 = vpop.permute.xlu1 %1243 }
0x1328   :  { %v1594_v5 = vpop.eup %1593  ;;  %v2028_v24 = vadd.f32 %v1588_v31, %v1244_v2 }
0x1329   :  { %v1159_v7 = vsub.f32 %v2009_v59, %v1594_v5 }
0x132a   :  { %v1253_v55 = vsub.f32 %v2028_v24, %v1991_v32 }
0x132b   :  { %1161 = vrot.lane.b32.xlu0 %v1159_v7, %s1612_s19 }
0x132c   :  { %v1254_v4 = vmul.f32 %v1253_v55, %v2033_v26 }
0x132e   :  { %v2038_v10 = vadd.f32 %v1254_v4, %v1991_v32 }
0x132f   :  { %v2050_v30 = vpop.permute.xlu1 %1172 }
0x1330   :  { %v1341_v12 = vpack.c.bf16 %v2038_v10, %v2038_v10 }
0x1332   :  { %1343 = vrot.lane.b32.xlu2 %v1341_v12, %s1609_s16 }
0x138c   :  { %v1344_v14 = vpop.permute.xlu2 %1343 }
0x138d   :  { %1490 = vmatmul.msk.bf16.vlgmr.msra.gmra.mxu3 %vm67_vm0, %v1344_v14 }
0x139d   :  { %v1162_v42 = vpop.permute.xlu0 %1161 }
0x139e   :  { %v1164_v23 = vmul.f32 %v1162_v42, %v1145_v58 }
0x13a0   :  { %1166 = vrot.lane.b32.xlu0 %v1164_v23, %s1608_s5 }
0x1410   :  { %v1357_v27 = vpop.f32.mrf.mxu3 }
0x1411   :  { %1362 = vrot.lane.b32.xlu1 %v1357_v27, %s1609_s16  ;;  %v1385_v47 = vadd.f32 %v1357_v27, %v1704_v13 }
0x1412   :  { %v1167_v28 = vpop.permute.xlu0 %1166 }
0x1413   :  { %v2046_v29 = vadd.f32 %v1594_v5, %v1167_v28 }
0x1415   :  { %v1176_v32 = vsub.f32 %v2046_v29, %v2009_v59 }
0x1417   :  { %v1177_v0 = vmul.f32 %v1176_v32, %v2050_v30 }
0x1418   :  { %v1359_v31 = vpop.f32.mrf.mxu3 }
0x1419   :  { %v2054_v33 = vadd.f32 %v1177_v0, %v2009_v59 }
0x141b   :  { %v1271_v34 = vpack.c.bf16 %v2054_v33, %v2054_v33 }
0x141d   :  { %1273 = vrot.lane.b32.xlu0 %v1271_v34, %s1611_s18 }
0x1425   :  { %1387 = vrot.lane.b32.xlu0 %v1385_v47, %s1608_s5 }
0x1483   :  { %v1363_v35 = vpop.permute.xlu1 %1362 }
0x1484   :  { %v1365_v3 = vadd.f32 %v1363_v35, %v1340_v36 }
0x1486   :  { %v1491_v61 = vmul.f32 -1.442695, %v1365_v3 }
0x1488   :  { %1595 = vpow2.f32 %v1491_v61  ;;  %v1268_v61 = vld [vmem:[%s2188_s0 + $0x38] sm:$0xff] }
0x148e   :  { %v1596_v37 = vpop.eup %1595 }
0x148f   :  { %v1274_v49 = vpop.permute.xlu0 %1273  ;;  %v1369_v59 = vadd.f32 1.0, %v1596_v37  ;;  %v770_v37 = vpack.c.bf16 %v1915_v39, %v1915_v39 }
0x1490   :  { %1488 = vmatmul.msk.bf16.vlgmr.msra.gmra.mxu2 %vm67_vm0, %v1274_v49 }
0x1491   :  { %1597 = vrcp.f32 %v1369_v59  ;;  %v1381_v13 = vand.u32 2147483648, %v1369_v59  ;;  %vm1375_vm14 = vweird.f32 %v1369_v59  ;;  %v1379_v17 = vand.u32 2147483647, %v1369_v59 }
0x1493   :  { %v1382_v40 = vor.u32 1.1754944e-38, %v1381_v13  ;;  %vm1380_vm15 = vcmp.eq.f32.partialorder %v1379_v17, 8.507059e+37 }
0x1497   :  { %v1598_v38 = vpop.eup %1597  ;;  %v1388_v63 = vpop.permute.xlu0 %1387 }
0x1498   :  { %v1371_v43 = vmul.f32 %v1598_v38, %v1369_v59  ;;  %vm1376_vm13 = vweird.f32 %v1598_v38 }
0x1499   :  { %vm1377_vm0 = vmor %vm1375_vm14, %vm1376_vm13 }
0x149a   :  { %v1372_v50 = vsub.f32 1.0, %v1371_v43 }
0x149c   :  { %v1373_v44 = vmul.f32 %v1598_v38, %v1372_v50 }
0x149e   :  { %v1374_v54 = vadd.f32 %v1598_v38, %v1373_v44 }
0x14a0   :  { %v1378_v58 = vsel %vm1377_vm0, %v1598_v38, %v1374_v54 }
0x14a1   :  { %v1383_v62 = vsel %vm1380_vm15, %v1382_v40, %v1378_v58 }
0x14a2   :  { %v1390_v1 = vmul.f32 %v1388_v63, %v1383_v62 }
0x1513   :  { %v1287_v56 = vpop.f32.mrf.mxu2 }
0x1514   :  { %v1311_v9 = vadd.f32 %v1287_v56, %v1723_v53  ;;  %v1291_v2 = vadd.f32 %v1287_v56, %v1270_v25 }
0x1516   :  { %1313 = vrot.lane.b32.xlu2 %v1311_v9, %s1611_s18  ;;  %v1489_v5 = vmul.f32 -1.442695, %v1291_v2  ;;  %v1269_v9 = vld [vmem:[%s2188_s0] sm:$0xff] }
0x1518   :  { %1599 = vpow2.f32 %v1489_v5 }
0x151b   :  { %v1289_v8 = vpop.f32.mrf.mxu2 }
0x151e   :  { %1392 = vrot.lane.b32.xlu2 %v1390_v1, %s1610_s1  ;;  %v1600_v7 = vpop.eup %1599 }
0x151f   :  { %v1295_v55 = vadd.f32 1.0, %v1600_v7 }
0x1521   :  { %1601 = vrcp.f32 %v1295_v55  ;;  %v1307_v23 = vand.u32 2147483648, %v1295_v55  ;;  %vm1301_vm2 = vweird.f32 %v1295_v55  ;;  %v1305_v27 = vand.u32 2147483647, %v1295_v55 }
0x1523   :  { %v1308_v32 = vor.u32 1.1754944e-38, %v1307_v23  ;;  %vm1306_vm4 = vcmp.eq.f32.partialorder %v1305_v27, 8.507059e+37 }
0x1527   :  { %v1602_v53 = vpop.eup %1601 }
0x1528   :  { %v1297_v4 = vmul.f32 %v1602_v53, %v1295_v55  ;;  %vm1302_vm1 = vweird.f32 %v1602_v53 }
0x1529   :  { %vm1303_vm3 = vmor %vm1301_vm2, %vm1302_vm1 }
0x152a   :  { %v1298_v12 = vsub.f32 1.0, %v1297_v4  ;;  %v1100_v4 = vpack.c.bf16 %v2005_v57, %v2005_v57 }
0x152c   :  { %v1299_v14 = vmul.f32 %v1602_v53, %v1298_v12 }
0x152e   :  { %v1300_v42 = vadd.f32 %v1602_v53, %v1299_v14 }
0x1530   :  { %v1304_v28 = vsel %vm1303_vm3, %v1602_v53, %v1300_v42 }
0x1531   :  { %v1309_v31 = vsel %vm1306_vm4, %v1308_v32, %v1304_v28 }
0x1570   :  { %v1314_v0 = vpop.permute.xlu2 %1313 }
0x1571   :  { %v1316_v34 = vmul.f32 %v1314_v0, %v1309_v31 }
0x1573   :  { %1318 = vrot.lane.b32.xlu1 %v1316_v34, %s1610_s1 }
0x1578   :  { %v1393_v47 = vpop.permute.xlu2 %1392 }
0x1579   :  { %v1395_v49 = vadd.f32 %v1393_v47, %v1340_v36  ;;  %v932_v36 = vmul.f32 %v1940_v60, %v1936_v21  ;;  %v442_v21 = vmul.f32 %v1776_v19, %v1772_v16  ;;  %v600_v60 = vmul.f32 %v1836_v48, %v1832_v45 }
0x157a   :  { %v1252_v19 = vmul.f32 %v2033_v26, %v2028_v24  ;;  %v604_v24 = vpack.c.bf16 %v1860_v6, %v1860_v6  ;;  %v766_v26 = vmul.f32 %v1895_v22, %v1891_v18  ;;  %v1175_v6 = vmul.f32 %v2050_v30, %v2046_v29 }
0x157b   :  { %1603 = vtanh.f32 %v1395_v49  ;;  %v449_v54 = vpack.c.bf16 %v442_v21, %v442_v21  ;;  %v611_v13 = vpack.c.bf16 %v600_v60, %v600_v60  ;;  %v1096_v29 = vmul.f32 %v1987_v51, %v1983_v52 }
0x157c   :  { %v1262_v45 = vpack.c.bf16 %v1252_v19, %v1252_v19  ;;  %v777_v58 = vpack.c.bf16 %v766_v26, %v766_v26  ;;  %v1256_v40 = vpack.c.bf16 %v1175_v6, %v1175_v6 }
0x157d   :  { %v1102_v55 = vpack.c.bf16 %v1096_v29, %v1096_v29 }
0x1581   :  { %v2066_v35 = vpop.eup %1603 }
0x1582   :  { %v1397_v3 = vsub.f32 %v2038_v10, %v2066_v35  ;;  %v942_v10 = vpack.c.bf16 %v932_v36, %v932_v36 }
0x1584   :  { %1399 = vrot.lane.b32.xlu1 %v1397_v3, %s1612_s19 }
0x158c   :  { %1336 = vperm.xlu1 %1508, %v1268_v61  }
0x1594   :  { %289 = vrot.lane.b32.xlu1 %v1735_v11, %s1610_s1 }
0x159c   :  { %772 = vrot.lane.b32.xlu1 %v770_v37, %s1613_s12 }
0x15a4   :  { %944 = vrot.lane.b32.xlu1 %v942_v10, %s1610_s1 }
0x15e5   :  { %v1319_v59 = vpop.permute.xlu1 %1318 }
0x15e6   :  { %v1321_v38 = vadd.f32 %v1319_v59, %v1270_v25 }
0x15e8   :  { %1605 = vtanh.f32 %v1321_v38 }
0x15ee   :  { %v1606_v43 = vpop.eup %1605 }
0x15ef   :  { %v1323_v50 = vsub.f32 %v2054_v33, %v1606_v43 }
0x15f1   :  { %1325 = vrot.lane.b32.xlu0 %v1323_v50, %s1612_s19 }
0x15f6   :  { %v1400_v11 = vpop.permute.xlu1 %1399 }
0x15f7   :  { %v1402_v44 = vmul.f32 %v1400_v11, %v1383_v62 }
0x15f9   :  { %1404 = vrot.lane.b32.xlu0 %v1402_v44, %s1608_s5 }
0x15fe   :  { %v1337_v39 = vpop.permute.xlu1 %1336 }
0x1601   :  { %282 = vrot.lane.b32.xlu0 %v1754_v41, %s1611_s18  ;;  %v855_v41 = vmul.f32 %v1962_v20, %v1958_v15  ;;  %v446_v15 = vpack.c.bf16 %v1801_v46, %v1801_v46 }
0x1603   :  { %v936_v16 = vpack.c.bf16 %v855_v41, %v855_v41 }
0x1606   :  { %v290_v33 = vpop.permute.xlu1 %289 }
0x1607   :  { %293 = vst.msk [vmem:[%s2189_s7 + $0x4] sm:$0xf] %vm292_vm5, %v290_v33 }
0x1608   :  { %451 = vst.msk [vmem:[%s2189_s7 + $0x4] sm:$0xf] %vm450_vm6, %v449_v54 }
0x1609   :  { %613 = vrot.lane.b32.xlu0 %v611_v13, %s1611_s18 }
0x160e   :  { %v773_v1 = vpop.permute.xlu1 %772 }
0x1611   :  { %938 = vrot.lane.b32.xlu0 %v936_v16, %s1611_s18 }
0x1616   :  { %v945_v53 = vpop.permute.xlu1 %944 }
0x1619   :  { %1264 = vrot.lane.b32.xlu0 %v1262_v45, %s1611_s18 }
0x1663   :  { %v1326_v48 = vpop.permute.xlu0 %1325 }
0x1664   :  { %v1328_v56 = vmul.f32 %v1326_v48, %v1309_v31 }
0x1666   :  { %1330 = vrot.lane.b32.xlu2 %v1328_v56, %s1608_s5 }
0x166b   :  { %v1405_v17 = vpop.permute.xlu0 %1404 }
0x166c   :  { %v1407_v22 = vadd.f32 %v2066_v35, %v1405_v17 }
0x166e   :  { %1410 = vperm.xlu2 %1507, %v1269_v9  }
0x1673   :  { %v283_v20 = vpop.permute.xlu0 %282 }
0x1674   :  { %286 = vst.msk [vmem:[%s2189_s7] sm:$0xf] %vm285_vm7, %v283_v20 }
0x1675   :  { %448 = vst.msk [vmem:[%s2189_s7] sm:$0xf] %vm447_vm8, %v446_v15 }
0x1676   :  { %606 = vrot.lane.b32.xlu2 %v604_v24, %s1610_s1 }
0x167b   :  { %v614_v46 = vpop.permute.xlu0 %613 }
0x167c   :  { %617 = vst.msk [vmem:[%s2189_s7 + $0x4] sm:$0xf] %vm616_vm9, %v614_v46 }
0x167e   :  { %779 = vrot.lane.b32.xlu2 %v777_v58, %s1613_s12 }
0x1683   :  { %v939_v5 = vpop.permute.xlu0 %938 }
0x1686   :  { %1258 = vrot.lane.b32.xlu2 %v1256_v40, %s1610_s1 }
0x168b   :  { %v1265_v52 = vpop.permute.xlu0 %1264 }
0x16c0   :  { %v1331_v62 = vpop.permute.xlu2 %1330 }
0x16c1   :  { %v1333_v63 = vadd.f32 %v1606_v43, %v1331_v62 }
0x16c3   :  { %v1339_v8 = vmul.f32 %v1337_v39, %v1333_v63 }
0x16c5   :  { %v1414_v18 = vpack.c.bf16 %v1339_v8, %v1339_v8 }
0x16c7   :  { %1416 = vrot.lane.b32.xlu1 %v1414_v18, %s1613_s12 }
0x16c8   :  { %v1411_v25 = vpop.permute.xlu2 %1410 }
0x16c9   :  { %v1413_v2 = vmul.f32 %v1411_v25, %v1407_v22 }
0x16cb   :  { %v1420_v7 = vpack.c.bf16 %v1413_v2, %v1413_v2 }
0x16cd   :  { %1422 = vrot.lane.b32.xlu2 %v1420_v7, %s1613_s12 }
0x16d0   :  { %v607_v30 = vpop.permute.xlu2 %606 }
0x16d1   :  { %610 = vst.msk [vmem:[%s2189_s7] sm:$0xf] %vm609_vm10, %v607_v30 }
0x16d2   :  { %776 = vst.msk [vmem:[%s2189_s7] sm:$0xf] %vm775_vm11, %v773_v1 }
0x16d3   :  { %947 = vst.msk [vmem:[%s2189_s7] sm:$0xf] %vm292_vm5, %v945_v53 }
0x16d4   :  { %1103 = vst.msk [vmem:[%s2189_s7] sm:$0xf] %vm450_vm6, %v1102_v55 }
0x16d5   :  { %1267 = vst.msk [vmem:[%s2189_s7] sm:$0xf] %vm616_vm9, %v1265_v52 }
0x16d8   :  { %v780_v51 = vpop.permute.xlu2 %779 }
0x16d9   :  { %783 = vst.msk [vmem:[%s2189_s7 + $0x4] sm:$0xf] %vm782_vm12, %v780_v51 }
0x16da   :  { %941 = vst.msk [vmem:[%s2189_s7 + $0x4] sm:$0xf] %vm285_vm7, %v939_v5 }
0x16db   :  { %1101 = vst.msk [vmem:[%s2189_s7 + $0x4] sm:$0xf] %vm447_vm8, %v1100_v4 }
0x16e0   :  { %v1259_v12 = vpop.permute.xlu2 %1258 }
0x16e1   :  { %1261 = vst.msk [vmem:[%s2189_s7 + $0x4] sm:$0xf] %vm609_vm10, %v1259_v12 }
0x1727   :  { %v1423_v57 = vpop.permute.xlu2 %1422 }
0x1728   :  { %1425 = vst.msk [vmem:[%s2189_s7] sm:$0xf] %vm782_vm12, %v1423_v57 }
0x1739   :  { %v1417_v14 = vpop.permute.xlu1 %1416 }
0x173a   :  { %1419 = vst.msk [vmem:[%s2189_s7 + $0x4] sm:$0xf] %vm775_vm11, %v1417_v14 }

// kernel: forward.3
= control target key start
LH: loop header
LB: loop body
LE: loop exit
PB: predicated region body
PF: predicated region fallthrough
CT: control target
= control target key end

     0   :  { %s2550_s0 = inlined_call_operand.vmem [shape: f32[8,1], index: 0, kind: input, shape index: {}]   ;;  %s2551_s1 = inlined_call_operand.vmem [shape: bf16[8,8], index: 1, kind: input, shape index: {}]   ;;  %s2552_s2 = inlined_call_operand.vmem [shape: bf16[8,264], index: 2, kind: input, shape index: {}]   ;;  %s2553_s3 = inlined_call_operand.vmem [shape: bf16[8,48], index: 3, kind: input, shape index: {}]   ;;  %s2554_s4 = inlined_call_operand.vmem [shape: f32[1,48], index: 4, kind: input, shape index: {}]   ;;  %s2555_s5 = inlined_call_operand.vmem [shape: bf16[8,24], index: 5, kind: input, shape index: {}]   ;;  %s2556_s6 = inlined_call_operand.vmem [shape: bf16[8,24], index: 6, kind: input, shape index: {}]   ;;  %s2557_s7 = inlined_call_operand.vmem [shape: f32[1,16], index: 7, kind: input, shape index: {}]   ;;  %s2558_s8 = inlined_call_operand.vmem [shape: bf16[264,96], index: 8, kind: input, shape index: {}]   ;;  %s2559_s9 = inlined_call_operand.vmem [shape: f32[1,96], index: 9, kind: input, shape index: {}]   ;;  %s2560_s10 = inlined_call_operand.vmem [shape: bf16[16,48], index: 10, kind: input, shape index: {}]   ;;  %s2561_s11 = inlined_call_operand.vmem [shape: bf16[16,48], index: 11, kind: input, shape index: {}]   ;;  %s2562_s12 = inlined_call_operand.vmem [shape: f32[1,32], index: 12, kind: input, shape index: {}]   ;;  %s2563_s13 = inlined_call_operand.vmem [shape: bf16[32,10], index: 13, kind: input, shape index: {}]   ;;  %s2564_s14 = inlined_call_operand.vmem [shape: f32[1,10], index: 14, kind: input, shape index: {}]   ;;  %s2565_s15 = inlined_call_operand.hbm [shape: f32[8,16], index: 15, kind: output, shape index: {0}]   ;;  %s2566_s16 = inlined_call_operand.hbm [shape: f32[8,10], index: 16, kind: output, shape index: {1}]  }
   0x1   :  { %2568 = sst [smem:[#allocation11_spill]] %s2550_s0 }
   0x2   :  { %22 = vsyncpa [#allocation6], 0  ;;  %v1749_v0 = vld [vmem:[%s2558_s8 + $0x78] sm:$0xff]  ;;  %v118_v1 = vld [vmem:[%s2558_s8 + $0x80] sm:$0xf]  ;;  %vm65_vm0 = vcmask 1043456  }
   0x3   :  { %v1741_v2 = vld [vmem:[%s2558_s8 + $0x38] sm:$0xff]  ;;  %v198_v3 = vunpack.c.l.b16 %v118_v1  ;;  %v85_v4 = vld [vmem:[%s2552_s2 + $0x8] sm:$0xf]  ;;  %251 = vmatpush.bf16.msra.mxu2 %v1749_v0  ;;  %v1748_v5 = vld [vmem:[%s2558_s8 + $0x70] sm:$0xff]  ;;  %v1923_v10 = vmov 0   ;;  %vm61_vm1 = vcmask 64512  }
   0x4   :  { %238 = vmatpush.bf16.msra.mxu1 %v1741_v2  ;;  %v127_v6 = vunpack.c.l.b16 %v85_v4  ;;  %v2039_v8 = vld [vmem:[%s2560_s10] sm:$0xff]  ;;  %v1740_v9 = vld [vmem:[%s2558_s8 + $0x30] sm:$0xff]  ;;  %1767 = vset.pattern.permute.xlu2 %v1923_v10  ;;  %v1747_v13 = vld [vmem:[%s2558_s8 + $0x68] sm:$0xff] }
   0x5   :  { %v215_v7 = vpack.c.b16 %v198_v3, %v198_v3  ;;  %1768 = vset.pattern.permute.xlu0 %v1923_v10  ;;  %1769 = vset.pattern.permute.xlu1 %v1923_v10  ;;  %v1739_v14 = vld [vmem:[%s2558_s8 + $0x28] sm:$0xff]  ;;  %v2057_v15 = vld [vmem:[%s2561_s11] sm:$0xff] }
   0x6   :  { %v130_v12 = vpack.c.b16 %v127_v6, %v127_v6 }
   0x7   :  { %v236_v11 = vsel %vm65_vm0, %v215_v7, 0  ;;  %252 = vmatpush.bf16.msra.mxu2 %v1748_v5 }
   0x8   :  { %271 = vmatpush.bf16.msra.mxu3 %v236_v11  ;;  %239 = vmatpush.bf16.msra.mxu1 %v1740_v9 }
   0xc   :  { %383 = vmatpush.bf16.msrb.mxu3 %v2039_v8 }
   0xd   :  { %23 = vsyncpa [#allocation8], 0  ;;  %1688 = vmatmul.msk.bf16.vlgmr.msra.gmra.mxu3 %vm61_vm1, %v130_v12  ;;  %v2064_v16 = vld [vmem:[%s2562_s12] ss:$0 sm:$0xff]  ;;  %253 = vmatpush.bf16.msra.mxu2 %v1747_v13  ;;  %s1924_s30 = smov 16   ;;  %v1745_v19 = vld [vmem:[%s2558_s8 + $0x58] sm:$0xff] }
   0xe   :  { %v1746_v17 = vld [vmem:[%s2558_s8 + $0x60] sm:$0xff]  ;;  %240 = vmatpush.bf16.msra.mxu1 %v1739_v14  ;;  %555 = vrot.lane.b32.xlu0 %v2064_v16, %s1924_s30  ;;  %v1737_v20 = vld [vmem:[%s2558_s8 + $0x18] sm:$0xff]  ;;  %v1744_v21 = vld [vmem:[%s2558_s8 + $0x50] sm:$0xff]  ;;  %vm277_vm2 = vcmask 785408   ;;  %vm82_vm3 = vcmask 392192   ;;  %s1930_s25 = smov 24  }
   0xf   :  { %v1738_v18 = vld [vmem:[%s2558_s8 + $0x20] sm:$0xff]  ;;  %v1736_v22 = vld [vmem:[%s2558_s8 + $0x10] sm:$0xff]  ;;  %v1743_v23 = vld [vmem:[%s2558_s8 + $0x48] sm:$0xff]  ;;  %s2569_s28 = sld [smem:[#allocation11_spill]]  ;;  %s1931_s0 = smov 120  }
  0x10   :  { %525 = vmatpush.bf16.msra.mxu3 %v2057_v15  ;;  %v84_v24 = vld [vmem:[%s2552_s2] sm:$0xff]  ;;  %v1735_v25 = vld [vmem:[%s2558_s8 + $0x8] sm:$0xff]  ;;  %s1932_s2 = smov 88   ;;  %s1933_s10 = smov 64  }
  0x11   :  { %254 = vmatpush.bf16.msra.mxu2 %v1746_v17  ;;  %v126_v26 = vunpack.c.h.b16 %v84_v24  ;;  %v1742_v27 = vld [vmem:[%s2558_s8 + $0x40] sm:$0xff]  ;;  %v125_v28 = vunpack.c.l.b16 %v84_v24  ;;  %s1609_s11 = sshll.u32 %s2566_s16, 4  ;;  %s1610_s11 = int_to_ptr.hbm [resolvable:$true] %s1609_s11 }
  0x12   :  { %241 = vmatpush.bf16.msra.mxu1 %v1738_v18  ;;  %v1734_v29 = vld [vmem:[%s2558_s8] sm:$0xff] }
  0x13   :  { %v129_v30 = vpack.c.b16 %v126_v26, %v126_v26  ;;  %v128_v31 = vpack.c.b16 %v125_v28, %v125_v28  ;;  %v56_v34 = vld [vmem:[%s2553_s3] sm:$0xf] }
  0x14   :  { %v279_v35 = vld [vmem:[%s2555_s5] sm:$0xf]  ;;  %v67_v36 = vsel %vm65_vm0, %v56_v34, 0 }
  0x15   :  { %255 = vmatpush.bf16.msra.mxu2 %v1745_v19  ;;  %v2116_v37 = vsel %vm65_vm0, %v279_v35, 0  ;;  %76 = vmatpush.bf16.msra.mxu0 %v67_v36  ;;  %v55_v38 = vld [vmem:[%s2551_s1] sm:$0xf]  ;;  %s1925_s1 = smov 48  }
  0x16   :  { %242 = vmatpush.bf16.msra.mxu1 %v1737_v20  ;;  %v1771_v40 = vld [vmem:[%s2559_s9] ss:$0 sm:$0xff]  ;;  %s1926_s9 = smov 32  }
  0x17   :  { %v280_v53 = vld [vmem:[%s2556_s6] sm:$0xf]  ;;  %s1927_s6 = smov 8  }
  0x18   :  { %1623 = vmatmul.msk.bf16.vlgmr.msra.gmra.mxu0 %vm61_vm1, %v55_v38  ;;  %v2142_v54 = vsel %vm65_vm0, %v280_v53, 0  ;;  %v2151_v58 = vld [vmem:[%s2557_s7] ss:$0 sm:$0xff]  ;;  %s1929_s7 = smov 112   ;;  %vm373_vm0 = vcmask 130048  }
  0x19   :  { %256 = vmatpush.bf16.msra.mxu2 %v1744_v21  ;;  %307 = vmatpush.bf16.msrb.mxu0 %v2116_v37  ;;  %v1773_v60 = vld [vmem:[%s2554_s4] ss:$0 sm:$0xff]  ;;  %s1928_s4 = smov 96  }
  0x1a   :  { %243 = vmatpush.bf16.msra.mxu1 %v1736_v22 }
  0x1d   :  { %384 = vmatmul.bf16.vlgmr.msrb.gmra.mxu3 %v1923_v10  ;;  %257 = vmatpush.bf16.msra.mxu2 %v1743_v23 }
  0x1e   :  { %845 = vmatpush.bf16.msrb.mxu3 %v2057_v15  ;;  %244 = vmatpush.bf16.msra.mxu1 %v1735_v25 }
  0x1f   :  { %448 = vmatpush.bf16.msra.mxu0 %v2142_v54 }
  0x21   :  { %258 = vmatpush.bf16.msra.mxu2 %v1742_v27 }
  0x22   :  { %245 = vmatpush.bf16.msra.mxu1 %v1734_v29 }
  0x24   :  { %259 = vmatmul.bf16.vlgmr.msra.gmra.mxu2 %v129_v30 }
  0x25   :  { %700 = vmatpush.bf16.msrb.mxu2 %v2039_v8  ;;  %246 = vmatmul.bf16.vlgmr.msra.gmra.mxu1 %v128_v31 }
  0x26   :  { %627 = vmatpush.bf16.msrb.mxu1 %v2116_v37 }
  0x28   :  { %308 = vmatmul.bf16.vlgmr.msrb.gmra.mxu0 %v1923_v10 }
  0x29   :  { %1018 = vmatpush.bf16.msra.mxu2 %v2039_v8  ;;  %768 = vmatpush.bf16.msrb.mxu0 %v2142_v54 }
  0x2a   :  { %945 = vmatpush.bf16.msra.mxu1 %v2116_v37 }
  0x2d   :  { %526 = vmatmul.bf16.vlgmr.msra.gmra.mxu3 %v1923_v10 }
  0x2e   :  { %1163 = vmatpush.bf16.msra.mxu3 %v2057_v15 }
  0x38   :  { %449 = vmatmul.bf16.vlgmr.msra.gmra.mxu0 %v1923_v10 }
  0x39   :  { %1086 = vmatpush.bf16.msra.mxu0 %v2142_v54 }
  0x80   :  { %v2130_v48 = vpop.permute.xlu0 %555 }
  0x90   :  { %v273_v32 = vpop.f32.mrf.mxu3 }
  0x95   :  { %v78_v61 = vpop.f32.mrf.mxu0 }
  0x96   :  { %v79_v63 = vadd.f32 %v1773_v60, %v78_v61 }
  0x98   :  { %v275_v33 = vpop.f32.mrf.mxu3  ;;  %83 = vst.msk [vmem:[#allocation2] sm:$0xff] %vm82_vm3, %v79_v63 }
  0x9d   :  { %v80_v1 = vpop.f32.mrf.mxu0 }
  0xa0   :  { %v2124_v39 = vpop.f32.mrf.mxu3 }
  0xa2   :  { %v247_v41 = vpop.f32.mrf.mxu1 }
  0xa3   :  { %v248_v42 = vadd.f32 %v1771_v40, %v247_v41 }
  0xa5   :  { %v2158_v9 = vpop.f32.mrf.mxu0 }
  0xa7   :  { %v260_v44 = vpop.f32.mrf.mxu2 }
  0xa8   :  { %v387_v43 = vpop.f32.mrf.mxu3  ;;  %v261_v45 = vadd.f32 %v260_v44, %v248_v42 }
  0xaa   :  { %v274_v46 = vadd.f32 %v273_v32, %v261_v45  ;;  %v249_v47 = vpop.f32.mrf.mxu1 }
  0xac   :  { %278 = vst.msk [vmem:[#allocation3] sm:$0xff] %vm277_vm2, %v274_v46 }
  0xad   :  { %v311_v17 = vpop.f32.mrf.mxu0 }
  0xaf   :  { %v262_v50 = vpop.f32.mrf.mxu2 }
  0xb0   :  { %v527_v49 = vpop.f32.mrf.mxu3 }
  0xb1   :  { %532 = vrot.lane.b32.xlu0 %v527_v49, %s1925_s1  ;;  %v558_v51 = vadd.f32 %v2130_v48, %v527_v49  ;;  %v292_v49 = vld [vmem:[%s2569_s28 + $0x6] sm:$0x3] }
  0xb3   :  { %560 = vrot.lane.b32.xlu1 %v558_v51, %s1924_s30  ;;  %v511_v56 = vld [vmem:[#allocation3 + $0x6] sm:$0x3]  ;;  %v366_v20 = vld [vmem:[#allocation3] sm:$0x3] }
  0xb4   :  { %v389_v21 = vadd.f32 %v2124_v39, %v366_v20 }
  0xb5   :  { %v450_v26 = vpop.f32.mrf.mxu0 }
  0xb6   :  { %v1694_v22 = vmul.f32 -1.442695, %v389_v21 }
  0xb8   :  { %v529_v52 = vpop.f32.mrf.mxu3 }
  0xbb   :  { %409 = vrot.lane.b32.xlu1 %v2064_v16, %s1926_s9 }
  0xbd   :  { %v452_v29 = vpop.f32.mrf.mxu0 }
  0xc3   :  { %478 = vrot.lane.b32.xlu1 %v2151_v58, %s1927_s6 }
 0x123   :  { %v533_v55 = vpop.permute.xlu0 %532 }
 0x124   :  { %v535_v57 = vadd.f32 %v533_v55, %v511_v56  ;;  %v437_v55 = vld [vmem:[#allocation2 + $0x6] sm:$0x3] }
 0x125   :  { %v561_v10 = vpop.permute.xlu1 %560 }
 0x126   :  { %v1700_v59 = vmul.f32 -1.442695, %v535_v57 }
 0x128   :  { %1775 = vpow2.f32 %v1700_v59 }
 0x12d   :  { %v2161_v18 = vpop.permute.xlu1 %409 }
 0x12e   :  { %v1776_v62 = vpop.eup %1775  ;;  %v412_v19 = vadd.f32 %v2161_v18, %v2124_v39 }
 0x12f   :  { %v539_v0 = vadd.f32 1.0, %v1776_v62 }
 0x131   :  { %1777 = vrcp.f32 %v539_v0  ;;  %v551_v5 = vand.u32 2147483648, %v539_v0  ;;  %v549_v7 = vand.u32 2147483647, %v539_v0  ;;  %vm545_vm5 = vweird.f32 %v539_v0 }
 0x132   :  { %1779 = vpow2.f32 %v1694_v22 }
 0x133   :  { %v552_v12 = vor.u32 1.1754944e-38, %v551_v5  ;;  %vm550_vm7 = vcmp.eq.f32.partialorder %v549_v7, 8.507059e+37 }
 0x135   :  { %v2170_v44 = vpop.permute.xlu1 %478 }
 0x136   :  { %v481_v45 = vadd.f32 %v2170_v44, %v450_v26 }
 0x137   :  { %v1778_v2 = vpop.eup %1777 }
 0x138   :  { %v541_v3 = vmul.f32 %v1778_v2, %v539_v0  ;;  %vm546_vm4 = vweird.f32 %v1778_v2  ;;  %v1780_v23 = vpop.eup %1779 }
 0x139   :  { %vm547_vm6 = vmor %vm545_vm5, %vm546_vm4  ;;  %v393_v24 = vadd.f32 1.0, %v1780_v23 }
 0x13a   :  { %v542_v4 = vsub.f32 1.0, %v541_v3 }
 0x13b   :  { %1781 = vrcp.f32 %v393_v24  ;;  %v405_v34 = vand.u32 2147483648, %v393_v24  ;;  %vm399_vm9 = vweird.f32 %v393_v24  ;;  %v403_v35 = vand.u32 2147483647, %v393_v24 }
 0x13c   :  { %v543_v6 = vmul.f32 %v1778_v2, %v542_v4 }
 0x13d   :  { %v406_v38 = vor.u32 1.1754944e-38, %v405_v34  ;;  %vm404_vm11 = vcmp.eq.f32.partialorder %v403_v35, 8.507059e+37 }
 0x13e   :  { %v544_v11 = vadd.f32 %v1778_v2, %v543_v6 }
 0x140   :  { %v548_v13 = vsel %vm547_vm6, %v1778_v2, %v544_v11 }
 0x141   :  { %v553_v14 = vsel %vm550_vm7, %v552_v12, %v548_v13  ;;  %v1782_v25 = vpop.eup %1781 }
 0x142   :  { %v563_v16 = vmul.f32 %v561_v10, %v553_v14  ;;  %v395_v27 = vmul.f32 %v1782_v25, %v393_v24  ;;  %vm400_vm8 = vweird.f32 %v1782_v25 }
 0x143   :  { %vm401_vm10 = vmor %vm399_vm9, %vm400_vm8 }
 0x144   :  { %565 = vrot.lane.b32.xlu2 %v563_v16, %s1926_s9  ;;  %v396_v28 = vsub.f32 1.0, %v395_v27  ;;  %v293_v27 = vld [vmem:[#allocation2] sm:$0x3] }
 0x146   :  { %v397_v30 = vmul.f32 %v1782_v25, %v396_v28  ;;  %v313_v28 = vadd.f32 %v2158_v9, %v293_v27 }
 0x148   :  { %v398_v33 = vadd.f32 %v1782_v25, %v397_v30  ;;  %v1689_v29 = vmul.f32 -1.442695, %v313_v28 }
 0x14a   :  { %v402_v36 = vsel %vm401_vm10, %v1782_v25, %v398_v33 }
 0x14b   :  { %v407_v40 = vsel %vm404_vm11, %v406_v38, %v402_v36 }
 0x14c   :  { %414 = vrot.lane.b32.xlu2 %v412_v19, %s1928_s4 }
 0x19e   :  { %v566_v31 = vpop.permute.xlu2 %565 }
 0x19f   :  { %v568_v32 = vadd.f32 %v566_v31, %v511_v56 }
 0x1a1   :  { %1783 = vtanh.f32 %v568_v32 }
 0x1a6   :  { %v415_v39 = vpop.permute.xlu2 %414 }
 0x1a7   :  { %v1784_v41 = vpop.eup %1783  ;;  %v417_v42 = vmul.f32 %v415_v39, %v407_v40 }
 0x1a8   :  { %v570_v43 = vsub.f32 0.0, %v1784_v41 }
 0x1a9   :  { %419 = vrot.lane.b32.xlu2 %v417_v42, %s1926_s9 }
 0x1aa   :  { %572 = vrot.lane.b32.xlu0 %v570_v43, %s1929_s7 }
 0x1b1   :  { %506 = vperm.xlu2 %1767, %v292_v49  }
 0x1b2   :  { %455 = vrot.lane.b32.xlu0 %v450_v26, %s1930_s25 }
 0x1ba   :  { %483 = vrot.lane.b32.xlu0 %v481_v45, %s1927_s6 }
 0x203   :  { %v420_v46 = vpop.permute.xlu2 %419 }
 0x204   :  { %v422_v47 = vadd.f32 %v420_v46, %v366_v20 }
 0x206   :  { %1785 = vtanh.f32 %v422_v47 }
 0x20b   :  { %v2188_v13 = vpop.permute.xlu2 %506 }
 0x20c   :  { %v2178_v52 = vpop.eup %1785 }
 0x20d   :  { %v424_v57 = vsub.f32 0.0, %v2178_v52 }
 0x21c   :  { %v573_v50 = vpop.permute.xlu0 %572 }
 0x21d   :  { %v575_v51 = vmul.f32 %v573_v50, %v553_v14 }
 0x21f   :  { %577 = vrot.lane.b32.xlu1 %v575_v51, %s1924_s30 }
 0x224   :  { %v456_v53 = vpop.permute.xlu0 %455 }
 0x225   :  { %v458_v56 = vadd.f32 %v456_v53, %v437_v55 }
 0x227   :  { %v1695_v59 = vmul.f32 -1.442695, %v458_v56  ;;  %426 = vrot.lane.b32.xlu1 %v424_v57, %s1929_s7 }
 0x229   :  { %1787 = vpow2.f32 %v1695_v59 }
 0x22c   :  { %v484_v7 = vpop.permute.xlu0 %483 }
 0x22f   :  { %v1788_v60 = vpop.eup %1787  ;;  %333 = vrot.lane.b32.xlu1 %v2151_v58, %s1924_s30  ;;  %v291_v58 = vld [vmem:[%s2569_s28] sm:$0x3] }
 0x230   :  { %v462_v61 = vadd.f32 1.0, %v1788_v60 }
 0x232   :  { %1789 = vrcp.f32 %v462_v61  ;;  %v474_v1 = vand.u32 2147483648, %v462_v61  ;;  %v472_v3 = vand.u32 2147483647, %v462_v61  ;;  %vm468_vm13 = vweird.f32 %v462_v61 }
 0x234   :  { %v475_v5 = vor.u32 1.1754944e-38, %v474_v1  ;;  %vm473_vm15 = vcmp.eq.f32.partialorder %v472_v3, 8.507059e+37 }
 0x238   :  { %v1790_v62 = vpop.eup %1789 }
 0x239   :  { %v464_v63 = vmul.f32 %v1790_v62, %v462_v61  ;;  %vm469_vm12 = vweird.f32 %v1790_v62 }
 0x23a   :  { %vm470_vm14 = vmor %vm468_vm13, %vm469_vm12 }
 0x23b   :  { %v465_v0 = vsub.f32 1.0, %v464_v63 }
 0x23d   :  { %v466_v2 = vmul.f32 %v1790_v62, %v465_v0 }
 0x23f   :  { %v467_v4 = vadd.f32 %v1790_v62, %v466_v2  ;;  %v2235_v2 = vld [vmem:[#allocation3 + $0x4] sm:$0x3] }
 0x241   :  { %v471_v6 = vsel %vm470_vm14, %v1790_v62, %v467_v4 }
 0x242   :  { %v476_v10 = vsel %vm473_vm15, %v475_v5, %v471_v6 }
 0x243   :  { %v486_v11 = vmul.f32 %v484_v7, %v476_v10 }
 0x245   :  { %488 = vrot.lane.b32.xlu0 %v486_v11, %s1924_s30 }
 0x24d   :  { %361 = vperm.xlu0 %1768, %v291_v58  }
 0x291   :  { %v578_v12 = vpop.permute.xlu1 %577 }
 0x292   :  { %v580_v14 = vadd.f32 %v1784_v41, %v578_v12 }
 0x294   :  { %v2191_v16 = vmul.f32 %v580_v14, %v2188_v13 }
 0x296   :  { %v2195_v17 = vpack.c.bf16 %v2191_v16, %v2191_v16 }
 0x298   :  { %833 = vrot.lane.b32.xlu2 %v2195_v17, %s1925_s1 }
 0x299   :  { %v427_v19 = vpop.permute.xlu1 %426 }
 0x29a   :  { %v429_v20 = vmul.f32 %v427_v19, %v407_v40 }
 0x2a0   :  { %431 = vrot.lane.b32.xlu2 %v429_v20, %s1924_s30 }
 0x2a1   :  { %v2200_v21 = vpop.permute.xlu1 %333 }
 0x2a2   :  { %v336_v22 = vadd.f32 %v2200_v21, %v2158_v9 }
 0x2a4   :  { %338 = vrot.lane.b32.xlu1 %v336_v22, %s1929_s7 }
 0x2b7   :  { %v489_v23 = vpop.permute.xlu0 %488 }
 0x2b8   :  { %v491_v24 = vadd.f32 %v489_v23, %v437_v55 }
 0x2ba   :  { %1791 = vtanh.f32 %v491_v24 }
 0x2bb   :  { %1793 = vpow2.f32 %v1689_v29 }
 0x2bf   :  { %v2209_v34 = vpop.permute.xlu0 %361 }
 0x2c0   :  { %v1792_v25 = vpop.eup %1791 }
 0x2c1   :  { %v493_v26 = vsub.f32 0.0, %v1792_v25  ;;  %v1794_v31 = vpop.eup %1793 }
 0x2c2   :  { %v317_v32 = vadd.f32 1.0, %v1794_v31  ;;  %v685_v31 = vld [vmem:[#allocation3 + $0x2] sm:$0x3] }
 0x2c3   :  { %495 = vrot.lane.b32.xlu2 %v493_v26, %s1931_s0 }
 0x2c4   :  { %1795 = vrcp.f32 %v317_v32  ;;  %vm323_vm2 = vweird.f32 %v317_v32  ;;  %v329_v41 = vand.u32 2147483648, %v317_v32  ;;  %v327_v43 = vand.u32 2147483647, %v317_v32 }
 0x2c6   :  { %v330_v45 = vor.u32 1.1754944e-38, %v329_v41  ;;  %vm328_vm5 = vcmp.eq.f32.partialorder %v327_v43, 8.507059e+37 }
 0x2ca   :  { %v1796_v38 = vpop.eup %1795 }
 0x2cb   :  { %v319_v39 = vmul.f32 %v1796_v38, %v317_v32  ;;  %vm324_vm3 = vweird.f32 %v1796_v38 }
 0x2cc   :  { %vm325_vm4 = vmor %vm323_vm2, %vm324_vm3 }
 0x2f2   :  { %v834_v30 = vpop.permute.xlu2 %833 }
 0x2f3   :  { %1707 = vmatmul.msk.bf16.vlgmr.msrb.gmra.mxu3 %vm373_vm0, %v834_v30 }
 0x2f4   :  { %1472 = vmatpush.bf16.msrb.mxu3 %v2057_v15  ;;  %v320_v15 = vsub.f32 1.0, %v319_v39 }
 0x2f6   :  { %v321_v40 = vmul.f32 %v1796_v38, %v320_v15 }
 0x2f8   :  { %v322_v42 = vadd.f32 %v1796_v38, %v321_v40 }
 0x2fa   :  { %v432_v33 = vpop.permute.xlu2 %431  ;;  %v326_v46 = vsel %vm325_vm4, %v1796_v38, %v322_v42 }
 0x2fb   :  { %v434_v35 = vadd.f32 %v2178_v52, %v432_v33  ;;  %v331_v49 = vsel %vm328_vm5, %v330_v45, %v326_v46 }
 0x2fd   :  { %v2213_v36 = vmul.f32 %v434_v35, %v2209_v34 }
 0x2ff   :  { %v2217_v9 = vpack.c.bf16 %v2213_v36, %v2213_v36 }
 0x301   :  { %688 = vrot.lane.b32.xlu1 %v2217_v9, %s1928_s4 }
 0x316   :  { %v339_v47 = vpop.permute.xlu1 %338 }
 0x317   :  { %v341_v50 = vmul.f32 %v339_v47, %v331_v49 }
 0x319   :  { %343 = vrot.lane.b32.xlu2 %v341_v50, %s1924_s30 }
 0x31d   :  { %v496_v51 = vpop.permute.xlu2 %495 }
 0x31e   :  { %v498_v52 = vmul.f32 %v496_v51, %v476_v10 }
 0x320   :  { %500 = vrot.lane.b32.xlu0 %v498_v52, %s1927_s6 }
 0x373   :  { %v689_v53 = vpop.permute.xlu1 %688  ;;  %v344_v55 = vpop.permute.xlu2 %343 }
 0x374   :  { %v346_v56 = vadd.f32 %v344_v55, %v293_v27  ;;  %1703 = vmatmul.msk.bf16.vlgmr.msrb.gmra.mxu2 %vm373_vm0, %v689_v53 }
 0x375   :  { %1333 = vmatpush.bf16.msrb.mxu2 %v2039_v8 }
 0x376   :  { %1797 = vtanh.f32 %v346_v56  ;;  %v847_v57 = vpop.f32.mrf.mxu3 }
 0x377   :  { %852 = vrot.lane.b32.xlu0 %v847_v57, %s1925_s1  ;;  %v875_v8 = vadd.f32 %v847_v57, %v2130_v48 }
 0x37c   :  { %v1798_v59 = vpop.eup %1797 }
 0x37d   :  { %v348_v60 = vsub.f32 0.0, %v1798_v59 }
 0x37e   :  { %v849_v61 = vpop.f32.mrf.mxu3 }
 0x37f   :  { %350 = vrot.lane.b32.xlu1 %v348_v60, %s1931_s0 }
 0x392   :  { %v501_v62 = vpop.permute.xlu0 %500 }
 0x393   :  { %v503_v63 = vadd.f32 %v1792_v25, %v501_v62 }
 0x395   :  { %v2228_v0 = vmul.f32 %v2188_v13, %v503_v63  ;;  %v611_v63 = vld [vmem:[%s2569_s28 + $0x4] sm:$0x3] }
 0x397   :  { %v754_v1 = vpack.c.bf16 %v2228_v0, %v2228_v0 }
 0x399   :  { %756 = vrot.lane.b32.xlu2 %v754_v1, %s1932_s2 }
 0x3a1   :  { %877 = vrot.lane.b32.xlu2 %v875_v8, %s1924_s30 }
 0x3e9   :  { %v853_v3 = vpop.permute.xlu0 %852 }
 0x3ea   :  { %v855_v4 = vadd.f32 %v853_v3, %v2235_v2 }
 0x3ec   :  { %v1708_v5 = vmul.f32 -1.442695, %v855_v4 }
 0x3ee   :  { %1799 = vpow2.f32 %v1708_v5 }
 0x3f1   :  { %v351_v6 = vpop.permute.xlu1 %350 }
 0x3f2   :  { %v353_v7 = vmul.f32 %v351_v6, %v331_v49 }
 0x3f3   :  { %v757_v10 = vpop.permute.xlu2 %756 }
 0x3f4   :  { %v1800_v11 = vpop.eup %1799  ;;  %355 = vrot.lane.b32.xlu1 %v353_v7, %s1927_s6  ;;  %1705 = vmatmul.msk.bf16.vlgmr.msrb.gmra.mxu0 %vm61_vm1, %v757_v10 }
 0x3f5   :  { %v859_v58 = vadd.f32 1.0, %v1800_v11  ;;  %1398 = vmatpush.bf16.msrb.mxu0 %v2142_v54  ;;  %v2268_v11 = vld [vmem:[#allocation2 + $0x4] sm:$0x3] }
 0x3f7   :  { %1801 = vrcp.f32 %v859_v58  ;;  %v702_v12 = vpop.f32.mrf.mxu2  ;;  %v871_v23 = vand.u32 2147483648, %v859_v58  ;;  %v869_v25 = vand.u32 2147483647, %v859_v58  ;;  %vm865_vm7 = vweird.f32 %v859_v58 }
 0x3f8   :  { %v726_v13 = vadd.f32 %v702_v12, %v2161_v18  ;;  %v706_v32 = vadd.f32 %v702_v12, %v685_v31 }
 0x3f9   :  { %v872_v27 = vor.u32 1.1754944e-38, %v871_v23  ;;  %vm870_vm9 = vcmp.eq.f32.partialorder %v869_v25, 8.507059e+37 }
 0x3fa   :  { %728 = vrot.lane.b32.xlu2 %v726_v13, %s1928_s4  ;;  %v1704_v33 = vmul.f32 -1.442695, %v706_v32 }
 0x3fb   :  { %v878_v29 = vpop.permute.xlu2 %877 }
 0x3fc   :  { %1803 = vpow2.f32 %v1704_v33 }
 0x3fd   :  { %v1802_v14 = vpop.eup %1801 }
 0x3fe   :  { %v861_v19 = vmul.f32 %v1802_v14, %v859_v58  ;;  %vm866_vm6 = vweird.f32 %v1802_v14 }
 0x3ff   :  { %v704_v20 = vpop.f32.mrf.mxu2  ;;  %vm867_vm8 = vmor %vm865_vm7, %vm866_vm6 }
 0x400   :  { %v862_v22 = vsub.f32 1.0, %v861_v19 }
 0x402   :  { %v863_v24 = vmul.f32 %v1802_v14, %v862_v22  ;;  %v1804_v35 = vpop.eup %1803 }
 0x403   :  { %v710_v38 = vadd.f32 1.0, %v1804_v35 }
 0x404   :  { %v864_v26 = vadd.f32 %v1802_v14, %v863_v24 }
 0x405   :  { %1805 = vrcp.f32 %v710_v38  ;;  %v722_v49 = vand.u32 2147483648, %v710_v38  ;;  %vm716_vm11 = vweird.f32 %v710_v38  ;;  %v720_v50 = vand.u32 2147483647, %v710_v38 }
 0x406   :  { %v868_v28 = vsel %vm867_vm8, %v1802_v14, %v864_v26 }
 0x407   :  { %v873_v54 = vsel %vm870_vm9, %v872_v27, %v868_v28  ;;  %v723_v52 = vor.u32 1.1754944e-38, %v722_v49  ;;  %vm721_vm13 = vcmp.eq.f32.partialorder %v720_v50, 8.507059e+37 }
 0x408   :  { %v880_v30 = vmul.f32 %v878_v29, %v873_v54 }
 0x40a   :  { %882 = vrot.lane.b32.xlu0 %v880_v30, %s1926_s9 }
 0x40b   :  { %v1806_v39 = vpop.eup %1805 }
 0x40c   :  { %v712_v15 = vmul.f32 %v1806_v39, %v710_v38  ;;  %vm717_vm10 = vweird.f32 %v1806_v39 }
 0x40d   :  { %vm718_vm12 = vmor %vm716_vm11, %vm717_vm10 }
 0x40e   :  { %v713_v40 = vsub.f32 1.0, %v712_v15 }
 0x410   :  { %v714_v42 = vmul.f32 %v1806_v39, %v713_v40 }
 0x412   :  { %v715_v46 = vadd.f32 %v1806_v39, %v714_v42 }
 0x414   :  { %v719_v51 = vsel %vm718_vm12, %v1806_v39, %v715_v46 }
 0x415   :  { %v724_v56 = vsel %vm721_vm13, %v723_v52, %v719_v51 }
 0x454   :  { %v729_v53 = vpop.permute.xlu2 %728 }
 0x466   :  { %v356_v41 = vpop.permute.xlu1 %355 }
 0x467   :  { %v358_v43 = vadd.f32 %v1798_v59, %v356_v41 }
 0x469   :  { %v2245_v45 = vmul.f32 %v2209_v34, %v358_v43  ;;  %v731_v34 = vmul.f32 %v729_v53, %v724_v56 }
 0x46b   :  { %v613_v47 = vpack.c.bf16 %v2245_v45, %v2245_v45 }
 0x46d   :  { %615 = vrot.lane.b32.xlu1 %v613_v47, %s1929_s7 }
 0x471   :  { %v770_v55 = vpop.f32.mrf.mxu0 }
 0x472   :  { %775 = vrot.lane.b32.xlu2 %v770_v55, %s1930_s25  ;;  %v798_v7 = vadd.f32 %v770_v55, %v2170_v44 }
 0x475   :  { %733 = vrot.lane.b32.xlu1 %v731_v34, %s1926_s9 }
 0x479   :  { %v772_v57 = vpop.f32.mrf.mxu0 }
 0x47c   :  { %v883_v59 = vpop.permute.xlu0 %882 }
 0x47d   :  { %v885_v60 = vadd.f32 %v883_v59, %v2235_v2  ;;  %823 = vperm.xlu1 %1769, %v611_v63  }
 0x47f   :  { %1807 = vtanh.f32 %v885_v60 }
 0x485   :  { %v1808_v61 = vpop.eup %1807 }
 0x486   :  { %v887_v62 = vsub.f32 %v2191_v16, %v1808_v61 }
 0x488   :  { %889 = vrot.lane.b32.xlu0 %v887_v62, %s1929_s7 }
 0x4cc   :  { %v776_v10 = vpop.permute.xlu2 %775 }
 0x4cd   :  { %v778_v12 = vadd.f32 %v776_v10, %v2268_v11 }
 0x4cf   :  { %v1706_v14 = vmul.f32 -1.442695, %v778_v12 }
 0x4df   :  { %v616_v1 = vpop.permute.xlu1 %615 }
 0x4e0   :  { %1701 = vmatmul.msk.bf16.vlgmr.msrb.gmra.mxu1 %vm61_vm1, %v616_v1 }
 0x4e1   :  { %1263 = vmatpush.bf16.msrb.mxu1 %v2116_v37  ;;  %v610_v37 = vld [vmem:[%s2569_s28 + $0x2] sm:$0x3] }
 0x4e7   :  { %v734_v8 = vpop.permute.xlu1 %733 }
 0x4e8   :  { %v736_v3 = vadd.f32 %v734_v8, %v685_v31 }
 0x4ea   :  { %1809 = vtanh.f32 %v736_v3 }
 0x4eb   :  { %1811 = vpow2.f32 %v1706_v14 }
 0x4ef   :  { %v2278_v30 = vpop.permute.xlu1 %823 }
 0x4f0   :  { %v1810_v2 = vpop.eup %1809 }
 0x4f1   :  { %v738_v4 = vsub.f32 %v2213_v36, %v1810_v2  ;;  %v1812_v19 = vpop.eup %1811 }
 0x4f2   :  { %v782_v23 = vadd.f32 1.0, %v1812_v19 }
 0x4f3   :  { %740 = vrot.lane.b32.xlu2 %v738_v4, %s1929_s7 }
 0x4f4   :  { %1813 = vrcp.f32 %v782_v23  ;;  %v794_v39 = vand.u32 2147483648, %v782_v23  ;;  %vm788_vm15 = vweird.f32 %v782_v23  ;;  %v792_v15 = vand.u32 2147483647, %v782_v23 }
 0x4f6   :  { %v795_v42 = vor.u32 1.1754944e-38, %v794_v39  ;;  %vm793_vm3 = vcmp.eq.f32.partialorder %v792_v15, 8.507059e+37  ;;  %v2319_v15 = vld [vmem:[#allocation3 + $0x4] sm:$0x3] }
 0x4fa   :  { %v890_v5 = vpop.permute.xlu0 %889  ;;  %v1814_v25 = vpop.eup %1813 }
 0x4fb   :  { %v892_v6 = vmul.f32 %v890_v5, %v873_v54  ;;  %v784_v26 = vmul.f32 %v1814_v25, %v782_v23  ;;  %vm789_vm14 = vweird.f32 %v1814_v25 }
 0x4fc   :  { %vm790_vm2 = vmor %vm788_vm15, %vm789_vm14 }
 0x4fd   :  { %894 = vrot.lane.b32.xlu0 %v892_v6, %s1924_s30  ;;  %v785_v54 = vsub.f32 1.0, %v784_v26 }
 0x4ff   :  { %v786_v32 = vmul.f32 %v1814_v25, %v785_v54 }
 0x501   :  { %v787_v35 = vadd.f32 %v1814_v25, %v786_v32 }
 0x503   :  { %v791_v40 = vsel %vm790_vm2, %v1814_v25, %v787_v35 }
 0x504   :  { %v796_v43 = vsel %vm793_vm3, %v795_v42, %v791_v40 }
 0x505   :  { %800 = vrot.lane.b32.xlu0 %v798_v7, %s1927_s6 }
 0x50d   :  { %678 = vperm.xlu0 %1768, %v610_v37  }
 0x54d   :  { %v741_v58 = vpop.permute.xlu2 %740 }
 0x54e   :  { %v743_v13 = vmul.f32 %v741_v58, %v724_v56 }
 0x550   :  { %745 = vrot.lane.b32.xlu2 %v743_v13, %s1924_s30 }
 0x55d   :  { %v629_v20 = vpop.f32.mrf.mxu1 }
 0x55e   :  { %v653_v22 = vadd.f32 %v629_v20, %v2200_v21 }
 0x560   :  { %655 = vrot.lane.b32.xlu2 %v653_v22, %s1929_s7 }
 0x565   :  { %v631_v24 = vpop.f32.mrf.mxu1 }
 0x56f   :  { %v895_v27 = vpop.permute.xlu0 %894 }
 0x570   :  { %v2274_v28 = vadd.f32 %v1808_v61, %v895_v27 }
 0x572   :  { %v899_v29 = vsub.f32 %v2274_v28, %v2191_v16 }
 0x574   :  { %v900_v31 = vmul.f32 %v899_v29, %v2278_v30 }
 0x576   :  { %v2282_v33 = vadd.f32 %v900_v31, %v2191_v16  ;;  %v612_v16 = vld [vmem:[#allocation2 + $0x2] sm:$0x3] }
 0x577   :  { %v801_v41 = vpop.permute.xlu0 %800  ;;  %v633_v47 = vadd.f32 %v629_v20, %v612_v16 }
 0x578   :  { %v1149_v38 = vpack.c.bf16 %v2282_v33, %v2282_v33  ;;  %v803_v46 = vmul.f32 %v801_v41, %v796_v43 }
 0x579   :  { %v1702_v49 = vmul.f32 -1.442695, %v633_v47 }
 0x57a   :  { %1151 = vrot.lane.b32.xlu1 %v1149_v38, %s1925_s1 }
 0x57b   :  { %1815 = vpow2.f32 %v1702_v49 }
 0x57f   :  { %v2292_v59 = vpop.permute.xlu0 %678 }
 0x581   :  { %v1816_v50 = vpop.eup %1815 }
 0x582   :  { %805 = vrot.lane.b32.xlu1 %v803_v46, %s1924_s30  ;;  %v637_v51 = vadd.f32 1.0, %v1816_v50 }
 0x584   :  { %1817 = vrcp.f32 %v637_v51  ;;  %v649_v8 = vand.u32 2147483648, %v637_v51  ;;  %vm643_vm5 = vweird.f32 %v637_v51  ;;  %v647_v3 = vand.u32 2147483647, %v637_v51 }
 0x586   :  { %v650_v4 = vor.u32 1.1754944e-38, %v649_v8  ;;  %vm648_vm7 = vcmp.eq.f32.partialorder %v647_v3, 8.507059e+37 }
 0x58a   :  { %v1818_v52 = vpop.eup %1817 }
 0x58b   :  { %v639_v53 = vmul.f32 %v1818_v52, %v637_v51  ;;  %vm644_vm4 = vweird.f32 %v1818_v52 }
 0x58c   :  { %vm645_vm6 = vmor %vm643_vm5, %vm644_vm4 }
 0x58d   :  { %v640_v34 = vsub.f32 1.0, %v639_v53 }
 0x58f   :  { %v641_v61 = vmul.f32 %v1818_v52, %v640_v34 }
 0x591   :  { %v642_v1 = vadd.f32 %v1818_v52, %v641_v61 }
 0x5aa   :  { %v746_v55 = vpop.permute.xlu2 %745 }
 0x5ab   :  { %v2288_v56 = vadd.f32 %v1810_v2, %v746_v55  ;;  %v646_v2 = vsel %vm645_vm6, %v1818_v52, %v642_v1 }
 0x5ac   :  { %v651_v5 = vsel %vm648_vm7, %v650_v4, %v646_v2 }
 0x5ad   :  { %v750_v57 = vsub.f32 %v2288_v56, %v2213_v36 }
 0x5af   :  { %v751_v60 = vmul.f32 %v750_v57, %v2292_v59 }
 0x5b1   :  { %v2296_v62 = vadd.f32 %v751_v60, %v2213_v36 }
 0x5b3   :  { %v1004_v63 = vpack.c.bf16 %v2296_v62, %v2296_v62 }
 0x5b5   :  { %1006 = vrot.lane.b32.xlu0 %v1004_v63, %s1928_s4 }
 0x5ba   :  { %v656_v6 = vpop.permute.xlu2 %655 }
 0x5bb   :  { %v658_v7 = vmul.f32 %v656_v6, %v651_v5 }
 0x5bd   :  { %660 = vrot.lane.b32.xlu2 %v658_v7, %s1924_s30 }
 0x5ec   :  { %v1152_v36 = vpop.permute.xlu1 %1151 }
 0x5ed   :  { %1715 = vmatmul.msk.bf16.vlgmr.msra.gmra.mxu3 %vm373_vm0, %v1152_v36  ;;  %v1148_v36 = vld [vmem:[#allocation3 + $0x2] sm:$0x3] }
 0x5f4   :  { %v806_v37 = vpop.permute.xlu1 %805 }
 0x5f5   :  { %v808_v10 = vadd.f32 %v806_v37, %v2268_v11 }
 0x5f7   :  { %1819 = vtanh.f32 %v808_v10 }
 0x5fd   :  { %v1820_v58 = vpop.eup %1819 }
 0x5fe   :  { %v810_v12 = vsub.f32 %v2228_v0, %v1820_v58 }
 0x600   :  { %812 = vrot.lane.b32.xlu1 %v810_v12, %s1931_s0 }
 0x617   :  { %v661_v13 = vpop.permute.xlu2 %660 }
 0x618   :  { %v663_v14 = vadd.f32 %v661_v13, %v612_v16 }
 0x61a   :  { %1821 = vtanh.f32 %v663_v14 }
 0x620   :  { %v1822_v19 = vpop.eup %1821 }
 0x621   :  { %v665_v20 = vsub.f32 %v2245_v45, %v1822_v19 }
 0x623   :  { %667 = vrot.lane.b32.xlu1 %v665_v20, %s1931_s0 }
 0x627   :  { %v1007_v22 = vpop.permute.xlu0 %1006 }
 0x628   :  { %1711 = vmatmul.msk.bf16.vlgmr.msra.gmra.mxu2 %vm373_vm0, %v1007_v22 }
 0x670   :  { %v1165_v23 = vpop.f32.mrf.mxu3 }
 0x671   :  { %1170 = vrot.lane.b32.xlu1 %v1165_v23, %s1925_s1  ;;  %v1193_v46 = vadd.f32 %v1165_v23, %v2130_v48 }
 0x672   :  { %v813_v11 = vpop.permute.xlu1 %812 }
 0x673   :  { %v815_v24 = vmul.f32 %v813_v11, %v796_v43 }
 0x675   :  { %817 = vrot.lane.b32.xlu0 %v815_v24, %s1927_s6 }
 0x678   :  { %v1167_v25 = vpop.f32.mrf.mxu3 }
 0x695   :  { %v668_v26 = vpop.permute.xlu1 %667 }
 0x696   :  { %v670_v27 = vmul.f32 %v668_v26, %v651_v5 }
 0x698   :  { %672 = vrot.lane.b32.xlu0 %v670_v27, %s1927_s6 }
 0x6ab   :  { %v1020_v54 = vpop.f32.mrf.mxu2 }
 0x6ac   :  { %v1044_v29 = vadd.f32 %v1020_v54, %v2161_v18  ;;  %v1024_v41 = vadd.f32 %v1020_v54, %v2319_v15 }
 0x6ae   :  { %1046 = vrot.lane.b32.xlu1 %v1044_v29, %s1928_s4  ;;  %v1712_v43 = vmul.f32 -1.442695, %v1024_v41 }
 0x6b0   :  { %1823 = vpow2.f32 %v1712_v43  ;;  %v928_v43 = vld [vmem:[%s2569_s28 + $0x4] sm:$0x3] }
 0x6b3   :  { %v1022_v31 = vpop.f32.mrf.mxu2 }
 0x6b6   :  { %v1824_v16 = vpop.eup %1823 }
 0x6b7   :  { %v1028_v47 = vadd.f32 1.0, %v1824_v16 }
 0x6b9   :  { %1825 = vrcp.f32 %v1028_v47  ;;  %v1040_v8 = vand.u32 2147483648, %v1028_v47  ;;  %vm1034_vm9 = vweird.f32 %v1028_v47  ;;  %v1038_v3 = vand.u32 2147483647, %v1028_v47 }
 0x6bb   :  { %v1041_v4 = vor.u32 1.1754944e-38, %v1040_v8  ;;  %vm1039_vm11 = vcmp.eq.f32.partialorder %v1038_v3, 8.507059e+37  ;;  %v2366_v8 = vld [vmem:[#allocation2 + $0x2] sm:$0x3] }
 0x6bf   :  { %v1826_v49 = vpop.eup %1825 }
 0x6c0   :  { %v1030_v53 = vmul.f32 %v1826_v49, %v1028_v47  ;;  %vm1035_vm8 = vweird.f32 %v1826_v49 }
 0x6c1   :  { %vm1036_vm10 = vmor %vm1034_vm9, %vm1035_vm8 }
 0x6c2   :  { %v1031_v57 = vsub.f32 1.0, %v1030_v53 }
 0x6c4   :  { %v1032_v61 = vmul.f32 %v1826_v49, %v1031_v57 }
 0x6c6   :  { %v1033_v1 = vadd.f32 %v1826_v49, %v1032_v61 }
 0x6c8   :  { %v1037_v2 = vsel %vm1036_vm10, %v1826_v49, %v1033_v1 }
 0x6c9   :  { %v1042_v5 = vsel %vm1039_vm11, %v1041_v4, %v1037_v2 }
 0x6e3   :  { %v1171_v63 = vpop.permute.xlu1 %1170 }
 0x6e4   :  { %v1173_v37 = vadd.f32 %v1171_v63, %v1148_v36 }
 0x6e6   :  { %v1716_v10 = vmul.f32 -1.442695, %v1173_v37 }
 0x6e7   :  { %v818_v32 = vpop.permute.xlu0 %817 }
 0x6e8   :  { %v2314_v35 = vadd.f32 %v1820_v58, %v818_v32  ;;  %1827 = vpow2.f32 %v1716_v10 }
 0x6ea   :  { %v827_v38 = vsub.f32 %v2314_v35, %v2228_v0 }
 0x6ec   :  { %v828_v39 = vmul.f32 %v827_v38, %v2278_v30 }
 0x6ee   :  { %v2322_v40 = vadd.f32 %v828_v39, %v2228_v0  ;;  %v1828_v58 = vpop.eup %1827 }
 0x6ef   :  { %v1177_v12 = vadd.f32 1.0, %v1828_v58 }
 0x6f0   :  { %v1072_v42 = vpack.c.bf16 %v2322_v40, %v2322_v40 }
 0x6f1   :  { %1829 = vrcp.f32 %v1177_v12  ;;  %v1189_v11 = vand.u32 2147483648, %v1177_v12  ;;  %vm1183_vm13 = vweird.f32 %v1177_v12  ;;  %v1187_v24 = vand.u32 2147483647, %v1177_v12 }
 0x6f2   :  { %1074 = vrot.lane.b32.xlu2 %v1072_v42, %s1932_s2  ;;  %v929_v42 = vld [vmem:[%s2569_s28 + $0x2] sm:$0x3] }
 0x6f3   :  { %v1190_v26 = vor.u32 1.1754944e-38, %v1189_v11  ;;  %vm1188_vm15 = vcmp.eq.f32.partialorder %v1187_v24, 8.507059e+37  ;;  %v930_v11 = vld [vmem:[#allocation2 + $0x4] sm:$0x3] }
 0x6f7   :  { %v1830_v13 = vpop.eup %1829 }
 0x6f8   :  { %v1179_v14 = vmul.f32 %v1830_v13, %v1177_v12  ;;  %vm1184_vm12 = vweird.f32 %v1830_v13 }
 0x6f9   :  { %vm1185_vm14 = vmor %vm1183_vm13, %vm1184_vm12 }
 0x6fa   :  { %1195 = vrot.lane.b32.xlu2 %v1193_v46, %s1924_s30 }
 0x70a   :  { %v673_v50 = vpop.permute.xlu0 %672 }
 0x70b   :  { %v2330_v51 = vadd.f32 %v1822_v19, %v673_v50  ;;  %v1180_v19 = vsub.f32 1.0, %v1179_v14 }
 0x70d   :  { %v682_v52 = vsub.f32 %v2330_v51, %v2245_v45  ;;  %v1181_v20 = vmul.f32 %v1830_v13, %v1180_v19 }
 0x70f   :  { %v683_v55 = vmul.f32 %v682_v52, %v2292_v59  ;;  %v1182_v23 = vadd.f32 %v1830_v13, %v1181_v20 }
 0x711   :  { %v2336_v34 = vadd.f32 %v683_v55, %v2245_v45  ;;  %v1186_v25 = vsel %vm1185_vm14, %v1830_v13, %v1182_v23 }
 0x712   :  { %v1191_v27 = vsel %vm1188_vm15, %v1190_v26, %v1186_v25 }
 0x713   :  { %v931_v60 = vpack.c.bf16 %v2336_v34, %v2336_v34 }
 0x715   :  { %933 = vrot.lane.b32.xlu0 %v931_v60, %s1929_s7 }
 0x720   :  { %v1047_v6 = vpop.permute.xlu1 %1046 }
 0x721   :  { %v1049_v7 = vmul.f32 %v1047_v6, %v1042_v5 }
 0x723   :  { %1051 = vrot.lane.b32.xlu0 %v1049_v7, %s1926_s9 }
 0x74c   :  { %v1075_v22 = vpop.permute.xlu2 %1074 }
 0x74d   :  { %1713 = vmatmul.msk.bf16.vlgmr.msra.gmra.mxu0 %vm61_vm1, %v1075_v22 }
 0x754   :  { %v1196_v54 = vpop.permute.xlu2 %1195 }
 0x755   :  { %v1198_v29 = vmul.f32 %v1196_v54, %v1191_v27 }
 0x757   :  { %1200 = vrot.lane.b32.xlu2 %v1198_v29, %s1926_s9 }
 0x787   :  { %v934_v31 = vpop.permute.xlu0 %933 }
 0x788   :  { %1709 = vmatmul.msk.bf16.vlgmr.msra.gmra.mxu1 %vm61_vm1, %v934_v31 }
 0x795   :  { %v1052_v32 = vpop.permute.xlu0 %1051 }
 0x796   :  { %v1054_v38 = vadd.f32 %v1052_v32, %v2319_v15 }
 0x798   :  { %1831 = vtanh.f32 %v1054_v38 }
 0x79e   :  { %v2346_v39 = vpop.eup %1831 }
 0x79f   :  { %v1056_v41 = vsub.f32 %v2296_v62, %v2346_v39 }
 0x7a1   :  { %1058 = vrot.lane.b32.xlu2 %v1056_v41, %s1929_s7 }
 0x7a9   :  { %1141 = vperm.xlu2 %1767, %v929_v42  }
 0x7b1   :  { %996 = vperm.xlu2 %1767, %v928_v43   ;;  %v1201_v46 = vpop.permute.xlu2 %1200 }
 0x7b2   :  { %v1203_v15 = vadd.f32 %v1201_v46, %v1148_v36 }
 0x7b4   :  { %1833 = vtanh.f32 %v1203_v15 }
 0x7ba   :  { %v1834_v16 = vpop.eup %1833 }
 0x7bb   :  { %v1205_v47 = vsub.f32 %v2282_v33, %v1834_v16 }
 0x7bd   :  { %1207 = vrot.lane.b32.xlu1 %v1205_v47, %s1929_s7 }
 0x7ca   :  { %v1088_v49 = vpop.f32.mrf.mxu0 }
 0x7cb   :  { %1093 = vrot.lane.b32.xlu0 %v1088_v49, %s1930_s25  ;;  %v1116_v50 = vadd.f32 %v1088_v49, %v2170_v44 }
 0x7d2   :  { %v1090_v52 = vpop.f32.mrf.mxu0 }
 0x7d3   :  { %1118 = vrot.lane.b32.xlu0 %v1116_v50, %s1927_s6 }
 0x7fb   :  { %v1059_v63 = vpop.permute.xlu2 %1058 }
 0x7fc   :  { %v1061_v1 = vmul.f32 %v1059_v63, %v1042_v5 }
 0x803   :  { %v2372_v41 = vpop.permute.xlu2 %1141 }
 0x805   :  { %v947_v53 = vpop.f32.mrf.mxu1 }
 0x806   :  { %v971_v55 = vadd.f32 %v947_v53, %v2200_v21  ;;  %v951_v24 = vadd.f32 %v947_v53, %v930_v11 }
 0x808   :  { %973 = vrot.lane.b32.xlu0 %v971_v55, %s1929_s7  ;;  %v1710_v25 = vmul.f32 -1.442695, %v951_v24 }
 0x80d   :  { %v949_v57 = vpop.f32.mrf.mxu1 }
 0x80e   :  { %v2388_v57 = vpop.permute.xlu2 %996 }
 0x82f   :  { %v1208_v60 = vpop.permute.xlu1 %1207 }
 0x830   :  { %v1210_v61 = vmul.f32 %v1208_v60, %v1191_v27 }
 0x832   :  { %1212 = vrot.lane.b32.xlu1 %v1210_v61, %s1924_s30 }
 0x83a   :  { %1063 = vrot.lane.b32.xlu1 %v1061_v1, %s1924_s30 }
 0x83d   :  { %v1094_v3 = vpop.permute.xlu0 %1093 }
 0x83e   :  { %v1096_v2 = vadd.f32 %v1094_v3, %v2366_v8 }
 0x840   :  { %v1714_v4 = vmul.f32 -1.442695, %v1096_v2 }
 0x842   :  { %1835 = vpow2.f32 %v1714_v4 }
 0x845   :  { %v1119_v22 = vpop.permute.xlu0 %1118 }
 0x848   :  { %v1836_v6 = vpop.eup %1835 }
 0x849   :  { %v1100_v7 = vadd.f32 1.0, %v1836_v6 }
 0x84b   :  { %1837 = vrcp.f32 %v1100_v7  ;;  %v1112_v58 = vand.u32 2147483648, %v1100_v7  ;;  %v1110_v13 = vand.u32 2147483647, %v1100_v7  ;;  %vm1106_vm3 = vweird.f32 %v1100_v7 }
 0x84c   :  { %1839 = vpow2.f32 %v1710_v25 }
 0x84d   :  { %v1113_v14 = vor.u32 1.1754944e-38, %v1112_v58  ;;  %vm1111_vm5 = vcmp.eq.f32.partialorder %v1110_v13, 8.507059e+37 }
 0x851   :  { %v1838_v36 = vpop.eup %1837 }
 0x852   :  { %v1102_v37 = vmul.f32 %v1838_v36, %v1100_v7  ;;  %vm1107_vm2 = vweird.f32 %v1838_v36  ;;  %v1840_v26 = vpop.eup %1839 }
 0x853   :  { %vm1108_vm4 = vmor %vm1106_vm3, %vm1107_vm2  ;;  %v955_v27 = vadd.f32 1.0, %v1840_v26 }
 0x854   :  { %v1103_v10 = vsub.f32 1.0, %v1102_v37 }
 0x855   :  { %1841 = vrcp.f32 %v955_v27  ;;  %v967_v52 = vand.u32 2147483648, %v955_v27  ;;  %vm961_vm7 = vweird.f32 %v955_v27  ;;  %v965_v53 = vand.u32 2147483647, %v955_v27 }
 0x856   :  { %v1104_v12 = vmul.f32 %v1838_v36, %v1103_v10 }
 0x857   :  { %v968_v61 = vor.u32 1.1754944e-38, %v967_v52  ;;  %vm966_vm9 = vcmp.eq.f32.partialorder %v965_v53, 8.507059e+37 }
 0x858   :  { %v1105_v5 = vadd.f32 %v1838_v36, %v1104_v12 }
 0x85a   :  { %v1109_v19 = vsel %vm1108_vm4, %v1838_v36, %v1105_v5 }
 0x85b   :  { %v1114_v20 = vsel %vm1111_vm5, %v1113_v14, %v1109_v19  ;;  %v1842_v54 = vpop.eup %1841 }
 0x85c   :  { %v1121_v23 = vmul.f32 %v1119_v22, %v1114_v20  ;;  %v957_v29 = vmul.f32 %v1842_v54, %v955_v27  ;;  %vm962_vm6 = vweird.f32 %v1842_v54 }
 0x85d   :  { %vm963_vm8 = vmor %vm961_vm7, %vm962_vm6  ;;  %vm608_vm6 = vcmask 257155   ;;  %vm600_vm7 = vcmask 122880  }
 0x85e   :  { %1123 = vrot.lane.b32.xlu2 %v1121_v23, %s1924_s30  ;;  %v958_v32 = vsub.f32 1.0, %v957_v29 }
 0x860   :  { %v959_v43 = vmul.f32 %v1842_v54, %v958_v32  ;;  %v1318_v32 = vld [vmem:[#allocation3 + $0x6] sm:$0x3] }
 0x862   :  { %v960_v49 = vadd.f32 %v1842_v54, %v959_v43 }
 0x8a4   :  { %v1213_v31 = vpop.permute.xlu1 %1212 }
 0x8a5   :  { %v2370_v38 = vadd.f32 %v1834_v16, %v1213_v31 }
 0x8a7   :  { %v1217_v42 = vsub.f32 %v2370_v38, %v2282_v33 }
 0x8a9   :  { %v1218_v46 = vmul.f32 %v1217_v42, %v2372_v41 }
 0x8ab   :  { %v2378_v15 = vadd.f32 %v1218_v46, %v2282_v33  ;;  %v964_v33 = vsel %vm963_vm8, %v1842_v54, %v960_v49 }
 0x8ac   :  { %v1064_v47 = vpop.permute.xlu1 %1063  ;;  %v969_v1 = vsel %vm966_vm9, %v968_v61, %v964_v33  ;;  %vm926_vm9 = vcmask 256130  }
 0x8ad   :  { %v2381_v50 = vadd.f32 %v2346_v39, %v1064_v47  ;;  %v1458_v16 = vpack.c.bf16 %v2378_v15, %v2378_v15  ;;  %v974_v39 = vpop.permute.xlu0 %973 }
 0x8ae   :  { %v976_v3 = vmul.f32 %v974_v39, %v969_v1 }
 0x8af   :  { %v1068_v55 = vsub.f32 %v2381_v50, %v2296_v62  ;;  %1460 = vrot.lane.b32.xlu1 %v1458_v16, %s1925_s1 }
 0x8b1   :  { %v1069_v60 = vmul.f32 %v1068_v55, %v2388_v57 }
 0x8b3   :  { %v2392_v63 = vadd.f32 %v1069_v60, %v2296_v62 }
 0x8b5   :  { %v1319_v2 = vpack.c.bf16 %v2392_v63, %v2392_v63 }
 0x8b7   :  { %978 = vrot.lane.b32.xlu1 %v976_v3, %s1924_s30  ;;  %1321 = vrot.lane.b32.xlu0 %v1319_v2, %s1928_s4 }
 0x8b8   :  { %v1124_v4 = vpop.permute.xlu2 %1123 }
 0x8b9   :  { %v1126_v6 = vadd.f32 %v1124_v4, %v2366_v8 }
 0x8bb   :  { %1843 = vtanh.f32 %v1126_v6 }
 0x8c1   :  { %v1844_v7 = vpop.eup %1843 }
 0x8c2   :  { %v1128_v36 = vsub.f32 %v2322_v40, %v1844_v7 }
 0x8c4   :  { %1130 = vrot.lane.b32.xlu2 %v1128_v36, %s1931_s0 }
 0x91e   :  { %v1131_v62 = vpop.permute.xlu2 %1130 }
 0x91f   :  { %v1133_v37 = vmul.f32 %v1131_v62, %v1114_v20 }
 0x921   :  { %v1461_v10 = vpop.permute.xlu1 %1460  ;;  %1135 = vrot.lane.b32.xlu1 %v1133_v37, %s1927_s6 }
 0x922   :  { %1723 = vmatmul.msk.bf16.vlgmr.msrb.gmra.mxu3 %vm373_vm0, %v1461_v10 }
 0x929   :  { %v979_v58 = vpop.permute.xlu1 %978  ;;  %v1322_v12 = vpop.permute.xlu0 %1321 }
 0x92a   :  { %v981_v13 = vadd.f32 %v979_v58, %v930_v11  ;;  %1719 = vmatmul.msk.bf16.vlgmr.msrb.gmra.mxu2 %vm373_vm0, %v1322_v12 }
 0x92c   :  { %1845 = vtanh.f32 %v981_v13 }
 0x932   :  { %v1846_v8 = vpop.eup %1845 }
 0x933   :  { %v983_v5 = vsub.f32 %v2336_v34, %v1846_v8 }
 0x935   :  { %985 = vrot.lane.b32.xlu0 %v983_v5, %s1931_s0 }
 0x993   :  { %v1136_v14 = vpop.permute.xlu1 %1135 }
 0x994   :  { %v2406_v19 = vadd.f32 %v1844_v7, %v1136_v14 }
 0x996   :  { %v1145_v20 = vsub.f32 %v2406_v19, %v2322_v40 }
 0x998   :  { %v1146_v22 = vmul.f32 %v1145_v20, %v2372_v41 }
 0x99a   :  { %v2412_v23 = vadd.f32 %v1146_v22, %v2322_v40 }
 0x99c   :  { %v1384_v11 = vpack.c.bf16 %v2412_v23, %v2412_v23 }
 0x99e   :  { %1386 = vrot.lane.b32.xlu0 %v1384_v11, %s1932_s2  ;;  %s1598_s2 = sshll.u32 %s2565_s15, 4  ;;  %s1599_s2 = int_to_ptr.hbm [resolvable:$true] %s1598_s2 }
 0x9a5   :  { %v1474_v24 = vpop.f32.mrf.mxu3 }
 0x9a6   :  { %1479 = vrot.lane.b32.xlu1 %v1474_v24, %s1925_s1  ;;  %v1502_v27 = vadd.f32 %v1474_v24, %v2130_v48 }
 0x9a7   :  { %v986_v25 = vpop.permute.xlu0 %985 }
 0x9a8   :  { %v988_v26 = vmul.f32 %v986_v25, %v969_v1  ;;  %v1457_v1 = vld [vmem:[#allocation3] sm:$0x3] }
 0x9aa   :  { %990 = vrot.lane.b32.xlu2 %v988_v26, %s1927_s6 }
 0x9ad   :  { %v1335_v54 = vpop.f32.mrf.mxu2  ;;  %v1476_v29 = vpop.f32.mrf.mxu3 }
 0x9ae   :  { %v1359_v31 = vadd.f32 %v1335_v54, %v2161_v18  ;;  %1504 = vrot.lane.b32.xlu1 %v1502_v27, %s1924_s30  ;;  %v1339_v42 = vadd.f32 %v1335_v54, %v1318_v32 }
 0x9b0   :  { %1361 = vrot.lane.b32.xlu0 %v1359_v31, %s1928_s4  ;;  %v1720_v43 = vmul.f32 -1.442695, %v1339_v42 }
 0x9b2   :  { %1847 = vpow2.f32 %v1720_v43 }
 0x9b5   :  { %v1337_v40 = vpop.f32.mrf.mxu2 }
 0x9b8   :  { %v1848_v46 = vpop.eup %1847 }
 0x9b9   :  { %v1343_v47 = vadd.f32 1.0, %v1848_v46 }
 0x9bb   :  { %1849 = vrcp.f32 %v1343_v47  ;;  %vm1349_vm10 = vweird.f32 %v1343_v47  ;;  %v1353_v7 = vand.u32 2147483647, %v1343_v47 }
 0x9bd   :  { %vm1354_vm12 = vcmp.eq.f32.partialorder %v1353_v7, 8.507059e+37 }
 0x9c1   :  { %v1850_v53 = vpop.eup %1849 }
 0x9c2   :  { %v1345_v33 = vmul.f32 %v1850_v53, %v1343_v47  ;;  %vm1350_vm0 = vweird.f32 %v1850_v53 }
 0x9c3   :  { %vm1351_vm11 = vmor %vm1349_vm10, %vm1350_vm0  ;;  %vm1236_vm0 = vcmask 124930  }
 0x9c4   :  { %v1346_v61 = vsub.f32 1.0, %v1345_v33 }
 0x9c6   :  { %v1347_v39 = vmul.f32 %v1850_v53, %v1346_v61  ;;  %v1067_v61 = vmul.f32 %v2381_v50, %v2388_v57  ;;  %v898_v50 = vmul.f32 %v2274_v28, %v2278_v30 }
 0x9c8   :  { %v1348_v6 = vadd.f32 %v1850_v53, %v1347_v39  ;;  %v604_v39 = vrot.slane %v2195_v17, 5 }
 0x9ca   :  { %v1352_v36 = vsel %vm1351_vm11, %v1850_v53, %v1348_v6 }
 0xa04   :  { %v991_v49 = vpop.permute.xlu2 %990 }
 0xa05   :  { %v2423_v16 = vadd.f32 %v1846_v8, %v991_v49 }
 0xa07   :  { %v1000_v48 = vsub.f32 %v2423_v16, %v2336_v34 }
 0xa09   :  { %v1001_v18 = vmul.f32 %v1000_v48, %v2388_v57 }
 0xa0b   :  { %v2429_v52 = vadd.f32 %v1001_v18, %v2336_v34  ;;  %v1355_v34 = vand.u32 2147483648, %v1343_v47 }
 0xa0d   :  { %v1249_v55 = vpack.c.bf16 %v2429_v52, %v2429_v52  ;;  %v1356_v62 = vor.u32 1.1754944e-38, %v1355_v34  ;;  %v920_v34 = vpack.c.bf16 %v898_v50, %v898_v50 }
 0xa0f   :  { %1251 = vrot.lane.b32.xlu2 %v1249_v55, %s1929_s7  ;;  %v1357_v37 = vsel %vm1354_vm12, %v1356_v62, %v1352_v36  ;;  %v922_v36 = vrot.slane %v920_v34, 6 }
 0xa10   :  { %v1387_v60 = vpop.permute.xlu0 %1386 }
 0xa11   :  { %1721 = vmatmul.msk.bf16.vlgmr.msrb.gmra.mxu0 %vm61_vm1, %v1387_v60 }
 0xa18   :  { %v1480_v3 = vpop.permute.xlu1 %1479 }
 0xa19   :  { %v1482_v2 = vadd.f32 %v1480_v3, %v1457_v1 }
 0xa1b   :  { %v1724_v4 = vmul.f32 -1.442695, %v1482_v2 }
 0xa1d   :  { %1851 = vpow2.f32 %v1724_v4  ;;  %v2467_v4 = vld [vmem:[#allocation2 + $0x6] sm:$0x3] }
 0xa20   :  { %v1505_v54 = vpop.permute.xlu1 %1504 }
 0xa22   :  { %v1362_v10 = vpop.permute.xlu0 %1361 }
 0xa23   :  { %v1852_v58 = vpop.eup %1851  ;;  %v1364_v12 = vmul.f32 %v1362_v10, %v1357_v37 }
 0xa24   :  { %v1486_v13 = vadd.f32 1.0, %v1852_v58 }
 0xa25   :  { %1366 = vrot.lane.b32.xlu2 %v1364_v12, %s1926_s9  ;;  %v1216_v12 = vmul.f32 %v2370_v38, %v2372_v41 }
 0xa26   :  { %1853 = vrcp.f32 %v1486_v13  ;;  %v1498_v20 = vand.u32 2147483648, %v1486_v13  ;;  %v1496_v11 = vand.u32 2147483647, %v1486_v13  ;;  %vm1492_vm14 = vweird.f32 %v1486_v13 }
 0xa28   :  { %v1499_v25 = vor.u32 1.1754944e-38, %v1498_v20  ;;  %vm1497_vm2 = vcmp.eq.f32.partialorder %v1496_v11, 8.507059e+37 }
 0xa2c   :  { %v1854_v8 = vpop.eup %1853 }
 0xa2d   :  { %v1488_v5 = vmul.f32 %v1854_v8, %v1486_v13  ;;  %vm1493_vm13 = vweird.f32 %v1854_v8 }
 0xa2e   :  { %vm1494_vm15 = vmor %vm1492_vm14, %vm1493_vm13  ;;  %vm918_vm13 = vcmask 123905   ;;  %vm1244_vm14 = vcmask 255105  }
 0xa2f   :  { %v1489_v14 = vsub.f32 1.0, %v1488_v5 }
 0xa31   :  { %v1490_v22 = vmul.f32 %v1854_v8, %v1489_v14 }
 0xa33   :  { %v1491_v24 = vadd.f32 %v1854_v8, %v1490_v22 }
 0xa35   :  { %v1495_v26 = vsel %vm1494_vm15, %v1854_v8, %v1491_v24  ;;  %v1238_v8 = vpack.c.bf16 %v1216_v12, %v1216_v12  ;;  %vm1549_vm15 = vcmask 254080  }
 0xa36   :  { %v1500_v27 = vsel %vm1497_vm2, %v1499_v25, %v1495_v26  ;;  %vm1542_vm2 = vcmask 125955  }
 0xa37   :  { %v1507_v29 = vmul.f32 %v1505_v54, %v1500_v27  ;;  %v1240_v5 = vrot.slane %v1238_v8, 7 }
 0xa39   :  { %1509 = vrot.lane.b32.xlu0 %v1507_v29, %s1926_s9 }
 0xa69   :  { %v1252_v31 = vpop.permute.xlu2 %1251 }
 0xa6a   :  { %1717 = vmatmul.msk.bf16.vlgmr.msrb.gmra.mxu1 %vm61_vm1, %v1252_v31 }
 0xa7f   :  { %v1367_v40 = vpop.permute.xlu2 %1366 }
 0xa80   :  { %v1369_v42 = vadd.f32 %v1367_v40, %v1318_v32 }
 0xa82   :  { %1855 = vtanh.f32 %v1369_v42  ;;  %v2486_v42 = vld [vmem:[#allocation2] sm:$0x3] }
 0xa88   :  { %v2438_v43 = vpop.eup %1855 }
 0xa89   :  { %v1371_v46 = vsub.f32 %v2392_v63, %v2438_v43  ;;  %v1246_v63 = vld [vmem:[%s2569_s28 + $0x6] sm:$0x3] }
 0xa8b   :  { %1373 = vrot.lane.b32.xlu1 %v1371_v46, %s1929_s7 }
 0xa8e   :  { %v1400_v47 = vpop.f32.mrf.mxu0 }
 0xa8f   :  { %1405 = vrot.lane.b32.xlu0 %v1400_v47, %s1930_s25  ;;  %v1428_v28 = vadd.f32 %v1400_v47, %v2170_v44 }
 0xa96   :  { %v1402_v49 = vpop.f32.mrf.mxu0 }
 0xaab   :  { %v1510_v48 = vpop.permute.xlu0 %1509 }
 0xaac   :  { %v1512_v18 = vadd.f32 %v1510_v48, %v1457_v1 }
 0xaae   :  { %1857 = vtanh.f32 %v1512_v18 }
 0xab4   :  { %v2444_v53 = vpop.eup %1857 }
 0xab5   :  { %v1514_v32 = vsub.f32 %v2378_v15, %v2444_v53  ;;  %v1230_v15 = vpack.c.bf16 %v1067_v61, %v1067_v61 }
 0xab7   :  { %1516 = vrot.lane.b32.xlu2 %v1514_v32, %s1929_s7  ;;  %v1232_v1 = vrot.slane %v1230_v15, 6 }
 0xabf   :  { %1314 = vperm.xlu2 %1767, %v1246_v63  }
 0xae7   :  { %v1265_v55 = vpop.f32.mrf.mxu1 }
 0xae8   :  { %v1289_v33 = vadd.f32 %v1265_v55, %v2200_v21  ;;  %v1247_v21 = vld [vmem:[%s2569_s28] sm:$0x3]  ;;  %v1269_v7 = vadd.f32 %v1265_v55, %v2467_v4 }
 0xaea   :  { %1291 = vrot.lane.b32.xlu2 %v1289_v33, %s1929_s7  ;;  %v1718_v62 = vmul.f32 -1.442695, %v1269_v7 }
 0xaec   :  { %1859 = vpow2.f32 %v1718_v62 }
 0xaef   :  { %v1267_v60 = vpop.f32.mrf.mxu1 }
 0xaf2   :  { %605 = vrot.lane.b32.xlu2 %v604_v39, %s1933_s10  ;;  %v1860_v10 = vpop.eup %1859 }
 0xaf3   :  { %v1273_v13 = vadd.f32 1.0, %v1860_v10 }
 0xaf5   :  { %1861 = vrcp.f32 %v1273_v13  ;;  %v1285_v24 = vand.u32 2147483648, %v1273_v13  ;;  %vm1279_vm3 = vweird.f32 %v1273_v13  ;;  %v1283_v25 = vand.u32 2147483647, %v1273_v13 }
 0xaf7   :  { %v1286_v26 = vor.u32 1.1754944e-38, %v1285_v24  ;;  %vm1284_vm5 = vcmp.eq.f32.partialorder %v1283_v25, 8.507059e+37 }
 0xafa   :  { %1233 = vrot.lane.b32.xlu2 %v1232_v1, %s1928_s4 }
 0xafd   :  { %v1374_v3 = vpop.permute.xlu1 %1373 }
 0xafe   :  { %v1376_v2 = vmul.f32 %v1374_v3, %v1357_v37  ;;  %v749_v37 = vmul.f32 %v2288_v56, %v2292_v59  ;;  %v1862_v56 = vpop.eup %1861 }
 0xaff   :  { %v1275_v14 = vmul.f32 %v1862_v56, %v1273_v13  ;;  %vm1280_vm1 = vweird.f32 %v1862_v56 }
 0xb00   :  { %1378 = vrot.lane.b32.xlu1 %v1376_v2, %s1924_s30  ;;  %vm1281_vm4 = vmor %vm1279_vm3, %vm1280_vm1  ;;  %vm1572_vm1 = vcmask 261120   ;;  %vm1589_vm3 = vcmask 80896  }
 0xb01   :  { %v1276_v44 = vsub.f32 1.0, %v1275_v14  ;;  %v1406_v40 = vpop.permute.xlu0 %1405  ;;  %v1752_v14 = vld [vmem:[%s2563_s13] sm:$0xff] }
 0xb02   :  { %v1408_v46 = vadd.f32 %v1406_v40, %v2486_v42  ;;  %v1144_v40 = vmul.f32 %v2372_v41, %v2406_v19 }
 0xb03   :  { %v1277_v20 = vmul.f32 %v1862_v56, %v1276_v44 }
 0xb04   :  { %v1722_v47 = vmul.f32 -1.442695, %v1408_v46 }
 0xb05   :  { %v1278_v11 = vadd.f32 %v1862_v56, %v1277_v20 }
 0xb06   :  { %1863 = vpow2.f32 %v1722_v47 }
 0xb07   :  { %v1282_v38 = vsel %vm1281_vm4, %v1862_v56, %v1278_v11  ;;  %v1753_v56 = vld [vmem:[%s2563_s13 + $0x8] sm:$0xff]  ;;  %vm587_vm4 = vcmask 58368  }
 0xb08   :  { %1453 = vperm.xlu1 %1769, %v1247_v21   ;;  %1582 = vmatpush.bf16.msra.mxu1 %v1753_v56 }
 0xb0c   :  { %v1864_v49 = vpop.eup %1863  ;;  %1583 = vmatpush.bf16.msra.mxu1 %v1752_v14 }
 0xb0d   :  { %v1412_v48 = vadd.f32 1.0, %v1864_v49 }
 0xb0f   :  { %1865 = vrcp.f32 %v1412_v48  ;;  %vm1418_vm10 = vweird.f32 %v1412_v48 }
 0xb10   :  { %597 = vrot.lane.b32.xlu1 %v2217_v9, %s1928_s4  ;;  %v912_v9 = vpack.c.bf16 %v749_v37, %v749_v37 }
 0xb11   :  { %v1517_v17 = vpop.permute.xlu2 %1516 }
 0xb12   :  { %v1519_v6 = vmul.f32 %v1517_v17, %v1500_v27  ;;  %v914_v58 = vrot.slane %v912_v9, 7  ;;  %v2482_v27 = vsel %vm1284_vm5, %v1286_v26, %v1282_v38  ;;  %v826_v38 = vmul.f32 %v2278_v30, %v2314_v35 }
 0xb13   :  { %vm593_vm5 = vcmask 123968  }
 0xb14   :  { %1521 = vrot.lane.b32.xlu0 %v1519_v6, %s1924_s30  ;;  %v1422_v6 = vand.u32 2147483647, %v1412_v48 }
 0xb15   :  { %v1866_v33 = vpop.eup %1865 }
 0xb16   :  { %v1414_v39 = vmul.f32 %v1866_v33, %v1412_v48  ;;  %vm1419_vm8 = vweird.f32 %v1866_v33  ;;  %vm1423_vm12 = vcmp.eq.f32.partialorder %v1422_v6, 8.507059e+37 }
 0xb17   :  { %vm1420_vm11 = vmor %vm1418_vm10, %vm1419_vm8 }
 0xb18   :  { %923 = vrot.lane.b32.xlu1 %v922_v36, %s1933_s10  ;;  %v1415_v15 = vsub.f32 1.0, %v1414_v39 }
 0xb19   :  { %v2480_v22 = vpop.permute.xlu2 %1314 }
 0xb1a   :  { %v1416_v3 = vmul.f32 %v1866_v33, %v1415_v15 }
 0xb1c   :  { %1430 = vrot.lane.b32.xlu0 %v1428_v28, %s1927_s6  ;;  %v1417_v50 = vadd.f32 %v1866_v33, %v1416_v3 }
 0xb1e   :  { %v1421_v62 = vsel %vm1420_vm11, %v1866_v33, %v1417_v50 }
 0xb24   :  { %915 = vrot.lane.b32.xlu0 %v914_v58, %s1928_s4 }
 0xb2c   :  { %1241 = vrot.lane.b32.xlu0 %v1240_v5, %s1933_s10 }
 0xb44   :  { %v1292_v54 = vpop.permute.xlu2 %1291 }
 0xb45   :  { %v1294_v29 = vmul.f32 %v1292_v54, %v2482_v27 }
 0xb47   :  { %1296 = vrot.lane.b32.xlu0 %v1294_v29, %s1924_s30 }
 0xb4c   :  { %v606_v31 = vpop.permute.xlu2 %605 }
 0xb4d   :  { %609 = vst.msk [vmem:[#allocation4] sm:$0x8] %vm608_vm6, %v606_v31 }
 0xb54   :  { %v1234_v7 = vpop.permute.xlu2 %1233 }
 0xb72   :  { %v1379_v18 = vpop.permute.xlu1 %1378 }
 0xb73   :  { %v1381_v32 = vadd.f32 %v2438_v43, %v1379_v18  ;;  %v1424_v43 = vand.u32 2147483648, %v1412_v48 }
 0xb75   :  { %v1382_v63 = vmul.f32 %v1381_v32, %v2480_v22  ;;  %v1425_v37 = vor.u32 1.1754944e-38, %v1424_v43 }
 0xb77   :  { %v1536_v55 = vpack.c.bf16 %v1382_v63, %v1382_v63 }
 0xb79   :  { %v1538_v60 = vrot.slane %v1536_v55, 5 }
 0xb7a   :  { %v2491_v61 = vpop.permute.xlu1 %1453 }
 0xb7b   :  { %1539 = vrot.lane.b32.xlu1 %v1538_v60, %s1928_s4 }
 0xb82   :  { %v598_v1 = vpop.permute.xlu1 %597 }
 0xb83   :  { %601 = vst.msk [vmem:[#allocation4] sm:$0x1] %vm600_vm7, %v598_v1 }
 0xb86   :  { %v1522_v2 = vpop.permute.xlu0 %1521 }
 0xb87   :  { %v1524_v21 = vadd.f32 %v2444_v53, %v1522_v2  ;;  %v1426_v53 = vsel %vm1423_vm12, %v1425_v37, %v1421_v62 }
 0xb89   :  { %v1525_v17 = vmul.f32 %v1524_v21, %v2491_v61 }
 0xb8a   :  { %v924_v34 = vpop.permute.xlu1 %923 }
 0xb8b   :  { %v1544_v36 = vpack.c.bf16 %v1525_v17, %v1525_v17  ;;  %927 = vst.msk [vmem:[#allocation4] sm:$0x4] %vm926_vm9, %v924_v34 }
 0xb8c   :  { %1237 = vst.msk [vmem:[#allocation4] sm:$0x4] %vm1236_vm0, %v1234_v7 }
 0xb8d   :  { %1546 = vrot.lane.b32.xlu2 %v1544_v36, %s1933_s10 }
 0xb8e   :  { %v1431_v28 = vpop.permute.xlu0 %1430 }
 0xb8f   :  { %v1433_v9 = vmul.f32 %v1431_v28, %v1426_v53 }
 0xb91   :  { %1435 = vrot.lane.b32.xlu1 %v1433_v9, %s1924_s30 }
 0xb96   :  { %v916_v10 = vpop.permute.xlu0 %915 }
 0xb97   :  { %919 = vst.msk [vmem:[#allocation4] sm:$0x2] %vm918_vm13, %v916_v10 }
 0xb9e   :  { %v1242_v58 = vpop.permute.xlu0 %1241 }
 0xb9f   :  { %1245 = vst.msk [vmem:[#allocation4] sm:$0x2] %vm1244_vm14, %v1242_v58 }
 0xbb9   :  { %v1297_v12 = vpop.permute.xlu0 %1296 }
 0xbba   :  { %v1299_v13 = vadd.f32 %v1297_v12, %v2467_v4 }
 0xbbc   :  { %1867 = vtanh.f32 %v1299_v13 }
 0xbc2   :  { %v1868_v8 = vpop.eup %1867 }
 0xbc3   :  { %v1301_v5 = vsub.f32 %v2429_v52, %v1868_v8 }
 0xbc5   :  { %1303 = vrot.lane.b32.xlu2 %v1301_v5, %s1931_s0 }
 0xbe7   :  { %v1547_v44 = vpop.permute.xlu2 %1546 }
 0xbe8   :  { %1550 = vst.msk [vmem:[#allocation4] sm:$0x1] %vm1549_vm15, %v1547_v44 }
 0xbed   :  { %v1540_v4 = vpop.permute.xlu1 %1539 }
 0xbee   :  { %1543 = vst.msk [vmem:[#allocation4] sm:$0x8] %vm1542_vm2, %v1540_v4 }
 0xbf5   :  { %v1551_v52 = vld [vmem:[#allocation4] sm:$0xf] }
 0xbf6   :  { %1733 = vmatmul.msk.bf16.vlgmr.msra.gmra.mxu1 %vm1572_vm1, %v1551_v52 }
 0xc03   :  { %v1436_v20 = vpop.permute.xlu1 %1435 }
 0xc04   :  { %v1438_v11 = vadd.f32 %v1436_v20, %v2486_v42 }
 0xc06   :  { %1869 = vtanh.f32 %v1438_v11 }
 0xc0c   :  { %v1870_v24 = vpop.eup %1869 }
 0xc0d   :  { %v1440_v25 = vsub.f32 %v2412_v23, %v1870_v24  ;;  %v999_v23 = vmul.f32 %v2388_v57, %v2423_v16  ;;  %v681_v57 = vmul.f32 %v2292_v59, %v2330_v51 }
 0xc0f   :  { %1442 = vrot.lane.b32.xlu0 %v1440_v25, %s1931_s0 }
 0xc17   :  { %584 = vrot.lane.b32.xlu0 %v2245_v45, %s1929_s7  ;;  %v1774_v45 = vld [vmem:[%s2564_s14] ss:$0 sm:$0xff]  ;;  %s1934_s14 = smov [#allocation7]  }
 0xc1f   :  { %908 = vrot.lane.b32.xlu0 %v826_v38, %s1928_s4  ;;  %v1304_v26 = vpop.permute.xlu2 %1303 }
 0xc20   :  { %v1306_v54 = vmul.f32 %v1304_v26, %v2482_v27 }
 0xc22   :  { %1308 = vrot.lane.b32.xlu1 %v1306_v54, %s1927_s6 }
 0xc2a   :  { %590 = vrot.lane.b32.xlu1 %v2228_v0, %s1928_s4 }
 0xc32   :  { %1221 = vrot.lane.b32.xlu1 %v999_v23, %s1929_s7 }
 0xc73   :  { %v1585_v30 = vpop.f32.mrf.mxu1 }
 0xc74   :  { %v1586_v35 = vadd.f32 %v1774_v45, %v1585_v30 }
 0xc76   :  { %1590 = vst.msk [vmem:[#allocation7] sm:$0xff] %vm1589_vm3, %v1586_v35 }
 0xc7b   :  { %v1587_v29 = vpop.f32.mrf.mxu1 }
 0xc81   :  { %v1443_v27 = vpop.permute.xlu0 %1442 }
 0xc82   :  { %v1445_v31 = vmul.f32 %v1443_v27, %v1426_v53 }
 0xc84   :  { %1447 = vrot.lane.b32.xlu2 %v1445_v31, %s1927_s6  ;;  %s1607_s6 = sshll.u32 %s1934_s14, 4  ;;  %s1608_s6 = int_to_ptr.vmem [resolvable:$true] %s1607_s6 }
 0xc85   :  { %1612 = dma.vmem_to_hbm [thread:$0]  %s1608_s6, 128, %s1610_s11, [#allocation8]  }
 0xc89   :  { %v585_v0 = vpop.permute.xlu0 %584 }
 0xc8a   :  { %588 = vst.msk [vmem:[#allocation5] sm:$0x3] %vm587_vm4, %v585_v0 }
 0xc8c   :  { %903 = vrot.lane.b32.xlu2 %v681_v57, %s1929_s7 }
 0xc91   :  { %v909_v16 = vpop.permute.xlu0 %908 }
 0xc92   :  { %911 = vst.msk [vmem:[#allocation5 + $0x4] sm:$0x3] %vm593_vm5, %v909_v16 }
 0xc94   :  { %1226 = vrot.lane.b32.xlu2 %v1144_v40, %s1928_s4  ;;  %v1309_v42 = vpop.permute.xlu1 %1308 }
 0xc95   :  { %v1311_v46 = vadd.f32 %v1868_v8, %v1309_v42 }
 0xc97   :  { %v1317_v47 = vmul.f32 %v2480_v22, %v1311_v46 }
 0xc99   :  { %1527 = vrot.lane.b32.xlu0 %v1317_v47, %s1929_s7  ;;  %s1935_s7 = smov [#allocation5]  }
 0xc9a   :  { %s1596_s16 = sshll.u32 %s1935_s7, 4  ;;  %s1597_s16 = int_to_ptr.vmem [resolvable:$true] %s1596_s16 }
 0xc9c   :  { %v591_v59 = vpop.permute.xlu1 %590 }
 0xc9d   :  { %594 = vst.msk [vmem:[#allocation5 + $0x6] sm:$0x3] %vm593_vm5, %v591_v59 }
 0xca4   :  { %v1222_v51 = vpop.permute.xlu1 %1221 }
 0xca5   :  { %1224 = vst.msk [vmem:[#allocation5 + $0x4] sm:$0x3] %vm587_vm4, %v1222_v51 }
 0xcde   :  { %v1448_v41 = vpop.permute.xlu2 %1447 }
 0xcdf   :  { %v1450_v19 = vadd.f32 %v1870_v24, %v1448_v41 }
 0xce1   :  { %v1456_v22 = vmul.f32 %v2491_v61, %v1450_v19 }
 0xce3   :  { %1532 = vrot.lane.b32.xlu1 %v1456_v22, %s1928_s4 }
 0xce6   :  { %v904_v49 = vpop.permute.xlu2 %903 }
 0xce7   :  { %906 = vst.msk [vmem:[#allocation5 + $0x2] sm:$0x3] %vm587_vm4, %v904_v49 }
 0xcee   :  { %v1227_v48 = vpop.permute.xlu2 %1226 }
 0xcef   :  { %1229 = vst.msk [vmem:[#allocation5 + $0x2] sm:$0x3] %vm593_vm5, %v1227_v48 }
 0xd0b   :  { %v1528_v18 = vpop.permute.xlu0 %1527 }
 0xd0c   :  { %1530 = vst.msk [vmem:[#allocation5 + $0x6] sm:$0x3] %vm587_vm4, %v1528_v18 }
 0xd55   :  { %v1533_v32 = vpop.permute.xlu1 %1532 }
 0xd56   :  { %1535 = vst.msk [vmem:[#allocation5] sm:$0x3] %vm593_vm5, %v1533_v32 }
 0xd57   :  { %1601 = dma.vmem_to_hbm [thread:$0]  %s1597_s16, 128, %s1599_s2, [#allocation6]  }
 0xd58   :  { %1919 = dma.done.wait [#allocation6], 128  }
 0xd59   :  { %1920 = vsyncadd [#allocation6], 4294967168 }
 0xd5a   :  { %1921 = dma.done.wait [#allocation8], 128  }
 0xd5b   :  { %1922 = vsyncadd [#allocation8], 4294967168 }
 0xd5c   :  { %1621 = vsyncpa [#allocation6], 1 }
 0xd5d   :  { %1622 = vsyncpa [#allocation8], 1 }

</bundles_post_ra>
